<compile_context>
chip_gen: v6e
topology: v6e:2x2x1
jax: 0.10.0
libtpu: 0.0.40
codegen_flags: <defaults>
</compile_context>

<pallas_src>
import jax
import jax.numpy as jnp
from jax.experimental import pallas as pl
from jax.experimental.pallas import tpu as pltpu

_LANE = 128
_SLAB_BYTES = 128 * 1024        # per-slab relayout working set (~vreg-file sized)
_MIN_TILE_BYTES = 1024 * 1024   # don't shrink per-buffer tiles below ~1 MiB (85% BW knee)
_MIN_GRID_STEPS = 8             # >= 2-4 steps per TensorCore on v7x for pipelining


def _vmem_budget():
    """Generation-aware (per-buffer tile target bytes, vmem_limit_bytes)."""
    try:
        cap = int(pltpu.get_tpu_info().vmem_capacity_bytes)
    except Exception:
        cap = 64 * 1024 * 1024          # conservative fallback: assume v7x (64 MiB / TC)
    if cap >= 100 * 1024 * 1024:        # v5e / v6e: 128 MiB VMEM
        return 8 * 1024 * 1024, 80 * 1024 * 1024
    # v7x: 64 MiB per TensorCore.  4 MiB tiles -> 2 in + 2 out double buffers
    # = 16 MiB, leaving headroom for Mosaic internal scratch under 36 MiB.
    return 4 * 1024 * 1024, 36 * 1024 * 1024


def _pick_tiles(N, L, scale, itemsize, target_bytes):
    """Choose (G, L_blk) block sizes for the fused 2-D views.

    G     : rows of the fused (B*Cout) axis per output block (the input block
            gets G*scale rows).
    L_blk : lanes of the fused (H*W*D*T) axis per input block (the output block
            gets L_blk*scale lanes).

    Legality (last-two-dims rule): G / G*scale must be a multiple of the
    dtype's sublane tile or cover the full axis; L_blk must be a multiple of
    128 or equal L.  The grid uses pl.cdiv on both axes, so neither G nor
    L_blk has to divide the array extent (Pallas masks boundary blocks).
    """
    sub = 8 * max(1, 4 // max(1, itemsize))      # 8 (f32), 16 (bf16), 32 (int8)

    def tile_bytes(g, lb):
        return g * scale * lb * itemsize

    # Lane tile: as much of L as fits the budget with a single sublane row-group.
    if L <= _LANE:
        L_blk = L
    else:
        lb = (target_bytes // (sub * scale * itemsize)) // _LANE * _LANE
        L_blk = min(L, max(_LANE, lb))
        if L_blk < L:                            # keep 128-aligned when not full-axis
            L_blk = max(_LANE, (L_blk // _LANE) * _LANE)

    # Row tile: as many rows as still fit the budget (full axis if it all fits).
    if N <= sub:
        G = N
    else:
        g = (target_bytes // (scale * L_blk * itemsize)) // sub * sub
        G = N if g >= N else max(sub, g)

    # Ensure enough grid steps for software pipelining / megacore sharding.
    # Split the row axis first so each v7x core streams contiguous HBM ranges;
    # never shrink tiles below ~_MIN_TILE_BYTES just to add steps.
    def steps(g, lb):
        return pl.cdiv(N, g) * pl.cdiv(L, lb)

    while (steps(G, L_blk) < _MIN_GRID_STEPS
           and tile_bytes(G, L_blk) > 2 * _MIN_TILE_BYTES):
        if G > sub:
            G = max(sub, (G // 2) // sub * sub)
        elif L_blk > _LANE:
            L_blk = max(_LANE, (L_blk // 2) // _LANE * _LANE)
        else:
            break

    # Prefer an even number of grid steps so both v7x TensorCores get equal work.
    row_steps, lane_steps = pl.cdiv(N, G), pl.cdiv(L, L_blk)
    if (row_steps * lane_steps) % 2 == 1 and row_steps * lane_steps > 1 and N > sub:
        g_even = -(-pl.cdiv(N, row_steps + 1) // sub) * sub   # ceil to sublane multiple
        if g_even >= sub and pl.cdiv(N, g_even) % 2 == 0:
            G = g_even

    return G, L_blk


def _make_kernel(G, scale, L_blk, itemsize):
    """Kernel: x_ref (G*scale, L_blk) -> o_ref (G, L_blk*scale) interleave."""
    # Lane-slab width: keep each slab's working set near the vreg-file size so
    # the interleave never materializes a block-sized VMEM temp.
    slab = (_SLAB_BYTES // (G * scale * itemsize)) // _LANE * _LANE
    slab = min(L_blk, max(_LANE, slab))
    n_full = L_blk // slab
    rem = L_blk - n_full * slab

    def interleave(block, lanes):
        # block: (G*scale, lanes), rows ordered (g, r) with r fastest.
        # returns (G, lanes*scale) with out[g, i*scale + r] = block[g*scale + r, i].
        xv = block.reshape(G, scale, lanes)
        # TODO(synk): inspect the Mosaic dump; if this minor-dim swap lowers to a
        # generic XLU transpose (not a cheap lane interleave), switch to
        # pltpu.einshape("gsl->gls", xv); for bf16/scale==2 (int8/scale==4) add a
        # pltpu.bitcast / pltpu.pack_elementwise 32-bit packing path that needs
        # no vreg relayout at all (verify the within-word element order on HW).
        return jnp.swapaxes(xv, 1, 2).reshape(G, lanes * scale)

    def kernel(x_ref, o_ref):
        # Process the lane axis in static, 128-aligned slabs (fully unrolled so
        # the LLO scheduler sees the whole block): keeps the interleave in vregs
        # and limits vector-store pressure (v5e has a single vst slot).
        for s in range(n_full):
            src = s * slab
            o_ref[:, pl.ds(src * scale, slab * scale)] = interleave(
                x_ref[:, pl.ds(src, slab)], slab)
        if rem:
            src = n_full * slab
            o_ref[:, pl.ds(src * scale, rem * scale)] = interleave(
                x_ref[:, pl.ds(src, rem)], rem)

    return kernel


def time_shuffle(x, scale, *, block_rows=None, block_lanes=None):
    """Pallas TPU implementation of TimeShuffle.forward.

    x: (B, C, H, W, D, T) with C % scale == 0.
    returns: (B, C // scale, H, W, D, T * scale)

    block_rows / block_lanes override the auto-chosen tile sizes (testing/tuning).
    """
    B, C, H, W, D, T = x.shape
    if C % scale != 0:
        raise ValueError("in_channels must be divisible by scale")
    if scale == 1:
        return x

    Cout = C // scale
    N = B * Cout
    L = H * W * D * T
    itemsize = jnp.dtype(x.dtype).itemsize

    target_bytes, vmem_limit = _vmem_budget()
    G, L_blk = _pick_tiles(N, L, scale, itemsize, target_bytes)
    if block_rows is not None:
        G = block_rows
    if block_lanes is not None:
        L_blk = block_lanes
    grid = (pl.cdiv(N, G), pl.cdiv(L, L_blk))

    # Pure-metadata reshape to a lane-dense 2-D view:
    #   x2 row index = n*scale + r (n = b*Cout + c_out),
    #   out2[n, i*scale + r] == x2[n*scale + r, i], i = flattened (h, w, d, t).
    # TODO(synk): if a trace ever shows XLA inserting a copy around these
    # reshapes (non-default producer layout), feed the 6-D array directly and
    # collapse dims in the BlockSpec/index_map instead.
    x2 = x.reshape(N * scale, L)

    out2 = pl.pallas_call(
        _make_kernel(G, scale, L_blk, itemsize),
        out_shape=jax.ShapeDtypeStruct((N, L * scale), x.dtype),
        grid=grid,
        # TODO(synk): if an xprof/bundle check shows exposed input DMA at step
        # boundaries, add pipeline_mode=pl.Buffered(3) to the input spec only.
        in_specs=[pl.BlockSpec((G * scale, L_blk), lambda n, l: (n, l))],
        out_specs=pl.BlockSpec((G, L_blk * scale), lambda n, l: (n, l)),
        compiler_params=pltpu.CompilerParams(
            dimension_semantics=("parallel", "parallel"),
            vmem_limit_bytes=vmem_limit,
        ),
        cost_estimate=pl.CostEstimate(
            flops=0,
            transcendentals=0,
            bytes_accessed=2 * x.size * itemsize,   # pure bandwidth op
        ),
    )(x2)

    return out2.reshape(B, Cout, H, W, D, T * scale)


def _reference_time_shuffle(x, scale):
    # Pure-JAX reference mirroring the PyTorch module exactly.
    B, C, H, W, D, T = x.shape
    xv = x.reshape(B, C // scale, scale, H, W, D, T)
    out = jnp.transpose(xv, (0, 1, 3, 4, 5, 6, 2))
    return out.reshape(B, C // scale, H, W, D, T * scale)


if __name__ == "__main__":
    key = jax.random.PRNGKey(0)
    k1, k2 = jax.random.split(key)

    # 1) Small default-tiling case: (B, C, H, W, D, T), scale=2.
    B, C, H, W, D, T = 2, 4, 4, 4, 4, 8
    scale = 2
    x = jax.random.normal(k1, (B, C, H, W, D, T), dtype=jnp.float32)
    out = jax.block_until_ready(time_shuffle(x, scale))
    assert out.shape == (B, C // scale, H, W, D, T * scale), out.shape
    assert jnp.array_equal(out, _reference_time_shuffle(x, scale)), \
        "default-tiling output mismatch vs reference"

    # 2) Forced tiling that exercises the masked (cdiv) row boundary
    #    (N = 9 rows with 8-row blocks) and the multi-slab in-kernel loop
    #    (4096-lane block processed as two 2048-lane slabs).
    B2, C2, H2, W2, D2, T2 = 3, 6, 4, 4, 4, 64
    scale2 = 2
    x_b = jax.random.normal(k2, (B2, C2, H2, W2, D2, T2), dtype=jnp.float32)
    out_b = jax.block_until_ready(
        time_shuffle(x_b, scale2, block_rows=8, block_lanes=4096))
    assert out_b.shape == (B2, C2 // scale2, H2, W2, D2, T2 * scale2), out_b.shape
    assert jnp.array_equal(out_b, _reference_time_shuffle(x_b, scale2)), \
        "forced-tiling output mismatch vs reference"

    print("KERNEL_OK")
</pallas_src>

<mosaic_0001>
module attributes {stable_mosaic.version = 11 : i64} {
  func.func @kernel(%arg0: i32, %arg1: i32, %arg2: memref<8x512xf32, #tpu.memory_space<vmem>>, %arg3: memref<4x1024xf32, #tpu.memory_space<vmem>>) attributes {dimension_semantics = [#tpu.dimension_semantics<parallel>, #tpu.dimension_semantics<parallel>], iteration_bounds = array<i64: 1, 1>, scalar_prefetch = 0 : i64, scratch_operands = 0 : i64, tpu.core_type = #tpu.core_type<tc>, window_params = [{transform_indices = @transform_0, window_bounds = array<i64: 8, 512>}, {transform_indices = @transform_1, window_bounds = array<i64: 4, 1024>}]} {
    %c0 = arith.constant 0 : index
    %c0_0 = arith.constant 0 : index
    %0 = vector.load %arg2[%c0, %c0_0] : memref<8x512xf32, #tpu.memory_space<vmem>>, vector<8x512xf32>
    %1 = vector.shape_cast %0 : vector<8x512xf32> to vector<4x2x512xf32>
    %2 = tpu.transpose %1, [0, 2, 1] : vector<4x2x512xf32> -> vector<4x512x2xf32>
    %3 = vector.shape_cast %2 : vector<4x512x2xf32> to vector<4x1024xf32>
    %c0_1 = arith.constant 0 : index
    %c0_2 = arith.constant 0 : index
    %4 = vector.load %arg3[%c0_1, %c0_2] : memref<4x1024xf32, #tpu.memory_space<vmem>>, vector<4x1024xf32>
    tpu.vector_store %arg3[%c0_1, %c0_2], %3 {strides = array<i32>} : memref<4x1024xf32, #tpu.memory_space<vmem>>, vector<4x1024xf32>,
    return
  }
  func.func @transform_0(%arg0: i32, %arg1: i32) -> (i32, i32) {
    %c0_i32 = arith.constant 0 : i32
    return %arg0, %arg1 : i32, i32
  }
  func.func @transform_1(%arg0: i32, %arg1: i32) -> (i32, i32) {
    %c0_i32 = arith.constant 0 : i32
    return %arg0, %arg1 : i32, i32
  }
}

</mosaic_0001>

<bundles_post_ra>
// kernel: tpu_custom_call.1
= control target key start
LH: loop header
LB: loop body
LE: loop exit
PB: predicated region body
PF: predicated region fallthrough
CT: control target
= control target key end

     0   :  { %s11263_s0 = inlined_call_operand.hbm [shape: f32[8,512], index: 0, kind: input, shape index: {}]   ;;  %s11264_s1 = inlined_call_operand.hbm [shape: f32[4,1024], index: 1, kind: output, shape index: {}]  }
   0x1   :  { %11663 = sst [smem:[#allocation220_spill]] %s11264_s1 }
   0x2   :  { %6 = vsyncpa [#allocation3], 0 }
   0x3   :  { %7 = vsyncpa [#allocation4], 0  ;;  %s7753_s6 = smov [#allocation2]  }
   0x4   :  { %s14_s7 = sshll.u32 %s7753_s6, 4  ;;  %s15_s7 = int_to_ptr.vmem [resolvable:$true] %s14_s7 }
   0x5   :  { %s7717_s8 = scalar_lea.vmem %s15_s7, 512  ;;  %p7722_p1 = scmp.lt.s32.totalorder %s15_s7, %s15_s7 }
   0x6   :  { %p7718_p0 = scmp.ne.s32.totalorder %s15_s7, %s7717_s8  ;;  %p7723_p2 = scmp.lt.s32.totalorder %s7717_s8, %s7717_s8 }
   0x8   :  { %p7724_p3 = por %p7723_p2, %p7722_p1 }
   0xa   :  { %p7725_p4 = pnand %p7724_p3, %p7718_p0 }
   0xc   :  { %7728 = shalt.err (!%p7725_p4)
}
   0xd   :  { %17 = dma.hbm_to_vmem [thread:$0]  %s11263_s0, 512, %s15_s7, [#allocation3]  }
   0xe   :  { %7749 = dma.done.wait [#allocation3], 512  }
   0xf   :  { %7750 = vsyncadd [#allocation3], 4294966784  ;;  %v36_v0 = vlaneseq  ;;  %v7754_v1 = vmov 1983009808   ;;  %v7703_v6 = vld [vmem:[#allocation2 + $0x10] ss:$8 sps:$4 sm:$0xff]  }
  0x10   :  { %v34_v2 = vunpack.c.l.s4 %v7754_v1  ;;  %v7706_v8 = vld [vmem:[#allocation2] ss:$8 sps:$4 sm:$0xff]   ;;  %s11582_s0 = smov 4   ;;  %s11578_s11 = smov 6   ;;  %vm7029_vm0 = vcmask 15360   ;;  %vm7031_vm1 = vcmask 31744  }
  0x11   :  { %v7834_v3 = vshrl.u32 %v36_v0, 7  ;;  %s11576_s12 = smov 8   ;;  %s11584_s13 = smov 2   ;;  %vm7033_vm2 = vcmask 48128   ;;  %vm7035_vm3 = vcmask 64512   ;;  %vm7037_vm4 = vcmask 80896  }
  0x12   :  { %v35_v4 = vunpack.c.0.s8 %v34_v2  ;;  %s11574_s14 = smov 10   ;;  %s11572_s15 = smov 12   ;;  %vm7039_vm5 = vcmask 97280   ;;  %vm7041_vm6 = vcmask 113664   ;;  %vm7043_vm7 = vcmask 130048  }
  0x13   :  { %s11570_s16 = smov 14   ;;  %s11568_s17 = smov 16   ;;  %vm11649_vm8 = vcmask 146432   ;;  %vm11648_vm9 = vcmask 162816   ;;  %vm11647_vm10 = vcmask 179200   ;;  %vm11650_vm11 = vcmask 195584  }
  0x14   :  { %v7837_v5 = vsub.s32 %v35_v4, %v7834_v3  ;;  %s11566_s18 = smov 18   ;;  %s11564_s19 = smov 20   ;;  %vm11592_vm12 = vcmask 211968   ;;  %vm11593_vm13 = vcmask 228352   ;;  %vm11594_vm14 = vcmask 244736  }
  0x15   :  { %s11562_s20 = smov 22   ;;  %s11560_s21 = smov 24   ;;  %vm11595_vm15 = vcmask 261120  }
  0x16   :  { %v53_v7 = vrot.slane %v7703_v6, %v7837_v5  ;;  %v39_v10 = vrot.slane %v7706_v8, %v7837_v5  ;;  %s11558_s22 = smov 26   ;;  %s11556_s23 = smov 28  }
  0x17   :  { %s11554_s24 = smov 30   ;;  %s11552_s25 = smov 32  }
  0x18   :  { %v7631_v9 = vcombine.low %v53_v7, %v53_v7  ;;  %v61_v12 = vcombine.low %v39_v10, %v53_v7  ;;  %v62_v13 = vcombine.high %v39_v10, %v53_v7  ;;  %v7632_v43 = vcombine.high %v53_v7, %v53_v7  ;;  %v7705_v10 = vld [vmem:[#allocation2 + $0x14] ss:$8 sps:$4 sm:$0xff]   ;;  %s11550_s26 = smov 34   ;;  %s11548_s27 = smov 36  }
  0x19   :  { %s11546_s28 = smov 38   ;;  %s11543_s29 = smov 40  }
  0x1a   :  { %v79_v11 = vrot.slane %v7631_v9, %v7837_v5  ;;  %v72_v14 = vrot.slane %v61_v12, %v7837_v5  ;;  %v89_v17 = vrot.slane %v62_v13, %v7837_v5  ;;  %v96_v46 = vrot.slane %v7632_v43, %v7837_v5  ;;  %s11541_s30 = smov 42   ;;  %s11539_s2 = smov 44  }
  0x1b   :  { %s11537_s3 = smov 46   ;;  %s11529_s4 = smov 48  }
  0x1c   :  { %213 = vxpose.xlu1.b32.start.end [1/1] (short) %v79_v11, 128  ;;  %149 = vxpose.xlu0.b32.start.end [1/1] (short) %v72_v14, 128  ;;  %v81_v15 = vcombine.high %v79_v11, %v79_v11  ;;  %v80_v16 = vcombine.high %v72_v14, %v72_v14  ;;  %v97_v18 = vcombine.high %v89_v17, %v89_v17  ;;  %v7708_v11 = vld [vmem:[#allocation2 + $0x4] ss:$8 sps:$4 sm:$0xff]   ;;  %s11532_s5 = smov 50   ;;  %s11534_s6 = smov 52  }
  0x1d   :  { %v98_v49 = vcombine.high %v96_v46, %v96_v46  ;;  %s11448_s7 = smov 54   ;;  %s11444_s8 = smov 56  }
  0x1e   :  { %s11442_s9 = smov 58   ;;  %s11446_s10 = smov 60  }
  0x1f   :  { %s11926_s1 = smov 116  }
  0x59   :  { %245 = vxpose.xlu1.b32.start.end [1/1] (short) %v81_v15, 128  ;;  %181 = vxpose.xlu0.b32.start.end [1/1] (short) %v80_v16, 128  ;;  %v7952_v15 = vrot.slane %v7708_v11, %v7837_v5  ;;  %v7955_v16 = vrot.slane %v7705_v10, %v7837_v5 }
  0x5b   :  { %v63_v43 = vcombine.low %v7952_v15, %v7955_v16 }
  0x96   :  { %309 = vxpose.xlu1.b32.start.end [1/1] (short) %v97_v18, 128  ;;  %277 = vxpose.xlu0.b32.start.end [1/1] (short) %v89_v17, 128 }
  0x98   :  { %v7844_v19 = vpop.trf.xlu1  ;;  %v7846_v20 = vpop.trf.xlu0 }
  0x99   :  { %11664 = vst [vmem:[#allocation8_spill] sm:$0xff] %v7844_v19 }
  0x9c   :  { %v7848_v21 = vpop.trf.xlu1  ;;  %v7850_v22 = vpop.trf.xlu0 }
  0x9d   :  { %11665 = vst [vmem:[#allocation9_spill] sm:$0xff] %v7848_v21 }
  0xa0   :  { %v7852_v23 = vpop.trf.xlu1  ;;  %v7854_v24 = vpop.trf.xlu0 }
  0xa1   :  { %11666 = vst [vmem:[#allocation10_spill] sm:$0xff] %v7852_v23 }
  0xa4   :  { %v7856_v25 = vpop.trf.xlu1  ;;  %v7858_v26 = vpop.trf.xlu0 }
  0xa5   :  { %11667 = vst [vmem:[#allocation11_spill] sm:$0xff] %v7856_v25 }
  0xa8   :  { %v7860_v27 = vpop.trf.xlu1  ;;  %v7862_v28 = vpop.trf.xlu0 }
  0xa9   :  { %11668 = vst [vmem:[#allocation12_spill] sm:$0xff] %v7860_v27  ;;  %v7633_v27 = vcombine.low %v7955_v16, %v7955_v16 }
  0xab   :  { %v113_v21 = vrot.slane %v7633_v27, %v7837_v5 }
  0xac   :  { %v7864_v29 = vpop.trf.xlu1  ;;  %v7866_v30 = vpop.trf.xlu0 }
  0xad   :  { %11669 = vst [vmem:[#allocation13_spill] sm:$0xff] %v7864_v29 }
  0xb0   :  { %v7868_v31 = vpop.trf.xlu1  ;;  %v7870_v32 = vpop.trf.xlu0 }
  0xb1   :  { %11670 = vst [vmem:[#allocation14_spill] sm:$0xff] %v7868_v31 }
  0xb4   :  { %v7872_v33 = vpop.trf.xlu1  ;;  %v7874_v34 = vpop.trf.xlu0 }
  0xb5   :  { %11671 = vst [vmem:[#allocation15_spill] sm:$0xff] %v7872_v33 }
  0xb8   :  { %v7876_v35 = vpop.trf.xlu1  ;;  %v7878_v36 = vpop.trf.xlu0 }
  0xb9   :  { %11672 = vst [vmem:[#allocation16_spill] sm:$0xff] %v7876_v35 }
  0xbc   :  { %v7880_v37 = vpop.trf.xlu1  ;;  %v7882_v38 = vpop.trf.xlu0 }
  0xbd   :  { %11673 = vst [vmem:[#allocation17_spill] sm:$0xff] %v7880_v37 }
  0xc0   :  { %v7884_v39 = vpop.trf.xlu1  ;;  %v7886_v40 = vpop.trf.xlu0 }
  0xc1   :  { %11674 = vst [vmem:[#allocation18_spill] sm:$0xff] %v7884_v39 }
  0xc4   :  { %v7888_v41 = vpop.trf.xlu1  ;;  %v7890_v42 = vpop.trf.xlu0 }
  0xc5   :  { %11675 = vst [vmem:[#allocation19_spill] sm:$0xff] %v7888_v41 }
  0xc8   :  { %v7892_v44 = vpop.trf.xlu1  ;;  %v7894_v45 = vpop.trf.xlu0 }
  0xc9   :  { %11676 = vst [vmem:[#allocation20_spill] sm:$0xff] %v7892_v44 }
  0xcc   :  { %v7897_v47 = vpop.trf.xlu1  ;;  %v7899_v48 = vpop.trf.xlu0 }
  0xcd   :  { %11677 = vst [vmem:[#allocation21_spill] sm:$0xff] %v7897_v47 }
  0xd0   :  { %v7901_v50 = vpop.trf.xlu1  ;;  %v7903_v51 = vpop.trf.xlu0 }
  0xd1   :  { %11678 = vst [vmem:[#allocation22_spill] sm:$0xff] %v7901_v50  ;;  %11679 = vst [vmem:[#allocation23_spill] sm:$0xff] %v7903_v51 }
  0xd3   :  { %373 = vxpose.xlu1.b32.start.end [1/1] (short) %v98_v49, 128  ;;  %341 = vxpose.xlu0.b32.start.end [1/1] (short) %v96_v46, 128 }
  0xd4   :  { %v7905_v52 = vpop.trf.xlu1  ;;  %v7907_v53 = vpop.trf.xlu0 }
  0xd5   :  { %11680 = vst [vmem:[#allocation24_spill] sm:$0xff] %v7905_v52  ;;  %11681 = vst [vmem:[#allocation25_spill] sm:$0xff] %v7907_v53 }
  0xd8   :  { %v7909_v54 = vpop.trf.xlu1  ;;  %v7911_v55 = vpop.trf.xlu0 }
  0xd9   :  { %11682 = vst [vmem:[#allocation26_spill] sm:$0xff] %v7909_v54  ;;  %11683 = vst [vmem:[#allocation27_spill] sm:$0xff] %v7911_v55 }
  0xdc   :  { %v7913_v56 = vpop.trf.xlu1  ;;  %v7915_v57 = vpop.trf.xlu0 }
  0xdd   :  { %11684 = vst [vmem:[#allocation28_spill] sm:$0xff] %v7913_v56  ;;  %11685 = vst [vmem:[#allocation29_spill] sm:$0xff] %v7915_v57 }
  0xe0   :  { %v7917_v58 = vpop.trf.xlu1  ;;  %v7919_v59 = vpop.trf.xlu0 }
  0xe1   :  { %11686 = vst [vmem:[#allocation30_spill] sm:$0xff] %v7917_v58  ;;  %11687 = vst [vmem:[#allocation31_spill] sm:$0xff] %v7919_v59 }
  0xe4   :  { %v7921_v60 = vpop.trf.xlu1  ;;  %v7923_v61 = vpop.trf.xlu0 }
  0xe5   :  { %11688 = vst [vmem:[#allocation32_spill] sm:$0xff] %v7921_v60  ;;  %11689 = vst [vmem:[#allocation33_spill] sm:$0xff] %v7923_v61 }
  0xe8   :  { %v7925_v62 = vpop.trf.xlu1  ;;  %v7927_v63 = vpop.trf.xlu0 }
  0xe9   :  { %11690 = vst [vmem:[#allocation34_spill] sm:$0xff] %v7925_v62  ;;  %11691 = vst [vmem:[#allocation35_spill] sm:$0xff] %v7927_v63 }
  0xec   :  { %v7929_v0 = vpop.trf.xlu1  ;;  %v7931_v1 = vpop.trf.xlu0 }
  0xed   :  { %11692 = vst [vmem:[#allocation36_spill] sm:$0xff] %v7929_v0  ;;  %11693 = vst [vmem:[#allocation37_spill] sm:$0xff] %v7931_v1 }
  0xf0   :  { %v7933_v2 = vpop.trf.xlu1  ;;  %v7935_v4 = vpop.trf.xlu0 }
  0xf1   :  { %11694 = vst [vmem:[#allocation38_spill] sm:$0xff] %v7933_v2  ;;  %11695 = vst [vmem:[#allocation39_spill] sm:$0xff] %v7935_v4 }
  0xf4   :  { %v7937_v6 = vpop.trf.xlu1  ;;  %v7939_v7 = vpop.trf.xlu0 }
  0xf5   :  { %11696 = vst [vmem:[#allocation40_spill] sm:$0xff] %v7937_v6  ;;  %11697 = vst [vmem:[#allocation41_spill] sm:$0xff] %v7939_v7 }
  0xf8   :  { %v7941_v8 = vpop.trf.xlu1  ;;  %v7943_v9 = vpop.trf.xlu0 }
  0xf9   :  { %11698 = vst [vmem:[#allocation42_spill] sm:$0xff] %v7941_v8  ;;  %11699 = vst [vmem:[#allocation43_spill] sm:$0xff] %v7943_v9 }
  0xfc   :  { %v7945_v12 = vpop.trf.xlu1  ;;  %v7947_v13 = vpop.trf.xlu0 }
  0xfd   :  { %11700 = vst [vmem:[#allocation44_spill] sm:$0xff] %v7945_v12  ;;  %11701 = vst [vmem:[#allocation45_spill] sm:$0xff] %v7947_v13  ;;  %v106_v12 = vrot.slane %v63_v43, %v7837_v5 }
  0xff   :  { %v114_v8 = vcombine.high %v106_v12, %v106_v12 }
 0x100   :  { %v7949_v14 = vpop.trf.xlu1  ;;  %v7957_v17 = vpop.trf.xlu0 }
 0x101   :  { %11702 = vst [vmem:[#allocation46_spill] sm:$0xff] %v7949_v14  ;;  %11703 = vst [vmem:[#allocation47_spill] sm:$0xff] %v7957_v17 }
 0x104   :  { %v7959_v18 = vpop.trf.xlu1  ;;  %v7963_v46 = vpop.trf.xlu0 }
 0x105   :  { %11704 = vst [vmem:[#allocation48_spill] sm:$0xff] %v7959_v18  ;;  %11705 = vst [vmem:[#allocation49_spill] sm:$0xff] %v7963_v46 }
 0x108   :  { %v7965_v49 = vpop.trf.xlu1  ;;  %v7968_v14 = vpop.trf.xlu0 }
 0x109   :  { %11706 = vst [vmem:[#allocation50_spill] sm:$0xff] %v7965_v49  ;;  %11707 = vst [vmem:[#allocation51_spill] sm:$0xff] %v7968_v14 }
 0x10c   :  { %v7970_v11 = vpop.trf.xlu1  ;;  %v7972_v10 = vpop.trf.xlu0 }
 0x10d   :  { %11708 = vst [vmem:[#allocation52_spill] sm:$0xff] %v7970_v11  ;;  %11709 = vst [vmem:[#allocation53_spill] sm:$0xff] %v7972_v10 }
 0x110   :  { %v7974_v6 = vpop.trf.xlu1  ;;  %437 = vxpose.xlu1.b32.start.end [1/1] (short) %v114_v8, 128  ;;  %v7976_v18 = vpop.trf.xlu0  ;;  %405 = vxpose.xlu0.b32.start.end [1/1] (short) %v106_v12, 128 }
 0x111   :  { %11710 = vst [vmem:[#allocation54_spill] sm:$0xff] %v7974_v6  ;;  %11711 = vst [vmem:[#allocation55_spill] sm:$0xff] %v7976_v18  ;;  %v115_v18 = vcombine.high %v113_v21, %v113_v21 }
 0x114   :  { %v7978_v2 = vpop.trf.xlu1  ;;  %v7980_v0 = vpop.trf.xlu0 }
 0x115   :  { %11712 = vst [vmem:[#allocation56_spill] sm:$0xff] %v7978_v2  ;;  %11713 = vst [vmem:[#allocation57_spill] sm:$0xff] %v7980_v0 }
 0x118   :  { %v7982_v49 = vpop.trf.xlu1  ;;  %v7984_v43 = vpop.trf.xlu0 }
 0x119   :  { %11714 = vst [vmem:[#allocation58_spill] sm:$0xff] %v7982_v49 }
 0x11c   :  { %v7986_v62 = vpop.trf.xlu1  ;;  %v7988_v11 = vpop.trf.xlu0 }
 0x11d   :  { %11715 = vst [vmem:[#allocation59_spill] sm:$0xff] %v7986_v62 }
 0x120   :  { %v7990_v60 = vpop.trf.xlu1  ;;  %v7992_v58 = vpop.trf.xlu0 }
 0x121   :  { %11716 = vst [vmem:[#allocation60_spill] sm:$0xff] %v7990_v60 }
 0x124   :  { %v7994_v8 = vpop.trf.xlu1  ;;  %v7996_v6 = vpop.trf.xlu0 }
 0x125   :  { %11717 = vst [vmem:[#allocation61_spill] sm:$0xff] %v7994_v8 }
 0x128   :  { %v7998_v12 = vpop.trf.xlu1  ;;  %v8000_v2 = vpop.trf.xlu0 }
 0x129   :  { %11718 = vst [vmem:[#allocation62_spill] sm:$0xff] %v7998_v12 }
 0x12c   :  { %v8002_v56 = vpop.trf.xlu1  ;;  %v8004_v54 = vpop.trf.xlu0 }
 0x12d   :  { %11719 = vst [vmem:[#allocation63_spill] sm:$0xff] %v8002_v56 }
 0x130   :  { %v8006_v52 = vpop.trf.xlu1  ;;  %v8008_v50 = vpop.trf.xlu0 }
 0x131   :  { %11720 = vst [vmem:[#allocation64_spill] sm:$0xff] %v8006_v52 }
 0x134   :  { %v8010_v47 = vpop.trf.xlu1  ;;  %v8012_v44 = vpop.trf.xlu0 }
 0x135   :  { %11721 = vst [vmem:[#allocation65_spill] sm:$0xff] %v8010_v47 }
 0x138   :  { %v8014_v41 = vpop.trf.xlu1  ;;  %v8016_v39 = vpop.trf.xlu0 }
 0x139   :  { %11722 = vst [vmem:[#allocation66_spill] sm:$0xff] %v8014_v41 }
 0x13c   :  { %v8018_v37 = vpop.trf.xlu1  ;;  %v8020_v35 = vpop.trf.xlu0 }
 0x13d   :  { %11723 = vst [vmem:[#allocation67_spill] sm:$0xff] %v8018_v37 }
 0x140   :  { %v8022_v33 = vpop.trf.xlu1  ;;  %v8024_v31 = vpop.trf.xlu0 }
 0x141   :  { %11724 = vst [vmem:[#allocation68_spill] sm:$0xff] %v8022_v33 }
 0x144   :  { %v8026_v29 = vpop.trf.xlu1  ;;  %v8030_v25 = vpop.trf.xlu0 }
 0x145   :  { %11725 = vst [vmem:[#allocation69_spill] sm:$0xff] %v8026_v29 }
 0x148   :  { %v8032_v23 = vpop.trf.xlu1  ;;  %v8035_v19 = vpop.trf.xlu0 }
 0x149   :  { %11726 = vst [vmem:[#allocation70_spill] sm:$0xff] %v8032_v23 }
 0x14c   :  { %v8037_v0 = vpop.trf.xlu1  ;;  %v8039_v10 = vpop.trf.xlu0 }
 0x14d   :  { %11727 = vst [vmem:[#allocation71_spill] sm:$0xff] %v8037_v0 }
 0x150   :  { %v8041_v14 = vpop.trf.xlu1  ;;  %501 = vxpose.xlu1.b32.start.end [1/1] (short) %v115_v18, 128  ;;  %v8043_v46 = vpop.trf.xlu0  ;;  %469 = vxpose.xlu0.b32.start.end [1/1] (short) %v113_v21, 128 }
 0x151   :  { %11728 = vst [vmem:[#allocation72_spill] sm:$0xff] %v8041_v14  ;;  %11729 = vst [vmem:[#allocation73_spill] sm:$0xff] %v8043_v46 }
 0x154   :  { %v8045_v29 = vpop.trf.xlu1  ;;  %v8047_v17 = vpop.trf.xlu0 }
 0x155   :  { %11730 = vst [vmem:[#allocation74_spill] sm:$0xff] %v8045_v29  ;;  %11731 = vst [vmem:[#allocation75_spill] sm:$0xff] %v8047_v17  ;;  %v11824_v17 = vmov 0.0  }
 0x158   :  { %v8049_v23 = vpop.trf.xlu1  ;;  %v8051_v27 = vpop.trf.xlu0 }
 0x159   :  { %11732 = vst [vmem:[#allocation76_spill] sm:$0xff] %v8049_v23  ;;  %11733 = vst [vmem:[#allocation77_spill] sm:$0xff] %v8051_v27 }
 0x15c   :  { %v8053_v33 = vpop.trf.xlu1  ;;  %v8055_v0 = vpop.trf.xlu0 }
 0x15d   :  { %11734 = vst [vmem:[#allocation78_spill] sm:$0xff] %v8053_v33  ;;  %11735 = vst [vmem:[#allocation79_spill] sm:$0xff] %v8055_v0 }
 0x160   :  { %v8057_v13 = vpop.trf.xlu1  ;;  %v8059_v37 = vpop.trf.xlu0 }
 0x161   :  { %11736 = vst [vmem:[#allocation80_spill] sm:$0xff] %v8057_v13  ;;  %11737 = vst [vmem:[#allocation81_spill] sm:$0xff] %v8059_v37 }
 0x164   :  { %v8061_v18 = vpop.trf.xlu1  ;;  %v8063_v14 = vpop.trf.xlu0 }
 0x165   :  { %11738 = vst [vmem:[#allocation82_spill] sm:$0xff] %v8061_v18  ;;  %11739 = vst [vmem:[#allocation83_spill] sm:$0xff] %v8063_v14 }
 0x168   :  { %v8065_v21 = vpop.trf.xlu1  ;;  %v8067_v29 = vpop.trf.xlu0 }
 0x169   :  { %11740 = vst [vmem:[#allocation84_spill] sm:$0xff] %v8065_v21  ;;  %11741 = vst [vmem:[#allocation85_spill] sm:$0xff] %v8067_v29 }
 0x16c   :  { %v8069_v9 = vpop.trf.xlu1  ;;  %v8071_v23 = vpop.trf.xlu0 }
 0x16d   :  { %11742 = vst [vmem:[#allocation86_spill] sm:$0xff] %v8069_v9  ;;  %11743 = vst [vmem:[#allocation87_spill] sm:$0xff] %v8071_v23 }
 0x170   :  { %v8073_v27 = vpop.trf.xlu1  ;;  %v8075_v33 = vpop.trf.xlu0 }
 0x171   :  { %11744 = vst [vmem:[#allocation88_spill] sm:$0xff] %v8073_v27  ;;  %11745 = vst [vmem:[#allocation89_spill] sm:$0xff] %v8075_v33  ;;  %v64_v27 = vcombine.high %v7952_v15, %v7955_v16 }
 0x174   :  { %v8077_v0 = vpop.trf.xlu1  ;;  %v8079_v13 = vpop.trf.xlu0 }
 0x175   :  { %11746 = vst [vmem:[#allocation90_spill] sm:$0xff] %v8077_v0  ;;  %11747 = vst [vmem:[#allocation91_spill] sm:$0xff] %v8079_v13 }
 0x178   :  { %v8081_v37 = vpop.trf.xlu1  ;;  %v8083_v18 = vpop.trf.xlu0 }
 0x179   :  { %11748 = vst [vmem:[#allocation92_spill] sm:$0xff] %v8081_v37  ;;  %11749 = vst [vmem:[#allocation93_spill] sm:$0xff] %v8083_v18  ;;  %v123_v37 = vrot.slane %v64_v27, %v7837_v5 }
 0x17c   :  { %v8085_v14 = vpop.trf.xlu1  ;;  %v8087_v21 = vpop.trf.xlu0 }
 0x17d   :  { %11750 = vst [vmem:[#allocation94_spill] sm:$0xff] %v8085_v14  ;;  %11751 = vst [vmem:[#allocation95_spill] sm:$0xff] %v8087_v21  ;;  %v131_v21 = vcombine.high %v123_v37, %v123_v37 }
 0x180   :  { %v8089_v29 = vpop.trf.xlu1  ;;  %v8091_v9 = vpop.trf.xlu0 }
 0x181   :  { %11752 = vst [vmem:[#allocation96_spill] sm:$0xff] %v8089_v29  ;;  %11753 = vst [vmem:[#allocation97_spill] sm:$0xff] %v8091_v9 }
 0x184   :  { %v8093_v23 = vpop.trf.xlu1  ;;  %v8097_v0 = vpop.trf.xlu0 }
 0x185   :  { %11754 = vst [vmem:[#allocation98_spill] sm:$0xff] %v8093_v23  ;;  %11755 = vst [vmem:[#allocation99_spill] sm:$0xff] %v8097_v0 }
 0x188   :  { %v8099_v13 = vpop.trf.xlu1  ;;  %v8102_v18 = vpop.trf.xlu0 }
 0x189   :  { %11756 = vst [vmem:[#allocation100_spill] sm:$0xff] %v8099_v13  ;;  %11757 = vst [vmem:[#allocation101_spill] sm:$0xff] %v8102_v18 }
 0x18c   :  { %v8104_v14 = vpop.trf.xlu1  ;;  %v8106_v33 = vpop.trf.xlu0 }
 0x18d   :  { %11758 = vst [vmem:[#allocation102_spill] sm:$0xff] %v8104_v14  ;;  %11759 = vst [vmem:[#allocation103_spill] sm:$0xff] %v8106_v33 }
 0x190   :  { %v8108_v29 = vpop.trf.xlu1  ;;  %565 = vxpose.xlu1.b32.start.end [1/1] (short) %v131_v21, 128  ;;  %v8110_v23 = vpop.trf.xlu0  ;;  %533 = vxpose.xlu0.b32.start.end [1/1] (short) %v123_v37, 128 }
 0x191   :  { %11760 = vst [vmem:[#allocation104_spill] sm:$0xff] %v8108_v29  ;;  %11761 = vst [vmem:[#allocation105_spill] sm:$0xff] %v8110_v23 }
 0x194   :  { %v8112_v15 = vpop.trf.xlu1  ;;  %v8114_v0 = vpop.trf.xlu0 }
 0x195   :  { %11762 = vst [vmem:[#allocation106_spill] sm:$0xff] %v8112_v15  ;;  %11763 = vst [vmem:[#allocation107_spill] sm:$0xff] %v8114_v0 }
 0x198   :  { %v8116_v13 = vpop.trf.xlu1  ;;  %v8118_v27 = vpop.trf.xlu0 }
 0x199   :  { %11764 = vst [vmem:[#allocation108_spill] sm:$0xff] %v8116_v13 }
 0x19c   :  { %v8120_v18 = vpop.trf.xlu1  ;;  %v8122_v14 = vpop.trf.xlu0 }
 0x19d   :  { %11765 = vst [vmem:[#allocation109_spill] sm:$0xff] %v8120_v18 }
 0x1a0   :  { %v8124_v9 = vpop.trf.xlu1  ;;  %v8126_v33 = vpop.trf.xlu0 }
 0x1a1   :  { %11766 = vst [vmem:[#allocation110_spill] sm:$0xff] %v8124_v9 }
 0x1a4   :  { %v8128_v21 = vpop.trf.xlu1  ;;  %v8130_v29 = vpop.trf.xlu0 }
 0x1a5   :  { %11767 = vst [vmem:[#allocation111_spill] sm:$0xff] %v8128_v21 }
 0x1a8   :  { %v8132_v37 = vpop.trf.xlu1  ;;  %v8134_v15 = vpop.trf.xlu0 }
 0x1a9   :  { %11768 = vst [vmem:[#allocation112_spill] sm:$0xff] %v8132_v37 }
 0x1ac   :  { %v8136_v0 = vpop.trf.xlu1  ;;  %v8138_v23 = vpop.trf.xlu0 }
 0x1ad   :  { %11769 = vst [vmem:[#allocation113_spill] sm:$0xff] %v8136_v0 }
 0x1b0   :  { %v8140_v41 = vpop.trf.xlu1  ;;  %v8142_v7 = vpop.trf.xlu0 }
 0x1b1   :  { %11770 = vst [vmem:[#allocation114_spill] sm:$0xff] %v8140_v41  ;;  %v7634_v41 = vcombine.high %v7955_v16, %v7955_v16 }
 0x1b4   :  { %v8144_v47 = vpop.trf.xlu1  ;;  %v8146_v4 = vpop.trf.xlu0 }
 0x1b5   :  { %11771 = vst [vmem:[#allocation115_spill] sm:$0xff] %v8144_v47 }
 0x1b8   :  { %v8148_v52 = vpop.trf.xlu1  ;;  %v8150_v1 = vpop.trf.xlu0 }
 0x1b9   :  { %11772 = vst [vmem:[#allocation116_spill] sm:$0xff] %v8148_v52  ;;  %v130_v52 = vrot.slane %v7634_v41, %v7837_v5 }
 0x1bb   :  { %v132_v8 = vcombine.high %v130_v52, %v130_v52 }
 0x1bc   :  { %v8152_v56 = vpop.trf.xlu1  ;;  %v8154_v63 = vpop.trf.xlu0 }
 0x1bd   :  { %11773 = vst [vmem:[#allocation117_spill] sm:$0xff] %v8152_v56 }
 0x1c0   :  { %v8156_v37 = vpop.trf.xlu1  ;;  %v8158_v0 = vpop.trf.xlu0 }
 0x1c1   :  { %11774 = vst [vmem:[#allocation118_spill] sm:$0xff] %v8156_v37 }
 0x1c4   :  { %v8160_v12 = vpop.trf.xlu1  ;;  %v8164_v47 = vpop.trf.xlu0 }
 0x1c5   :  { %11775 = vst [vmem:[#allocation119_spill] sm:$0xff] %v8160_v12 }
 0x1c8   :  { %v8166_v61 = vpop.trf.xlu1  ;;  %v8169_v21 = vpop.trf.xlu0 }
 0x1c9   :  { %11776 = vst [vmem:[#allocation120_spill] sm:$0xff] %v8166_v61 }
 0x1cc   :  { %v8171_v56 = vpop.trf.xlu1  ;;  %v8173_v59 = vpop.trf.xlu0 }
 0x1cd   :  { %11777 = vst [vmem:[#allocation121_spill] sm:$0xff] %v8171_v56 }
 0x1d0   :  { %v8175_v37 = vpop.trf.xlu1  ;;  %629 = vxpose.xlu1.b32.start.end [1/1] (short) %v132_v8, 128  ;;  %v8177_v12 = vpop.trf.xlu0  ;;  %597 = vxpose.xlu0.b32.start.end [1/1] (short) %v130_v52, 128 }
 0x1d1   :  { %11778 = vst [vmem:[#allocation122_spill] sm:$0xff] %v8175_v37  ;;  %11779 = vst [vmem:[#allocation123_spill] sm:$0xff] %v8177_v12 }
 0x1d4   :  { %v8179_v16 = vpop.trf.xlu1  ;;  %v8181_v9 = vpop.trf.xlu0 }
 0x1d5   :  { %11780 = vst [vmem:[#allocation124_spill] sm:$0xff] %v8179_v16  ;;  %11781 = vst [vmem:[#allocation125_spill] sm:$0xff] %v8181_v9 }
 0x1d8   :  { %v8183_v61 = vpop.trf.xlu1  ;;  %v8185_v41 = vpop.trf.xlu0 }
 0x1d9   :  { %11782 = vst [vmem:[#allocation126_spill] sm:$0xff] %v8183_v61  ;;  %11783 = vst [vmem:[#allocation127_spill] sm:$0xff] %v8185_v41 }
 0x1dc   :  { %v8187_v60 = vpop.trf.xlu1  ;;  %v8189_v56 = vpop.trf.xlu0 }
 0x1dd   :  { %11784 = vst [vmem:[#allocation128_spill] sm:$0xff] %v8187_v60  ;;  %11785 = vst [vmem:[#allocation129_spill] sm:$0xff] %v8189_v56 }
 0x1e0   :  { %v8191_v57 = vpop.trf.xlu1  ;;  %v8193_v18 = vpop.trf.xlu0 }
 0x1e1   :  { %11786 = vst [vmem:[#allocation130_spill] sm:$0xff] %v8191_v57  ;;  %11787 = vst [vmem:[#allocation131_spill] sm:$0xff] %v8193_v18 }
 0x1e4   :  { %v8195_v8 = vpop.trf.xlu1  ;;  %v8197_v37 = vpop.trf.xlu0 }
 0x1e5   :  { %11788 = vst [vmem:[#allocation132_spill] sm:$0xff] %v8195_v8  ;;  %11789 = vst [vmem:[#allocation133_spill] sm:$0xff] %v8197_v37 }
 0x1e8   :  { %v8199_v52 = vpop.trf.xlu1  ;;  %v8201_v16 = vpop.trf.xlu0 }
 0x1e9   :  { %11790 = vst [vmem:[#allocation134_spill] sm:$0xff] %v8199_v52  ;;  %11791 = vst [vmem:[#allocation135_spill] sm:$0xff] %v8201_v16 }
 0x1ec   :  { %v8203_v62 = vpop.trf.xlu1  ;;  %v8205_v61 = vpop.trf.xlu0 }
 0x1ed   :  { %11792 = vst [vmem:[#allocation136_spill] sm:$0xff] %v8203_v62  ;;  %11793 = vst [vmem:[#allocation137_spill] sm:$0xff] %v8205_v61 }
 0x1f0   :  { %v8207_v41 = vpop.trf.xlu1  ;;  %v8209_v60 = vpop.trf.xlu0 }
 0x1f1   :  { %11794 = vst [vmem:[#allocation138_spill] sm:$0xff] %v8207_v41  ;;  %11795 = vst [vmem:[#allocation139_spill] sm:$0xff] %v8209_v60 }
 0x1f4   :  { %v8211_v56 = vpop.trf.xlu1  ;;  %v8213_v57 = vpop.trf.xlu0 }
 0x1f5   :  { %11796 = vst [vmem:[#allocation140_spill] sm:$0xff] %v8211_v56  ;;  %11797 = vst [vmem:[#allocation141_spill] sm:$0xff] %v8213_v57 }
 0x1f8   :  { %v8215_v18 = vpop.trf.xlu1  ;;  %v8217_v8 = vpop.trf.xlu0 }
 0x1f9   :  { %11798 = vst [vmem:[#allocation142_spill] sm:$0xff] %v8215_v18  ;;  %11799 = vst [vmem:[#allocation143_spill] sm:$0xff] %v8217_v8 }
 0x1fc   :  { %v8219_v37 = vpop.trf.xlu1  ;;  %v8221_v52 = vpop.trf.xlu0 }
 0x1fd   :  { %11800 = vst [vmem:[#allocation144_spill] sm:$0xff] %v8219_v37  ;;  %11801 = vst [vmem:[#allocation145_spill] sm:$0xff] %v8221_v52 }
 0x200   :  { %v8223_v16 = vpop.trf.xlu1  ;;  %v8225_v62 = vpop.trf.xlu0 }
 0x201   :  { %11802 = vst [vmem:[#allocation146_spill] sm:$0xff] %v8223_v16  ;;  %11803 = vst [vmem:[#allocation147_spill] sm:$0xff] %v8225_v62 }
 0x204   :  { %v8227_v61 = vpop.trf.xlu1  ;;  %v8229_v41 = vpop.trf.xlu0 }
 0x205   :  { %11804 = vst [vmem:[#allocation148_spill] sm:$0xff] %v8227_v61  ;;  %11805 = vst [vmem:[#allocation149_spill] sm:$0xff] %v8229_v41 }
 0x208   :  { %v8231_v60 = vpop.trf.xlu1  ;;  %v8233_v56 = vpop.trf.xlu0 }
 0x209   :  { %11806 = vst [vmem:[#allocation150_spill] sm:$0xff] %v8231_v60  ;;  %11807 = vst [vmem:[#allocation151_spill] sm:$0xff] %v8233_v56  ;;  %v7755_v56 = vmov 1934713408  }
 0x20a   :  { %v696_v55 = vunpack.c.l.s4 %v7755_v56 }
 0x20c   :  { %v8235_v57 = vpop.trf.xlu1  ;;  %v8237_v18 = vpop.trf.xlu0 }
 0x20d   :  { %11808 = vst [vmem:[#allocation152_spill] sm:$0xff] %v8235_v57  ;;  %11809 = vst [vmem:[#allocation153_spill] sm:$0xff] %v8237_v18  ;;  %v661_v57 = vcombine.low %v7846_v20, %v8118_v27 }
 0x210   :  { %v8239_v8 = vpop.trf.xlu1  ;;  %v8241_v37 = vpop.trf.xlu0 }
 0x211   :  { %11810 = vst [vmem:[#allocation154_spill] sm:$0xff] %v8239_v8  ;;  %11811 = vst [vmem:[#allocation155_spill] sm:$0xff] %v8241_v37 }
 0x214   :  { %v8243_v52 = vpop.trf.xlu1  ;;  %v8245_v16 = vpop.trf.xlu0 }
 0x215   :  { %11812 = vst [vmem:[#allocation156_spill] sm:$0xff] %v8243_v52  ;;  %11813 = vst [vmem:[#allocation157_spill] sm:$0xff] %v8245_v16  ;;  %v697_v52 = vunpack.c.0.s8 %v696_v55  ;;  %v669_v16 = vrot.slane %v661_v57, %v7837_v5 }
 0x217   :  { %v8264_v56 = vsub.s32 %v697_v52, %v7834_v3  ;;  %v11417_v52 = vmov 0.0  }
 0x218   :  { %v8247_v62 = vpop.trf.xlu1  ;;  %v549_v61 = vpop.trf.xlu0 }
 0x219   :  { %11814 = vst [vmem:[#allocation158_spill] sm:$0xff] %v8247_v62  ;;  %v677_v41 = vcombine.low %v7984_v43, %v549_v61  ;;  %v678_v49 = vcombine.high %v7984_v43, %v549_v61 }
 0x21b   :  { %v685_v8 = vrot.slane %v677_v41, %v7837_v5  ;;  %v692_v41 = vrot.slane %v678_v49, %v7837_v5 }
 0x21c   :  { %v8250_v60 = vpop.trf.xlu1  ;;  %v550_v18 = vpop.trf.xlu0 }
 0x21d   :  { %11815 = vst [vmem:[#allocation159_spill] sm:$0xff] %v8250_v60  ;;  %v694_v62 = vcombine.high %v669_v16, %v685_v8  ;;  %v662_v60 = vcombine.high %v7846_v20, %v8118_v27 }
 0x21f   :  { %v708_v57 = vrot.slane %v694_v62, %v8264_v56  ;;  %v693_v62 = vcombine.low %v669_v16, %v685_v8  ;;  %v729_v8 = vcombine.low %v7850_v22, %v8122_v14 }
 0x220   :  { %v8255_v37 = vpop.trf.xlu1  ;;  %v8258_v13 = vpop.trf.xlu0 }
 0x221   :  { %11816 = vst [vmem:[#allocation160_spill] sm:$0xff] %v8255_v37  ;;  %v676_v37 = vrot.slane %v662_v60, %v7837_v5  ;;  %v726_v20 = vcombine.high %v708_v57, %v11417_v52  ;;  %v745_v52 = vcombine.low %v7988_v11, %v550_v18 }
 0x223   :  { %v709_v3 = vcombine.low %v676_v37, %v692_v41 }
 0x224   :  { %v8261_v53 = vpop.trf.xlu1  ;;  %v8268_v9 = vpop.trf.xlu0 }
 0x225   :  { %11817 = vst [vmem:[#allocation161_spill] sm:$0xff] %v8261_v53  ;;  %v717_v60 = vrot.slane %v709_v3, %v8264_v56 }
 0x227   :  { %v727_v3 = vcombine.high %v717_v60, %v11824_v17 }
 0x228   :  { %v8271_v55 = vpop.trf.xlu1  ;;  %v8275_v61 = vpop.trf.xlu0 }
 0x229   :  { %11818 = vst [vmem:[#allocation162_spill] sm:$0xff] %v8271_v55 }
 0x22a   :  { %5018 = vrot.lane.b32.xlu1 %v708_v57, %s11582_s0 }
 0x22c   :  { %v8278_v43 = vpop.trf.xlu1  ;;  %v8281_v27 = vpop.trf.xlu0 }
 0x22d   :  { %11819 = vst [vmem:[#allocation163_spill] sm:$0xff] %v8278_v43  ;;  %v8293_v43 = vrot.slane %v693_v62, %v8264_v56  ;;  %v753_v62 = vrot.slane %v745_v52, %v7837_v5 }
 0x22e   :  { %5022 = vrot.lane.b32.xlu1 %v726_v20, %s11578_s11 }
 0x22f   :  { %11822 = vst [vmem:[#allocation166_spill] sm:$0xff] %v8293_v43  ;;  %v725_v16 = vcombine.high %v8293_v43, %v11824_v17 }
 0x230   :  { %v8284_v49 = vpop.trf.xlu1  ;;  %v8287_v55 = vpop.trf.xlu0 }
 0x231   :  { %11820 = vst [vmem:[#allocation164_spill] sm:$0xff] %v8284_v49  ;;  %v710_v49 = vcombine.high %v676_v37, %v692_v41  ;;  %v737_v41 = vrot.slane %v729_v8, %v7837_v5 }
 0x232   :  { %5026 = vrot.lane.b32.xlu1 %v717_v60, %s11576_s12  ;;  %v746_v60 = vcombine.high %v7988_v11, %v550_v18 }
 0x233   :  { %v724_v37 = vrot.slane %v710_v49, %v8264_v56  ;;  %v761_v43 = vcombine.low %v737_v41, %v753_v62 }
 0x234   :  { %v8290_v53 = vpop.trf.xlu1  ;;  %v8295_v57 = vpop.trf.xlu0  ;;  %v760_v8 = vrot.slane %v746_v60, %v7837_v5 }
 0x235   :  { %11821 = vst [vmem:[#allocation165_spill] sm:$0xff] %v8290_v53  ;;  %5014 = vrot.lane.b32.xlu0 %v725_v16, %s11584_s13  ;;  %v728_v16 = vcombine.high %v724_v37, %v11824_v17  ;;  %v769_v12 = vrot.slane %v761_v43, %v8264_v56  ;;  %v813_v43 = vcombine.low %v7992_v58, %v8258_v13 }
 0x236   :  { %5030 = vrot.lane.b32.xlu1 %v727_v3, %s11574_s14  ;;  %v730_v3 = vcombine.high %v7850_v22, %v8122_v14 }
 0x237   :  { %v793_v18 = vcombine.high %v769_v12, %v11824_v17 }
 0x238   :  { %v8298_v20 = vpop.trf.xlu1  ;;  %v8305_v51 = vpop.trf.xlu0  ;;  %v744_v11 = vrot.slane %v730_v3, %v7837_v5  ;;  %v821_v3 = vrot.slane %v813_v43, %v7837_v5  ;;  %v798_v43 = vcombine.high %v7854_v24, %v8126_v33 }
 0x239   :  { %11823 = vst [vmem:[#allocation167_spill] sm:$0xff] %v8298_v20  ;;  %5034 = vrot.lane.b32.xlu0 %v724_v37, %s11572_s15 }
 0x23a   :  { %5038 = vrot.lane.b32.xlu1 %v728_v16, %s11570_s16  ;;  %v777_v14 = vcombine.low %v744_v11, %v760_v8 }
 0x23c   :  { %v8310_v20 = vpop.trf.xlu1  ;;  %v8314_v53 = vpop.trf.xlu0 }
 0x23d   :  { %11825 = vst [vmem:[#allocation168_spill] sm:$0xff] %v8310_v20  ;;  %v762_v20 = vcombine.high %v737_v41, %v753_v62  ;;  %5042 = vrot.lane.b32.xlu0 %v769_v12, %s11568_s17  ;;  %v797_v12 = vcombine.low %v7854_v24, %v8126_v33 }
 0x23e   :  { %5046 = vrot.lane.b32.xlu1 %v793_v18, %s11566_s18  ;;  %v778_v18 = vcombine.high %v744_v11, %v760_v8 }
 0x23f   :  { %v776_v37 = vrot.slane %v762_v20, %v8264_v56  ;;  %v785_v20 = vrot.slane %v777_v14, %v8264_v56  ;;  %v814_v14 = vcombine.high %v7992_v58, %v8258_v13 }
 0x240   :  { %v8319_v52 = vpop.trf.xlu1  ;;  %v8324_v49 = vpop.trf.xlu0  ;;  %v792_v8 = vrot.slane %v778_v18, %v8264_v56  ;;  %v812_v18 = vrot.slane %v798_v43, %v7837_v5 }
 0x241   :  { %11826 = vst [vmem:[#allocation169_spill] sm:$0xff] %v8319_v52  ;;  %5050 = vrot.lane.b32.xlu0 %v776_v37, %s11564_s19  ;;  %v794_v41 = vcombine.high %v776_v37, %v11824_v17  ;;  %v795_v37 = vcombine.high %v785_v20, %v11824_v17 }
 0x243   :  { %5054 = vrot.lane.b32.xlu1 %v794_v41, %s11562_s20 }
 0x244   :  { %v8328_v46 = vpop.trf.xlu1  ;;  %v8333_v22 = vpop.trf.xlu0 }
 0x245   :  { %11827 = vst [vmem:[#allocation170_spill] sm:$0xff] %v8328_v46  ;;  %5058 = vrot.lane.b32.xlu0 %v785_v20, %s11560_s21  ;;  %v805_v46 = vrot.slane %v797_v12, %v7837_v5  ;;  %v828_v20 = vrot.slane %v814_v14, %v7837_v5 }
 0x247   :  { %5062 = vrot.lane.b32.xlu1 %v795_v37, %s11558_s22  ;;  %v796_v37 = vcombine.high %v792_v8, %v11824_v17  ;;  %v830_v58 = vcombine.high %v805_v46, %v821_v3  ;;  %v845_v33 = vcombine.low %v812_v18, %v828_v20 }
 0x248   :  { %v8337_v62 = vpop.trf.xlu1  ;;  %v8343_v60 = vpop.trf.xlu0 }
 0x249   :  { %11828 = vst [vmem:[#allocation171_spill] sm:$0xff] %v8337_v62  ;;  %5066 = vrot.lane.b32.xlu0 %v792_v8, %s11556_s23  ;;  %v844_v8 = vrot.slane %v830_v58, %v8264_v56  ;;  %v853_v43 = vrot.slane %v845_v33, %v8264_v56 }
 0x24b   :  { %5070 = vrot.lane.b32.xlu1 %v796_v37, %s11554_s24  ;;  %v846_v37 = vcombine.high %v812_v18, %v828_v20  ;;  %v882_v20 = vcombine.high %v7996_v6, %v8268_v9 }
 0x24c   :  { %v8349_v16 = vpop.trf.xlu1  ;;  %v8354_v62 = vpop.trf.xlu0 }
 0x24d   :  { %11829 = vst [vmem:[#allocation172_spill] sm:$0xff] %v8349_v16  ;;  %v829_v16 = vcombine.low %v805_v46, %v821_v3  ;;  %v881_v46 = vcombine.low %v7996_v6, %v8268_v9  ;;  %v862_v3 = vcombine.high %v844_v8, %v11824_v17 }
 0x250   :  { %v8358_v41 = vpop.trf.xlu1  ;;  %v8363_v11 = vpop.trf.xlu0 }
 0x251   :  { %11830 = vst [vmem:[#allocation173_spill] sm:$0xff] %v8358_v41  ;;  %v837_v41 = vrot.slane %v829_v16, %v8264_v56 }
 0x253   :  { %5074 = vrot.lane.b32.xlu0 %v837_v41, %s11552_s25  ;;  %v861_v14 = vcombine.high %v837_v41, %v11824_v17  ;;  %v865_v41 = vcombine.low %v7858_v26, %v8130_v29 }
 0x254   :  { %v8368_v12 = vpop.trf.xlu1  ;;  %v8373_v13 = vpop.trf.xlu0 }
 0x255   :  { %11831 = vst [vmem:[#allocation174_spill] sm:$0xff] %v8368_v12  ;;  %5078 = vrot.lane.b32.xlu1 %v861_v14, %s11550_s26  ;;  %v889_v14 = vrot.slane %v881_v46, %v7837_v5  ;;  %v873_v33 = vrot.slane %v865_v41, %v7837_v5 }
 0x257   :  { %5082 = vrot.lane.b32.xlu0 %v844_v8, %s11548_s27  ;;  %v863_v8 = vcombine.high %v853_v43, %v11824_v17  ;;  %v897_v18 = vcombine.low %v873_v33, %v889_v14 }
 0x258   :  { %v8378_v24 = vpop.trf.xlu1  ;;  %v8382_v12 = vpop.trf.xlu0 }
 0x259   :  { %11832 = vst [vmem:[#allocation175_spill] sm:$0xff] %v8378_v24  ;;  %11833 = vst [vmem:[#allocation176_spill] sm:$0xff] %v8382_v12  ;;  %5086 = vrot.lane.b32.xlu1 %v862_v3, %s11546_s28  ;;  %v905_v6 = vrot.slane %v897_v18, %v8264_v56 }
 0x25b   :  { %5090 = vrot.lane.b32.xlu0 %v853_v43, %s11543_s29  ;;  %v866_v43 = vcombine.high %v7858_v26, %v8130_v29 }
 0x25c   :  { %v8388_v16 = vpop.trf.xlu1  ;;  %v8394_v58 = vpop.trf.xlu0 }
 0x25d   :  { %11834 = vst [vmem:[#allocation177_spill] sm:$0xff] %v8388_v16  ;;  %11835 = vst [vmem:[#allocation178_spill] sm:$0xff] %v8394_v58  ;;  %v860_v16 = vrot.slane %v846_v37, %v8264_v56  ;;  %5094 = vrot.lane.b32.xlu1 %v863_v8, %s11541_s30  ;;  %v896_v37 = vrot.slane %v882_v20, %v7837_v5  ;;  %v898_v8 = vcombine.high %v873_v33, %v889_v14 }
 0x25e   :  { %v949_v33 = vcombine.low %v8000_v2, %v8275_v61 }
 0x25f   :  { %5098 = vrot.lane.b32.xlu0 %v860_v16, %s11539_s2  ;;  %v864_v3 = vcombine.high %v860_v16, %v11824_v17  ;;  %v929_v16 = vcombine.high %v905_v6, %v11824_v17  ;;  %v912_v20 = vrot.slane %v898_v8, %v8264_v56 }
 0x260   :  { %v8399_v24 = vpop.trf.xlu1  ;;  %v8404_v12 = vpop.trf.xlu0 }
 0x261   :  { %11836 = vst [vmem:[#allocation179_spill] sm:$0xff] %v8399_v24  ;;  %11837 = vst [vmem:[#allocation180_spill] sm:$0xff] %v8404_v12  ;;  %5102 = vrot.lane.b32.xlu1 %v864_v3, %s11537_s3  ;;  %v880_v24 = vrot.slane %v866_v43, %v7837_v5  ;;  %v930_v18 = vcombine.high %v912_v20, %v11824_v17  ;;  %v933_v43 = vcombine.low %v7862_v28, %v8134_v15 }
 0x263   :  { %5106 = vrot.lane.b32.xlu0 %v905_v6, %s11529_s4  ;;  %v913_v29 = vcombine.low %v880_v24, %v896_v37 }
 0x264   :  { %v8410_v46 = vpop.trf.xlu1  ;;  %v8415_v41 = vpop.trf.xlu0 }
 0x265   :  { %11838 = vst [vmem:[#allocation181_spill] sm:$0xff] %v8410_v46  ;;  %11839 = vst [vmem:[#allocation182_spill] sm:$0xff] %v8415_v41  ;;  %5110 = vrot.lane.b32.xlu1 %v929_v16, %s11532_s5  ;;  %v921_v8 = vrot.slane %v913_v29, %v8264_v56  ;;  %v957_v16 = vrot.slane %v949_v33, %v7837_v5  ;;  %v950_v29 = vcombine.high %v8000_v2, %v8275_v61 }
 0x267   :  { %5114 = vrot.lane.b32.xlu0 %v912_v20, %s11534_s6  ;;  %v931_v20 = vcombine.high %v921_v8, %v11824_v17 }
 0x268   :  { %v8420_v9 = vpop.trf.xlu1  ;;  %v8425_v26 = vpop.trf.xlu0 }
 0x269   :  { %11840 = vst [vmem:[#allocation183_spill] sm:$0xff] %v8420_v9  ;;  %11841 = vst [vmem:[#allocation184_spill] sm:$0xff] %v8425_v26  ;;  %5118 = vrot.lane.b32.xlu1 %v930_v18, %s11448_s7  ;;  %v941_v9 = vrot.slane %v933_v43, %v7837_v5  ;;  %v964_v43 = vrot.slane %v950_v29, %v7837_v5  ;;  %s11456_s7 = smov 68  }
 0x26b   :  { %5122 = vrot.lane.b32.xlu0 %v921_v8, %s11444_s8  ;;  %v966_v2 = vcombine.high %v941_v9, %v957_v16  ;;  %s11450_s8 = smov 64  }
 0x26c   :  { %v8429_v14 = vpop.trf.xlu1  ;;  %v8435_v3 = vpop.trf.xlu0 }
 0x26d   :  { %11842 = vst [vmem:[#allocation185_spill] sm:$0xff] %v8429_v14  ;;  %11843 = vst [vmem:[#allocation186_spill] sm:$0xff] %v8435_v3  ;;  %v914_v14 = vcombine.high %v880_v24, %v896_v37  ;;  %5126 = vrot.lane.b32.xlu1 %v931_v20, %s11442_s9  ;;  %v934_v37 = vcombine.high %v7862_v28, %v8134_v15  ;;  %s11490_s9 = smov 62   ;;  %v980_v29 = vrot.slane %v966_v2, %v8264_v56 }
 0x26f   :  { %v928_v24 = vrot.slane %v914_v14, %v8264_v56  ;;  %v948_v61 = vrot.slane %v934_v37, %v7837_v5 }
 0x270   :  { %v8441_v6 = vpop.trf.xlu1  ;;  %v8447_v46 = vpop.trf.xlu0 }
 0x271   :  { %11844 = vst [vmem:[#allocation187_spill] sm:$0xff] %v8441_v6  ;;  %11845 = vst [vmem:[#allocation188_spill] sm:$0xff] %v8447_v46  ;;  %v965_v6 = vcombine.low %v941_v9, %v957_v16  ;;  %5130 = vrot.lane.b32.xlu0 %v928_v24, %s11446_s10  ;;  %v932_v8 = vcombine.high %v928_v24, %v11824_v17  ;;  %v981_v15 = vcombine.low %v948_v61, %v964_v43  ;;  %s11452_s10 = smov 66  }
 0x272   :  { %v1017_v9 = vcombine.low %v8004_v54, %v8281_v27  ;;  %v998_v24 = vcombine.high %v980_v29, %v11824_v17 }
 0x273   :  { %v973_v20 = vrot.slane %v965_v6, %v8264_v56  ;;  %5134 = vrot.lane.b32.xlu1 %v932_v8, %s11490_s9  ;;  %v989_v37 = vrot.slane %v981_v15, %v8264_v56  ;;  %v1001_v8 = vcombine.low %v7866_v30, %v8138_v23  ;;  %s11502_s9 = smov 104  }
 0x274   :  { %v8450_v18 = vpop.trf.xlu1  ;;  %v1025_v2 = vrot.slane %v1017_v9, %v7837_v5 }
 0x275   :  { %11846 = vst [vmem:[#allocation189_spill] sm:$0xff] %v8450_v18  ;;  %v8463_v18 = vpop.trf.xlu0  ;;  %5138 = vrot.lane.b32.xlu0 %v973_v20, %s11450_s8  ;;  %v997_v14 = vcombine.high %v973_v20, %v11824_v17  ;;  %v982_v20 = vcombine.high %v948_v61, %v964_v43  ;;  %s11458_s8 = smov 70   ;;  %v1009_v15 = vrot.slane %v1001_v8, %v7837_v5 }
 0x276   :  { %11848 = vst [vmem:[#allocation191_spill] sm:$0xff] %v8463_v18  ;;  %v1018_v43 = vcombine.high %v8004_v54, %v8281_v27 }
 0x277   :  { %5142 = vrot.lane.b32.xlu1 %v997_v14, %s11452_s10  ;;  %s11460_s10 = smov 72   ;;  %v1033_v61 = vcombine.low %v1009_v15, %v1025_v2 }
 0x278   :  { %v8458_v33 = vpop.trf.xlu1 }
 0x279   :  { %11847 = vst [vmem:[#allocation190_spill] sm:$0xff] %v8458_v33  ;;  %v8473_v6 = vpop.trf.xlu0  ;;  %5146 = vrot.lane.b32.xlu0 %v980_v29, %s11456_s7  ;;  %v996_v29 = vrot.slane %v982_v20, %v8264_v56  ;;  %s11465_s7 = smov 74   ;;  %v1034_v20 = vcombine.high %v1009_v15, %v1025_v2  ;;  %v1041_v54 = vrot.slane %v1033_v61, %v8264_v56 }
 0x27a   :  { %11850 = vst [vmem:[#allocation193_spill] sm:$0xff] %v8473_v6  ;;  %v1085_v2 = vcombine.low %v8008_v50, %v8287_v55 }
 0x27b   :  { %5150 = vrot.lane.b32.xlu1 %v998_v24, %s11458_s8  ;;  %s11463_s8 = smov 76   ;;  %v1000_v24 = vcombine.high %v996_v29, %v11824_v17 }
 0x27c   :  { %v8468_v28 = vpop.trf.xlu1 }
 0x27d   :  { %11849 = vst [vmem:[#allocation192_spill] sm:$0xff] %v8468_v28  ;;  %5154 = vrot.lane.b32.xlu0 %v989_v37, %s11460_s10  ;;  %v8490_v28 = vpop.trf.xlu0  ;;  %s11467_s10 = smov 78  }
 0x27e   :  { %11853 = vst [vmem:[#allocation196_spill] sm:$0xff] %v8490_v28 }
 0x280   :  { %v8478_v16 = vpop.trf.xlu1 }
 0x281   :  { %11851 = vst [vmem:[#allocation194_spill] sm:$0xff] %v8478_v16  ;;  %v999_v16 = vcombine.high %v989_v37, %v11824_v17  ;;  %5162 = vrot.lane.b32.xlu0 %v996_v29, %s11463_s8  ;;  %v1002_v37 = vcombine.high %v7866_v30, %v8138_v23  ;;  %v8504_v8 = vpop.trf.xlu0  ;;  %s11469_s8 = smov 80   ;;  %v1065_v29 = vcombine.high %v1041_v54, %v11824_v17 }
 0x282   :  { %11855 = vst [vmem:[#allocation198_spill] sm:$0xff] %v8504_v8  ;;  %v1048_v30 = vrot.slane %v1034_v20, %v8264_v56  ;;  %v1093_v20 = vrot.slane %v1085_v2, %v7837_v5 }
 0x283   :  { %5158 = vrot.lane.b32.xlu1 %v999_v16, %s11465_s7  ;;  %v1032_v16 = vrot.slane %v1018_v43, %v7837_v5  ;;  %s11471_s7 = smov 82  }
 0x284   :  { %v8487_v14 = vpop.trf.xlu1  ;;  %v1066_v43 = vcombine.high %v1048_v30, %v11824_v17 }
 0x285   :  { %11852 = vst [vmem:[#allocation195_spill] sm:$0xff] %v8487_v14  ;;  %v1016_v14 = vrot.slane %v1002_v37, %v7837_v5  ;;  %5170 = vrot.lane.b32.xlu0 %v1041_v54, %s11469_s8  ;;  %v8517_v15 = vpop.trf.xlu0  ;;  %s11482_s8 = smov 86  }
 0x286   :  { %11857 = vst [vmem:[#allocation200_spill] sm:$0xff] %v8517_v15 }
 0x287   :  { %5166 = vrot.lane.b32.xlu1 %v1000_v24, %s11467_s10  ;;  %v1049_v23 = vcombine.low %v1016_v14, %v1032_v16  ;;  %s11474_s10 = smov 84   ;;  %v1069_v24 = vcombine.low %v7870_v32, %v8142_v7  ;;  %v1050_v54 = vcombine.high %v1016_v14, %v1032_v16  ;;  %v1070_v16 = vcombine.high %v7870_v32, %v8142_v7 }
 0x288   :  { %v8498_v9 = vpop.trf.xlu1  ;;  %v1153_v7 = vcombine.low %v8012_v44, %v8295_v57 }
 0x289   :  { %11854 = vst [vmem:[#allocation197_spill] sm:$0xff] %v8498_v9  ;;  %5178 = vrot.lane.b32.xlu0 %v1048_v30, %s11474_s10  ;;  %v1057_v37 = vrot.slane %v1049_v23, %v8264_v56  ;;  %v1077_v30 = vrot.slane %v1069_v24, %v7837_v5  ;;  %s11480_s10 = smov 90   ;;  %v1086_v23 = vcombine.high %v8008_v50, %v8287_v55 }
 0x28a   :  { %v1064_v14 = vrot.slane %v1050_v54, %v8264_v56  ;;  %v1084_v55 = vrot.slane %v1070_v16, %v7837_v5  ;;  %v1161_v16 = vrot.slane %v1153_v7, %v7837_v5  ;;  %v1154_v9 = vcombine.high %v8012_v44, %v8295_v57 }
 0x28b   :  { %5174 = vrot.lane.b32.xlu1 %v1065_v29, %s11471_s7  ;;  %s11477_s7 = smov 88   ;;  %v1067_v29 = vcombine.high %v1057_v37, %v11824_v17  ;;  %v1100_v24 = vrot.slane %v1086_v23, %v7837_v5  ;;  %v1102_v50 = vcombine.high %v1077_v30, %v1093_v20 }
 0x28c   :  { %v8508_v27 = vpop.trf.xlu1 }
 0x28d   :  { %11856 = vst [vmem:[#allocation199_spill] sm:$0xff] %v8508_v27  ;;  %5186 = vrot.lane.b32.xlu0 %v1057_v37, %s11477_s7  ;;  %v8531_v27 = vpop.trf.xlu0  ;;  %s11484_s7 = smov 92   ;;  %v1068_v37 = vcombine.high %v1064_v14, %v11824_v17  ;;  %v1117_v32 = vcombine.low %v1084_v55, %v1100_v24  ;;  %v1116_v23 = vrot.slane %v1102_v50, %v8264_v56 }
 0x28e   :  { %11859 = vst [vmem:[#allocation202_spill] sm:$0xff] %v8531_v27 }
 0x28f   :  { %5182 = vrot.lane.b32.xlu1 %v1066_v43, %s11482_s8  ;;  %v1101_v43 = vcombine.low %v1077_v30, %v1093_v20  ;;  %s11488_s8 = smov 96   ;;  %v1137_v20 = vcombine.low %v7874_v34, %v8146_v4 }
 0x290   :  { %v8521_v61 = vpop.trf.xlu1 }
 0x291   :  { %11858 = vst [vmem:[#allocation201_spill] sm:$0xff] %v8521_v61  ;;  %5194 = vrot.lane.b32.xlu0 %v1064_v14, %s11484_s7  ;;  %s11580_s7 = smov 98   ;;  %v1145_v50 = vrot.slane %v1137_v20, %v7837_v5  ;;  %v1168_v20 = vrot.slane %v1154_v9, %v7837_v5 }
 0x293   :  { %5190 = vrot.lane.b32.xlu1 %v1067_v29, %s11480_s10  ;;  %v8546_v29 = vpop.trf.xlu0  ;;  %s11486_s10 = smov 94  }
 0x294   :  { %v8534_v61 = vpop.trf.xlu1  ;;  %11861 = vst [vmem:[#allocation204_spill] sm:$0xff] %v8546_v29 }
 0x295   :  { %11860 = vst [vmem:[#allocation203_spill] sm:$0xff] %v8534_v61  ;;  %v1109_v61 = vrot.slane %v1101_v43, %v8264_v56  ;;  %v1118_v43 = vcombine.high %v1084_v55, %v1100_v24  ;;  %v1169_v24 = vcombine.low %v1145_v50, %v1161_v16 }
 0x297   :  { %5198 = vrot.lane.b32.xlu1 %v1068_v37, %s11486_s10  ;;  %5202 = vrot.lane.b32.xlu0 %v1109_v61, %s11488_s8  ;;  %v1133_v54 = vcombine.high %v1109_v61, %v11824_v17  ;;  %v8561_v30 = vpop.trf.xlu0  ;;  %s11493_s10 = smov 100   ;;  %v1134_v61 = vcombine.high %v1116_v23, %v11824_v17  ;;  %v1125_v37 = vrot.slane %v1117_v32, %v8264_v56  ;;  %s11495_s8 = smov 102  }
 0x298   :  { %11862 = vst [vmem:[#allocation205_spill] sm:$0xff] %v8561_v30  ;;  %v1132_v32 = vrot.slane %v1118_v43, %v8264_v56  ;;  %v1177_v57 = vrot.slane %v1169_v24, %v8264_v56  ;;  %v1221_v43 = vcombine.low %v8016_v39, %v8305_v51 }
 0x299   :  { %v1135_v7 = vcombine.high %v1125_v37, %v11824_v17 }
 0x29a   :  { %v1136_v44 = vcombine.high %v1132_v32, %v11824_v17  ;;  %v1229_v24 = vrot.slane %v1221_v43, %v7837_v5 }
 0x29b   :  { %5206 = vrot.lane.b32.xlu1 %v1133_v54, %s11580_s7  ;;  %5210 = vrot.lane.b32.xlu0 %v1116_v23, %s11493_s10  ;;  %v8574_v55 = vpop.trf.xlu0  ;;  %v1138_v23 = vcombine.high %v7874_v34, %v8146_v4  ;;  %s11498_s10 = smov 106   ;;  %v1205_v4 = vcombine.low %v7878_v36, %v8150_v1 }
 0x29c   :  { %v8542_v2 = vpop.permute.xlu1 %5018  ;;  %11863 = vst [vmem:[#allocation206_spill] sm:$0xff] %v8574_v55 }
 0x29d   :  { %v1152_v34 = vrot.slane %v1138_v23, %v7837_v5 }
 0x29f   :  { %5214 = vrot.lane.b32.xlu1 %v1134_v61, %s11495_s8  ;;  %5218 = vrot.lane.b32.xlu0 %v1125_v37, %s11502_s9  ;;  %s11500_s8 = smov 108   ;;  %v1170_v61 = vcombine.high %v1145_v50, %v1161_v16  ;;  %v1185_v9 = vcombine.low %v1152_v34, %v1168_v20  ;;  %v1201_v16 = vcombine.high %v1177_v57, %v11824_v17  ;;  %s11509_s9 = smov 114  }
 0x2a0   :  { %v8556_v14 = vpop.permute.xlu1 %5022 }
 0x2a1   :  { %v1184_v50 = vrot.slane %v1170_v61, %v8264_v56  ;;  %v1222_v61 = vcombine.high %v8016_v39, %v8305_v51 }
 0x2a3   :  { %5222 = vrot.lane.b32.xlu1 %v1135_v7, %s11498_s10  ;;  %5226 = vrot.lane.b32.xlu0 %v1132_v32, %s11500_s8  ;;  %s11504_s10 = smov 110   ;;  %s11507_s8 = smov 112   ;;  %v1213_v32 = vrot.slane %v1205_v4, %v7837_v5  ;;  %v1202_v55 = vcombine.high %v1184_v50, %v11824_v17  ;;  %v1206_v4 = vcombine.high %v7878_v36, %v8150_v1 }
 0x2a4   :  { %v8570_v54 = vpop.permute.xlu1 %5026 }
 0x2a5   :  { %v1237_v43 = vcombine.low %v1213_v32, %v1229_v24  ;;  %v1220_v36 = vrot.slane %v1206_v4, %v7837_v5 }
 0x2a7   :  { %v8585_v33 = vpop.permute.xlu0 %5014  ;;  %5230 = vrot.lane.b32.xlu1 %v1136_v44, %s11504_s10  ;;  %5234 = vrot.lane.b32.xlu0 %v1177_v57, %s11507_s8  ;;  %s11590_s10 = smov 116   ;;  %v1186_v44 = vcombine.high %v1152_v34, %v1168_v20  ;;  %v1193_v57 = vrot.slane %v1185_v9, %v8264_v56  ;;  %s11511_s8 = smov 118   ;;  %v1236_v9 = vrot.slane %v1222_v61, %v7837_v5 }
 0x2a8   :  { %v8589_v37 = vpop.permute.xlu1 %5030  ;;  %v8620_v39 = vrot.slane %v1237_v43, %v8264_v56  ;;  %v1273_v43 = vcombine.low %v7882_v38, %v8154_v63 }
 0x2a9   :  { %v1203_v20 = vcombine.high %v1193_v57, %v11824_v17  ;;  %v1200_v34 = vrot.slane %v1186_v44, %v8264_v56  ;;  %v1253_v44 = vcombine.low %v1220_v36, %v1236_v9 }
 0x2ab   :  { %v8599_v7 = vpop.permute.xlu0 %5034  ;;  %5238 = vrot.lane.b32.xlu1 %v1201_v16, %s11509_s9  ;;  %5242 = vrot.lane.b32.xlu0 %v1184_v50, %s11590_s10  ;;  %s11513_s9 = smov 120   ;;  %v1238_v50 = vcombine.high %v1213_v32, %v1229_v24  ;;  %v1289_v24 = vcombine.low %v8020_v35, %v8314_v53  ;;  %v1269_v32 = vcombine.high %v8620_v39, %v11824_v17  ;;  %s11925_s10 = smov 114  }
 0x2ac   :  { %v8604_v23 = vpop.permute.xlu1 %5038  ;;  %v1261_v29 = vrot.slane %v1253_v44, %v8264_v56  ;;  %v1274_v44 = vcombine.high %v7882_v38, %v8154_v63 }
 0x2af   :  { %5246 = vrot.lane.b32.xlu1 %v1202_v55, %s11511_s8  ;;  %5250 = vrot.lane.b32.xlu0 %v1193_v57, %s11513_s9  ;;  %v8614_v16 = vpop.permute.xlu0 %5042  ;;  %s11515_s8 = smov 122   ;;  %s11588_s9 = smov 124   ;;  %v1204_v55 = vcombine.high %v1200_v34, %v11824_v17  ;;  %v1252_v57 = vrot.slane %v1238_v50, %v8264_v56 }
 0x2b0   :  { %v8622_v51 = vpop.permute.xlu1 %5046 }
 0x2b1   :  { %v1270_v30 = vcombine.high %v1252_v57, %v11824_v17 }
 0x2b3   :  { %5254 = vrot.lane.b32.xlu1 %v1203_v20, %s11515_s8  ;;  %5258 = vrot.lane.b32.xlu0 %v1200_v34, %s11588_s9  ;;  %v8627_v1 = vpop.permute.xlu0 %5050  ;;  %s11586_s8 = smov 126   ;;  %v1254_v20 = vcombine.high %v1220_v36, %v1236_v9  ;;  %v1297_v34 = vrot.slane %v1289_v24, %v7837_v5  ;;  %v1271_v9 = vcombine.high %v1261_v29, %v11824_v17  ;;  %s11924_s9 = smov 112  }
 0x2b5   :  { %v8635_v61 = vpop.permute.xlu1 %5054  ;;  %v1268_v36 = vrot.slane %v1254_v20, %v8264_v56  ;;  %v1357_v20 = vcombine.low %v8024_v31, %v8324_v49 }
 0x2b7   :  { %5262 = vrot.lane.b32.xlu1 %v1204_v55, %s11586_s8  ;;  %5266 = vrot.lane.b32.xlu0 %v1269_v32, %s11584_s13  ;;  %v8641_v4 = vpop.permute.xlu0 %5058  ;;  %v1281_v55 = vrot.slane %v1273_v43, %v7837_v5  ;;  %v1290_v32 = vcombine.high %v8020_v35, %v8314_v53  ;;  %v1272_v35 = vcombine.high %v1268_v36, %v11824_v17  ;;  %s11916_s13 = smov 108   ;;  %s11917_s8 = smov 110  }
 0x2b9   :  { %v8647_v50 = vpop.permute.xlu1 %5062  ;;  %v1305_v27 = vcombine.low %v1281_v55, %v1297_v34  ;;  %v1306_v43 = vcombine.high %v1281_v55, %v1297_v34 }
 0x2bb   :  { %5270 = vrot.lane.b32.xlu1 %v1252_v57, %s11582_s0  ;;  %5274 = vrot.lane.b32.xlu0 %v1270_v30, %s11578_s11  ;;  %v8655_v24 = vpop.permute.xlu0 %5066  ;;  %v1304_v30 = vrot.slane %v1290_v32, %v7837_v5  ;;  %v1313_v53 = vrot.slane %v1305_v27, %v8264_v56  ;;  %v1320_v55 = vrot.slane %v1306_v43, %v8264_v56  ;;  %s11908_s11 = smov 102   ;;  %s11912_s0 = smov 106  }
 0x2bc   :  { %v1341_v27 = vcombine.low %v7886_v40, %v8158_v0 }
 0x2bd   :  { %v8661_v57 = vpop.permute.xlu1 %5070  ;;  %v1337_v34 = vcombine.high %v1313_v53, %v11824_v17 }
 0x2be   :  { %v1349_v43 = vrot.slane %v1341_v27, %v7837_v5 }
 0x2bf   :  { %5278 = vrot.lane.b32.xlu1 %v1261_v29, %s11576_s12  ;;  %5282 = vrot.lane.b32.xlu0 %v1271_v9, %s11574_s14  ;;  %v1288_v29 = vrot.slane %v1274_v44, %v7837_v5  ;;  %v1365_v44 = vrot.slane %v1357_v20, %v7837_v5  ;;  %s11902_s14 = smov 96   ;;  %s11907_s12 = smov 100  }
 0x2c1   :  { %v1321_v63 = vcombine.low %v1288_v29, %v1304_v30 }
 0x2c3   :  { %5286 = vrot.lane.b32.xlu1 %v1268_v36, %s11572_s15  ;;  %5290 = vrot.lane.b32.xlu0 %v1272_v35, %s11570_s16  ;;  %v1322_v36 = vcombine.high %v1288_v29, %v1304_v30  ;;  %v1338_v35 = vcombine.high %v1320_v55, %v11824_v17  ;;  %v1329_v8 = vrot.slane %v1321_v63, %v8264_v56  ;;  %s11897_s16 = smov 92   ;;  %s11898_s15 = smov 94  }
 0x2c4   :  { %v1373_v30 = vcombine.low %v1349_v43, %v1365_v44  ;;  %v1342_v63 = vcombine.high %v7886_v40, %v8158_v0  ;;  %v1425_v0 = vcombine.low %v8030_v25, %v8333_v22 }
 0x2c5   :  { %v8666_v15 = vpop.permute.xlu0 %5074  ;;  %v1339_v29 = vcombine.high %v1329_v8, %v11824_v17  ;;  %v1336_v20 = vrot.slane %v1322_v36, %v8264_v56 }
 0x2c6   :  { %v1356_v36 = vrot.slane %v1342_v63, %v7837_v5  ;;  %v1433_v63 = vrot.slane %v1425_v0, %v7837_v5 }
 0x2c7   :  { %v8671_v38 = vpop.permute.xlu1 %5078  ;;  %5294 = vrot.lane.b32.xlu1 %v1313_v53, %s11568_s17  ;;  %5298 = vrot.lane.b32.xlu0 %v1337_v34, %s11566_s18  ;;  %v1358_v34 = vcombine.high %v8024_v31, %v8324_v49  ;;  %v1340_v31 = vcombine.high %v1336_v20, %v11824_v17  ;;  %v1381_v49 = vrot.slane %v1373_v30, %v8264_v56  ;;  %s11893_s18 = smov 88   ;;  %s11894_s17 = smov 90  }
 0x2c9   :  { %v8677_v32 = vpop.permute.xlu0 %5082  ;;  %v1372_v27 = vrot.slane %v1358_v34, %v7837_v5  ;;  %v1409_v34 = vcombine.low %v7890_v42, %v8164_v47 }
 0x2cb   :  { %v8683_v9 = vpop.permute.xlu1 %5086  ;;  %5302 = vrot.lane.b32.xlu1 %v1320_v55, %s11564_s19  ;;  %5306 = vrot.lane.b32.xlu0 %v1338_v35, %s11562_s20  ;;  %v1374_v35 = vcombine.high %v1349_v43, %v1365_v44  ;;  %v1389_v40 = vcombine.low %v1356_v36, %v1372_v27  ;;  %s11889_s20 = smov 84   ;;  %s11890_s19 = smov 86  }
 0x2cd   :  { %v8688_v28 = vpop.permute.xlu0 %5090  ;;  %v1388_v44 = vrot.slane %v1374_v35, %v8264_v56  ;;  %v1397_v18 = vrot.slane %v1389_v40, %v8264_v56  ;;  %v1417_v35 = vrot.slane %v1409_v34, %v7837_v5 }
 0x2cf   :  { %v8693_v53 = vpop.permute.xlu1 %5094  ;;  %5310 = vrot.lane.b32.xlu1 %v1329_v8, %s11560_s21  ;;  %5314 = vrot.lane.b32.xlu0 %v1339_v29, %s11558_s22  ;;  %v1405_v29 = vcombine.high %v1381_v49, %v11824_v17  ;;  %s11884_s22 = smov 80   ;;  %s11887_s21 = smov 82  }
 0x2d1   :  { %v8699_v6 = vpop.permute.xlu0 %5098 }
 0x2d3   :  { %v8705_v55 = vpop.permute.xlu1 %5102  ;;  %5318 = vrot.lane.b32.xlu1 %v1336_v20, %s11556_s23  ;;  %5322 = vrot.lane.b32.xlu0 %v1340_v31, %s11554_s24  ;;  %v1390_v20 = vcombine.high %v1356_v36, %v1372_v27  ;;  %v1406_v31 = vcombine.high %v1388_v44, %v11824_v17  ;;  %v1441_v27 = vcombine.low %v1417_v35, %v1433_v63  ;;  %s11879_s24 = smov 76   ;;  %s11881_s23 = smov 78  }
 0x2d4   :  { %v1407_v36 = vcombine.high %v1397_v18, %v11824_v17 }
 0x2d5   :  { %v8713_v8 = vpop.permute.xlu0 %5106  ;;  %v1404_v0 = vrot.slane %v1390_v20, %v8264_v56 }
 0x2d7   :  { %v8719_v43 = vpop.permute.xlu1 %5110  ;;  %5326 = vrot.lane.b32.xlu1 %v1381_v49, %s11552_s25  ;;  %5330 = vrot.lane.b32.xlu0 %v1405_v29, %s11550_s26  ;;  %v1426_v29 = vcombine.high %v8030_v25, %v8333_v22  ;;  %v1408_v3 = vcombine.high %v1404_v0, %v11824_v17  ;;  %v1449_v25 = vrot.slane %v1441_v27, %v8264_v56  ;;  %s11876_s26 = smov 72   ;;  %s11877_s25 = smov 74  }
 0x2d8   :  { %v1477_v27 = vcombine.low %v7894_v45, %v8169_v21 }
 0x2d9   :  { %v8725_v30 = vpop.permute.xlu0 %5114  ;;  %v1440_v34 = vrot.slane %v1426_v29, %v7837_v5 }
 0x2db   :  { %v8730_v46 = vpop.permute.xlu1 %5118  ;;  %5334 = vrot.lane.b32.xlu1 %v1388_v44, %s11548_s27  ;;  %5338 = vrot.lane.b32.xlu0 %v1406_v31, %s11546_s28  ;;  %v1410_v44 = vcombine.high %v7890_v42, %v8164_v47  ;;  %v1442_v31 = vcombine.high %v1417_v35, %v1433_v63  ;;  %v1493_v47 = vcombine.low %v8035_v19, %v8343_v60  ;;  %s11872_s28 = smov 68   ;;  %s11873_s27 = smov 70  }
 0x2dc   :  { %v1473_v63 = vcombine.high %v1449_v25, %v11824_v17 }
 0x2dd   :  { %v8735_v49 = vpop.permute.xlu0 %5122  ;;  %v1456_v35 = vrot.slane %v1442_v31, %v8264_v56  ;;  %v1485_v31 = vrot.slane %v1477_v27, %v7837_v5 }
 0x2df   :  { %5342 = vrot.lane.b32.xlu1 %v1397_v18, %s11543_s29  ;;  %v8742_v40 = vpop.permute.xlu1 %5126  ;;  %5346 = vrot.lane.b32.xlu0 %v1407_v36, %s11541_s30  ;;  %v1424_v18 = vrot.slane %v1410_v44, %v7837_v5  ;;  %v1474_v44 = vcombine.high %v1456_v35, %v11824_v17  ;;  %s11869_s30 = smov 64   ;;  %s11870_s29 = smov 66  }
 0x2e1   :  { %v1457_v42 = vcombine.low %v1424_v18, %v1440_v34  ;;  %v1458_v36 = vcombine.high %v1424_v18, %v1440_v34 }
 0x2e3   :  { %v8750_v22 = vpop.permute.xlu0 %5130  ;;  %5350 = vrot.lane.b32.xlu1 %v1404_v0, %s11539_s2  ;;  %5354 = vrot.lane.b32.xlu0 %v1408_v3, %s11537_s3  ;;  %v1501_v0 = vrot.slane %v1493_v47, %v7837_v5  ;;  %v1465_v26 = vrot.slane %v1457_v42, %v8264_v56  ;;  %v1472_v47 = vrot.slane %v1458_v36, %v8264_v56  ;;  %s11867_s3 = smov 60   ;;  %s11868_s2 = smov 62  }
 0x2e4   :  { %v1478_v42 = vcombine.high %v7894_v45, %v8169_v21  ;;  %v1561_v36 = vcombine.low %v8039_v10, %v8354_v62 }
 0x2e5   :  { %v8755_v20 = vpop.permute.xlu1 %5134  ;;  %v1509_v34 = vcombine.low %v1485_v31, %v1501_v0  ;;  %v1475_v18 = vcombine.high %v1465_v26, %v11824_v17 }
 0x2e7   :  { %v8761_v29 = vpop.permute.xlu0 %5138  ;;  %5358 = vrot.lane.b32.xlu1 %v1449_v25, %s11529_s4  ;;  %5362 = vrot.lane.b32.xlu0 %v1473_v63, %s11532_s5  ;;  %s11864_s4 = smov 54   ;;  %v1494_v63 = vcombine.high %v8035_v19, %v8343_v60  ;;  %s11865_s5 = smov 56   ;;  %v1476_v19 = vcombine.high %v1472_v47, %v11824_v17  ;;  %v1517_v60 = vrot.slane %v1509_v34, %v8264_v56 }
 0x2e9   :  { %v8767_v3 = vpop.permute.xlu1 %5142  ;;  %v1508_v27 = vrot.slane %v1494_v63, %v7837_v5  ;;  %v1545_v63 = vcombine.low %v7899_v48, %v8173_v59 }
 0x2eb   :  { %v8772_v41 = vpop.permute.xlu0 %5146  ;;  %5366 = vrot.lane.b32.xlu1 %v1456_v35, %s11534_s6  ;;  %5370 = vrot.lane.b32.xlu0 %v1474_v44, %s11864_s4  ;;  %s11866_s6 = smov 58   ;;  %v1510_v44 = vcombine.high %v1485_v31, %v1501_v0  ;;  %v1541_v0 = vcombine.high %v1517_v60, %v11824_v17 }
 0x2ed   :  { %v8777_v25 = vpop.permute.xlu1 %5150  ;;  %v1524_v31 = vrot.slane %v1510_v44, %v8264_v56  ;;  %v1553_v44 = vrot.slane %v1545_v63, %v7837_v5 }
 0x2ef   :  { %v8783_v12 = vpop.permute.xlu0 %5154  ;;  %5374 = vrot.lane.b32.xlu1 %v1465_v26, %s11865_s5  ;;  %5378 = vrot.lane.b32.xlu0 %v1475_v18, %s11866_s6  ;;  %v1492_v26 = vrot.slane %v1478_v42, %v7837_v5 }
 0x2f1   :  { %v1525_v21 = vcombine.low %v1492_v26, %v1508_v27  ;;  %v1526_v18 = vcombine.high %v1492_v26, %v1508_v27 }
 0x2f3   :  { %v8794_v58 = vpop.permute.xlu0 %5162  ;;  %5382 = vrot.lane.b32.xlu1 %v1472_v47, %s11867_s3  ;;  %5386 = vrot.lane.b32.xlu0 %v1476_v19, %s11868_s2  ;;  %v1569_v47 = vrot.slane %v1561_v36, %v7837_v5  ;;  %v1542_v19 = vcombine.high %v1524_v31, %v11824_v17  ;;  %v1533_v52 = vrot.slane %v1525_v21, %v8264_v56 }
 0x2f4   :  { %v1546_v21 = vcombine.high %v7899_v48, %v8173_v59  ;;  %v11882_v59 = vld [vmem:[#allocation73_spill] sm:$0xff] }
 0x2f5   :  { %v8789_v35 = vpop.permute.xlu1 %5158  ;;  %v1577_v27 = vcombine.low %v1553_v44, %v1569_v47  ;;  %v1543_v36 = vcombine.high %v1533_v52, %v11824_v17 }
 0x2f7   :  { %5390 = vrot.lane.b32.xlu1 %v1517_v60, %s11869_s30  ;;  %5394 = vrot.lane.b32.xlu0 %v1541_v0, %s11870_s29  ;;  %v8809_v34 = vpop.permute.xlu0 %5170  ;;  %v1562_v0 = vcombine.high %v8039_v10, %v8354_v62  ;;  %v1585_v62 = vrot.slane %v1577_v27, %v8264_v56 }
 0x2f9   :  { %v8799_v45 = vpop.permute.xlu1 %5166  ;;  %v1576_v63 = vrot.slane %v1562_v0, %v7837_v5  ;;  %v11885_v0 = vld [vmem:[#allocation123_spill] sm:$0xff] }
 0x2fb   :  { %5398 = vrot.lane.b32.xlu1 %v1524_v31, %s11872_s28  ;;  %5402 = vrot.lane.b32.xlu0 %v1542_v19, %s11873_s27  ;;  %v8819_v60 = vpop.permute.xlu0 %5178  ;;  %v1578_v19 = vcombine.high %v1553_v44, %v1569_v47  ;;  %v1609_v47 = vcombine.high %v1585_v62, %v11824_v17 }
 0x2fc   :  { %11874 = vst [vmem:[#allocation208_spill] sm:$0xff] %v8819_v60 }
 0x2fd   :  { %v8812_v42 = vpop.permute.xlu1 %5174  ;;  %v1592_v44 = vrot.slane %v1578_v19, %v8264_v56 }
 0x2fe   :  { %11871 = vst [vmem:[#allocation207_spill] sm:$0xff] %v8812_v42  ;;  %v1540_v42 = vrot.slane %v1526_v18, %v8264_v56  ;;  %v1629_v18 = vcombine.low %v11882_v59, %v8363_v11 }
 0x2ff   :  { %5406 = vrot.lane.b32.xlu1 %v1533_v52, %s11876_s26  ;;  %5410 = vrot.lane.b32.xlu0 %v1543_v36, %s11877_s25  ;;  %v8831_v31 = vpop.permute.xlu0 %5186  ;;  %v1560_v52 = vrot.slane %v1546_v21, %v7837_v5 }
 0x300   :  { %11878 = vst [vmem:[#allocation210_spill] sm:$0xff] %v8831_v31  ;;  %v1544_v10 = vcombine.high %v1540_v42, %v11824_v17 }
 0x301   :  { %v8823_v26 = vpop.permute.xlu1 %5182  ;;  %v1593_v48 = vcombine.low %v1560_v52, %v1576_v63 }
 0x302   :  { %11875 = vst [vmem:[#allocation209_spill] sm:$0xff] %v8823_v26 }
 0x303   :  { %5414 = vrot.lane.b32.xlu1 %v1540_v42, %s11879_s24  ;;  %5418 = vrot.lane.b32.xlu0 %v1544_v10, %s11881_s23  ;;  %v8843_v36 = vpop.permute.xlu0 %5194  ;;  %v11886_v42 = vld [vmem:[#allocation23_spill] sm:$0xff]  ;;  %v1594_v10 = vcombine.high %v1560_v52, %v1576_v63  ;;  %v1601_v60 = vrot.slane %v1593_v48, %v8264_v56 }
 0x304   :  { %11883 = vst [vmem:[#allocation73_spill] sm:$0xff] %v8843_v36  ;;  %v1613_v27 = vcombine.low %v11886_v42, %v11885_v0  ;;  %v1610_v36 = vcombine.high %v1592_v44, %v11824_v17  ;;  %v1614_v48 = vcombine.high %v11886_v42, %v11885_v0 }
 0x305   :  { %v8837_v26 = vpop.permute.xlu1 %5190 }
 0x306   :  { %11880 = vst [vmem:[#allocation211_spill] sm:$0xff] %v8837_v26  ;;  %v1637_v26 = vrot.slane %v1629_v18, %v7837_v5  ;;  %v1621_v19 = vrot.slane %v1613_v27, %v7837_v5  ;;  %v1611_v18 = vcombine.high %v1601_v60, %v11824_v17 }
 0x307   :  { %5422 = vrot.lane.b32.xlu1 %v1585_v62, %s11884_s22  ;;  %5426 = vrot.lane.b32.xlu0 %v1609_v47, %s11887_s21  ;;  %v1630_v47 = vcombine.high %v11882_v59, %v8363_v11 }
 0x308   :  { %v1645_v63 = vcombine.low %v1621_v19, %v1637_v26  ;;  %v1646_v27 = vcombine.high %v1621_v19, %v1637_v26 }
 0x309   :  { %v8851_v21 = vpop.permute.xlu1 %5198  ;;  %v8854_v31 = vpop.permute.xlu0 %5202 }
 0x30a   :  { %11888 = vst [vmem:[#allocation123_spill] sm:$0xff] %v8854_v31  ;;  %v1608_v31 = vrot.slane %v1594_v10, %v8264_v56  ;;  %v11900_v10 = vld [vmem:[#allocation75_spill] sm:$0xff]  ;;  %v1660_v19 = vrot.slane %v1646_v27, %v8264_v56 }
 0x30b   :  { %5430 = vrot.lane.b32.xlu1 %v1592_v44, %s11889_s20  ;;  %5434 = vrot.lane.b32.xlu0 %v1610_v36, %s11890_s19  ;;  %v1644_v44 = vrot.slane %v1630_v47, %v7837_v5  ;;  %v1698_v27 = vcombine.high %v11900_v10, %v8373_v13 }
 0x30c   :  { %v1612_v59 = vcombine.high %v1608_v31, %v11824_v17 }
 0x30d   :  { %v8861_v62 = vpop.permute.xlu1 %5206  ;;  %v8865_v52 = vpop.permute.xlu0 %5210 }
 0x30e   :  { %11891 = vst [vmem:[#allocation23_spill] sm:$0xff] %v8861_v62  ;;  %11892 = vst [vmem:[#allocation212_spill] sm:$0xff] %v8865_v52  ;;  %v1653_v52 = vrot.slane %v1645_v63, %v8264_v56  ;;  %v11903_v63 = vld [vmem:[#allocation125_spill] sm:$0xff] }
 0x30f   :  { %5438 = vrot.lane.b32.xlu1 %v1601_v60, %s11893_s18  ;;  %5442 = vrot.lane.b32.xlu0 %v1611_v18, %s11894_s17  ;;  %v1628_v60 = vrot.slane %v1614_v48, %v7837_v5  ;;  %v1697_v18 = vcombine.low %v11900_v10, %v8373_v13 }
 0x310   :  { %v1677_v26 = vcombine.high %v1653_v52, %v11824_v17 }
 0x311   :  { %v8873_v36 = vpop.permute.xlu1 %5214  ;;  %v8876_v11 = vpop.permute.xlu0 %5218  ;;  %v1661_v42 = vcombine.low %v1628_v60, %v1644_v44 }
 0x312   :  { %11895 = vst [vmem:[#allocation213_spill] sm:$0xff] %v8873_v36  ;;  %11896 = vst [vmem:[#allocation214_spill] sm:$0xff] %v8876_v11 }
 0x313   :  { %5446 = vrot.lane.b32.xlu1 %v1608_v31, %s11897_s16  ;;  %5450 = vrot.lane.b32.xlu0 %v1612_v59, %s11898_s15  ;;  %v11904_v31 = vld [vmem:[#allocation25_spill] sm:$0xff]  ;;  %v1662_v59 = vcombine.high %v1628_v60, %v1644_v44  ;;  %v1669_v62 = vrot.slane %v1661_v42, %v8264_v56 }
 0x314   :  { %v1681_v11 = vcombine.low %v11904_v31, %v11903_v63  ;;  %v1682_v42 = vcombine.high %v11904_v31, %v11903_v63  ;;  %v11915_v63 = vld [vmem:[#allocation166_spill] sm:$0xff] }
 0x315   :  { %v8883_v0 = vpop.permute.xlu1 %5222  ;;  %v8887_v47 = vpop.permute.xlu0 %5226  ;;  %v11918_v31 = vld [vmem:[#allocation158_spill] sm:$0xff] }
 0x316   :  { %11899 = vst [vmem:[#allocation215_spill] sm:$0xff] %v8883_v0  ;;  %11901 = vst [vmem:[#allocation75_spill] sm:$0xff] %v8887_v47  ;;  %v1705_v0 = vrot.slane %v1697_v18, %v7837_v5  ;;  %v1678_v47 = vcombine.high %v1660_v19, %v11824_v17  ;;  %v1679_v18 = vcombine.high %v1669_v62, %v11824_v17 }
 0x317   :  { %5454 = vrot.lane.b32.xlu1 %v1653_v52, %s11902_s14  ;;  %5458 = vrot.lane.b32.xlu0 %v1677_v26, %s11580_s7  ;;  %v1689_v52 = vrot.slane %v1681_v11, %v7837_v5  ;;  %s11911_s7 = smov 104   ;;  %v1712_v11 = vrot.slane %v1698_v27, %v7837_v5  ;;  %v11919_v27 = vld [vmem:[#allocation58_spill] sm:$0xff] }
 0x319   :  { %v8895_v48 = vpop.permute.xlu1 %5230  ;;  %v8898_v36 = vpop.permute.xlu0 %5234  ;;  %v1713_v44 = vcombine.low %v1689_v52, %v1705_v0  ;;  %v1714_v10 = vcombine.high %v1689_v52, %v1705_v0  ;;  %v1765_v0 = vcombine.low %v11919_v27, %v11918_v31 }
 0x31a   :  { %11905 = vst [vmem:[#allocation125_spill] sm:$0xff] %v8895_v48  ;;  %11906 = vst [vmem:[#allocation25_spill] sm:$0xff] %v8898_v36  ;;  %v1676_v36 = vrot.slane %v1662_v59, %v8264_v56  ;;  %v1696_v59 = vrot.slane %v1682_v42, %v7837_v5 }
 0x31b   :  { %5462 = vrot.lane.b32.xlu1 %v1660_v19, %s11907_s12  ;;  %5466 = vrot.lane.b32.xlu0 %v1678_v47, %s11908_s11 }
 0x31c   :  { %v1680_v19 = vcombine.high %v1676_v36, %v11824_v17  ;;  %v1729_v52 = vcombine.low %v1696_v59, %v1712_v11 }
 0x31d   :  { %v8907_v26 = vpop.permute.xlu1 %5238  ;;  %v8909_v60 = vpop.permute.xlu0 %5242 }
 0x31e   :  { %11909 = vst [vmem:[#allocation216_spill] sm:$0xff] %v8907_v26  ;;  %11910 = vst [vmem:[#allocation217_spill] sm:$0xff] %v8909_v60  ;;  %v1721_v60 = vrot.slane %v1713_v44, %v8264_v56 }
 0x31f   :  { %5470 = vrot.lane.b32.xlu1 %v1669_v62, %s11911_s7  ;;  %5474 = vrot.lane.b32.xlu0 %v1679_v18, %s11912_s0  ;;  %v7030_v62 = vsel %vm7029_vm0, %v11915_v63, %v8585_v33  ;;  %v1728_v33 = vrot.slane %v1714_v10, %v8264_v56  ;;  %v11922_v63 = vld [vmem:[#allocation108_spill] sm:$0xff]  ;;  %v1737_v10 = vrot.slane %v1729_v52, %v8264_v56 }
 0x320   :  { %v7032_v44 = vsel %vm7031_vm1, %v7030_v62, %v8542_v2  ;;  %v1730_v62 = vcombine.high %v1696_v59, %v1712_v11 }
 0x321   :  { %v8918_v13 = vpop.permute.xlu1 %5246  ;;  %v8920_v47 = vpop.permute.xlu0 %5250  ;;  %v1746_v26 = vcombine.high %v1728_v33, %v11824_v17 }
 0x322   :  { %11913 = vst [vmem:[#allocation218_spill] sm:$0xff] %v8918_v13  ;;  %11914 = vst [vmem:[#allocation219_spill] sm:$0xff] %v8920_v47  ;;  %v1745_v47 = vcombine.high %v1721_v60, %v11824_v17 }
 0x323   :  { %5478 = vrot.lane.b32.xlu1 %v1676_v36, %s11916_s13  ;;  %5482 = vrot.lane.b32.xlu0 %v1680_v19, %s11917_s8  ;;  %v11923_v36 = vld [vmem:[#allocation27_spill] sm:$0xff]  ;;  %v1773_v19 = vrot.slane %v1765_v0, %v7837_v5 }
 0x324   :  { %v1749_v13 = vcombine.low %v11923_v36, %v11922_v63  ;;  %v1750_v11 = vcombine.high %v11923_v36, %v11922_v63 }
 0x325   :  { %v8932_v18 = vpop.permute.xlu1 %5254  ;;  %v8936_v42 = vpop.permute.xlu0 %5258 }
 0x326   :  { %11920 = vst [vmem:[#allocation166_spill] sm:$0xff] %v8932_v18  ;;  %11921 = vst [vmem:[#allocation158_spill] sm:$0xff] %v8936_v42  ;;  %v7034_v18 = vsel %vm7033_vm2, %v7032_v44, %v8556_v14  ;;  %v1757_v48 = vrot.slane %v1749_v13, %v7837_v5  ;;  %v1747_v44 = vcombine.high %v1737_v10, %v11824_v17 }
 0x327   :  { %5486 = vrot.lane.b32.xlu1 %v1721_v60, %s11924_s9  ;;  %5490 = vrot.lane.b32.xlu0 %v1745_v47, %s11925_s10  ;;  %v1766_v47 = vcombine.high %v11919_v27, %v11918_v31  ;;  %v7036_v14 = vsel %vm7035_vm3, %v7034_v18, %v8570_v54  ;;  %s11927_s10 = smov 118   ;;  %v1764_v27 = vrot.slane %v1750_v11, %v7837_v5 }
 0x328   :  { %v1781_v59 = vcombine.low %v1757_v48, %v1773_v19  ;;  %v7038_v31 = vsel %vm7037_vm4, %v7036_v14, %v8589_v37  ;;  %v1782_v18 = vcombine.high %v1757_v48, %v1773_v19  ;;  %v11932_v48 = vld [vmem:[#allocation59_spill] sm:$0xff] }
 0x329   :  { %v8947_v2 = vpop.permute.xlu1 %5262  ;;  %v5267_v42 = vpop.permute.xlu0 %5266  ;;  %v7040_v63 = vsel %vm7039_vm5, %v7038_v31, %v8599_v7 }
 0x32a   :  { %v7155_v60 = vsel %vm7029_vm0, %v8620_v39, %v5267_v42  ;;  %v1744_v39 = vrot.slane %v1730_v62, %v8264_v56  ;;  %v7042_v14 = vsel %vm7041_vm6, %v7040_v63, %v8604_v23 }
 0x32b   :  { %5494 = vrot.lane.b32.xlu1 %v1728_v33, %s11926_s1  ;;  %5498 = vrot.lane.b32.xlu0 %v1746_v26, %s11927_s10  ;;  %s11928_s1 = smov 120   ;;  %v1780_v26 = vrot.slane %v1766_v47, %v7837_v5  ;;  %s11929_s10 = smov 122   ;;  %v8973_v33 = vrot.slane %v1781_v59, %v8264_v56  ;;  %v11931_v47 = vld [vmem:[#allocation159_spill] sm:$0xff]  ;;  %v1796_v59 = vrot.slane %v1782_v18, %v8264_v56 }
 0x32c   :  { %v1748_v62 = vcombine.high %v1744_v39, %v11824_v17  ;;  %v1833_v19 = vcombine.low %v11932_v48, %v11931_v47  ;;  %v7044_v23 = vsel %vm7043_vm7, %v7042_v14, %v8614_v16 }
 0x32d   :  { %v5271_v0 = vpop.permute.xlu1 %5270  ;;  %v5275_v52 = vpop.permute.xlu0 %5274  ;;  %v1813_v11 = vcombine.high %v8973_v33, %v11824_v17  ;;  %v1814_v63 = vcombine.high %v1796_v59, %v11824_v17 }
 0x32e   :  { %v7156_v13 = vsel %vm7031_vm1, %v7155_v60, %v5271_v0  ;;  %v1797_v60 = vcombine.low %v1764_v27, %v1780_v26 }
 0x32f   :  { %5502 = vrot.lane.b32.xlu1 %v1737_v10, %s11928_s1  ;;  %v7157_v54 = vsel %vm7033_vm2, %v7156_v13, %v5275_v52  ;;  %5506 = vrot.lane.b32.xlu0 %v1747_v44, %s11929_s10  ;;  %s11930_s1 = smov 124   ;;  %s11933_s10 = smov 126   ;;  %v11934_v52 = vld [vmem:[#allocation109_spill] sm:$0xff] }
 0x330   :  { %v11935_v44 = vld [vmem:[#allocation29_spill] sm:$0xff] }
 0x331   :  { %v5279_v42 = vpop.permute.xlu1 %5278  ;;  %v5283_v36 = vpop.permute.xlu0 %5282 }
 0x332   :  { %v7158_v37 = vsel %vm7035_vm3, %v7157_v54, %v5279_v42  ;;  %v1798_v54 = vcombine.high %v1764_v27, %v1780_v26  ;;  %v1841_v42 = vrot.slane %v1833_v19, %v7837_v5  ;;  %v7046_v26 = vsel %vm11649_vm8, %v7044_v23, %v8622_v51 }
 0x333   :  { %5510 = vrot.lane.b32.xlu1 %v1744_v39, %s11930_s1  ;;  %v7159_v10 = vsel %vm7037_vm4, %v7158_v37, %v5283_v36  ;;  %5514 = vrot.lane.b32.xlu0 %v1748_v62, %s11933_s10  ;;  %v1817_v39 = vcombine.low %v11935_v44, %v11934_v52  ;;  %s11936_s1 = smov 2   ;;  %s11937_s10 = smov 4   ;;  %v1805_v37 = vrot.slane %v1797_v60, %v8264_v56 }
 0x334   :  { %v1834_v27 = vcombine.high %v11932_v48, %v11931_v47  ;;  %v7048_v19 = vsel %vm11648_vm9, %v7046_v26, %v8627_v1  ;;  %v1812_v51 = vrot.slane %v1798_v54, %v8264_v56 }
 0x335   :  { %v5287_v7 = vpop.permute.xlu1 %5286  ;;  %v5291_v13 = vpop.permute.xlu0 %5290  ;;  %v7050_v47 = vsel %vm11647_vm10, %v7048_v19, %v8635_v61  ;;  %v11946_v19 = vld [vmem:[#allocation110_spill] sm:$0xff] }
 0x336   :  { %v7160_v0 = vsel %vm7039_vm5, %v7159_v10, %v5287_v7  ;;  %v1825_v10 = vrot.slane %v1817_v39, %v7837_v5  ;;  %v1815_v7 = vcombine.high %v1805_v37, %v11824_v17  ;;  %v1848_v48 = vrot.slane %v1834_v27, %v7837_v5 }
 0x337   :  { %5518 = vrot.lane.b32.xlu1 %v1813_v11, %s11936_s1  ;;  %v7161_v31 = vsel %vm7041_vm6, %v7160_v0, %v5291_v13  ;;  %5522 = vrot.lane.b32.xlu0 %v1796_v59, %s11937_s10  ;;  %s11938_s1 = smov 6   ;;  %s11939_s10 = smov 8   ;;  %v1818_v0 = vcombine.high %v11935_v44, %v11934_v52  ;;  %v7052_v13 = vsel %vm11650_vm11, %v7050_v47, %v8641_v4 }
 0x338   :  { %v1849_v60 = vcombine.low %v1825_v10, %v1841_v42  ;;  %v1850_v39 = vcombine.high %v1825_v10, %v1841_v42  ;;  %v1816_v52 = vcombine.high %v1812_v51, %v11824_v17  ;;  %v11944_v42 = vld [vmem:[#allocation60_spill] sm:$0xff] }
 0x339   :  { %v5295_v18 = vpop.permute.xlu1 %5294  ;;  %v5299_v62 = vpop.permute.xlu0 %5298  ;;  %v1832_v23 = vrot.slane %v1818_v0, %v7837_v5 }
 0x33a   :  { %v7162_v36 = vsel %vm7043_vm7, %v7161_v31, %v5295_v18  ;;  %v1857_v44 = vrot.slane %v1849_v60, %v8264_v56  ;;  %v7054_v18 = vsel %vm11592_vm12, %v7052_v13, %v8647_v50  ;;  %v1864_v50 = vrot.slane %v1850_v39, %v8264_v56  ;;  %v11947_v60 = vld [vmem:[#allocation31_spill] sm:$0xff] }
 0x33b   :  { %5526 = vrot.lane.b32.xlu1 %v1814_v63, %s11938_s1  ;;  %v7163_v16 = vsel %vm11649_vm8, %v7162_v36, %v5299_v62  ;;  %5530 = vrot.lane.b32.xlu0 %v1805_v37, %s11939_s10  ;;  %s11940_s1 = smov 10   ;;  %s11941_s10 = smov 12   ;;  %v11943_v63 = vld [vmem:[#allocation160_spill] sm:$0xff]  ;;  %v7056_v36 = vsel %vm11593_vm13, %v7054_v18, %v8655_v24  ;;  %v1865_v62 = vcombine.low %v1832_v23, %v1848_v48 }
 0x33c   :  { %v1901_v37 = vcombine.low %v11944_v42, %v11943_v63  ;;  %v1881_v26 = vcombine.high %v1857_v44, %v11824_v17  ;;  %v1882_v47 = vcombine.high %v1864_v50, %v11824_v17 }
 0x33d   :  { %v5303_v14 = vpop.permute.xlu1 %5302  ;;  %v5307_v59 = vpop.permute.xlu0 %5306 }
 0x33e   :  { %v7164_v11 = vsel %vm11648_vm9, %v7163_v16, %v5303_v14  ;;  %v1885_v14 = vcombine.low %v11947_v60, %v11946_v19 }
 0x33f   :  { %5534 = vrot.lane.b32.xlu1 %v1815_v7, %s11940_s1  ;;  %v7165_v1 = vsel %vm11647_vm10, %v7164_v11, %v5307_v59  ;;  %5538 = vrot.lane.b32.xlu0 %v1812_v51, %s11941_s10  ;;  %s11942_s1 = smov 14   ;;  %s11945_s10 = smov 16   ;;  %v7058_v7 = vsel %vm11594_vm14, %v7056_v36, %v8661_v57  ;;  %v1866_v51 = vcombine.high %v1832_v23, %v1848_v48 }
 0x340   :  { %v7060_v11 = vsel %vm11595_vm15, %v7058_v7, %v8666_v15  ;;  %v1909_v59 = vrot.slane %v1901_v37, %v7837_v5  ;;  %v1893_v39 = vrot.slane %v1885_v14, %v7837_v5 }
 0x341   :  { %v5311_v31 = vpop.permute.xlu1 %5310  ;;  %v5315_v54 = vpop.permute.xlu0 %5314 }
 0x342   :  { %v7166_v61 = vsel %vm11650_vm11, %v7165_v1, %v5311_v31  ;;  %v1873_v1 = vrot.slane %v1865_v62, %v8264_v56  ;;  %v1902_v31 = vcombine.high %v11944_v42, %v11943_v63  ;;  %v1918_v36 = vcombine.high %v1893_v39, %v1909_v59 }
 0x343   :  { %5542 = vrot.lane.b32.xlu1 %v1816_v52, %s11942_s1  ;;  %v7167_v4 = vsel %vm11592_vm12, %v7166_v61, %v5315_v54  ;;  %5546 = vrot.lane.b32.xlu0 %v1857_v44, %s11945_s10  ;;  %s11948_s1 = smov 18   ;;  %vm11596_vm12 = vcmask 277504   ;;  %s11949_s10 = smov 20   ;;  %v1917_v44 = vcombine.low %v1893_v39, %v1909_v59 }
 0x344   :  { %v7062_v48 = vsel %vm11596_vm12, %v7060_v11, %v8671_v38  ;;  %v1883_v54 = vcombine.high %v1873_v1, %v11824_v17  ;;  %v1880_v38 = vrot.slane %v1866_v51, %v8264_v56  ;;  %v1916_v42 = vrot.slane %v1902_v31, %v7837_v5 }
 0x345   :  { %v5319_v10 = vpop.permute.xlu1 %5318  ;;  %v5323_v27 = vpop.permute.xlu0 %5322 }
 0x346   :  { %v7168_v16 = vsel %vm11593_vm13, %v7167_v4, %v5319_v10  ;;  %vm11597_vm13 = vcmask 293888   ;;  %v1886_v4 = vcombine.high %v11947_v60, %v11946_v19  ;;  %v1884_v10 = vcombine.high %v1880_v38, %v11824_v17  ;;  %v11955_v19 = vld [vmem:[#allocation161_spill] sm:$0xff] }
 0x347   :  { %5550 = vrot.lane.b32.xlu1 %v1881_v26, %s11948_s1  ;;  %v7169_v24 = vsel %vm11594_vm14, %v7168_v16, %v5323_v27  ;;  %5554 = vrot.lane.b32.xlu0 %v1864_v50, %s11949_s10  ;;  %s11950_s1 = smov 22   ;;  %v7064_v52 = vsel %vm11597_vm13, %v7062_v48, %v8677_v32  ;;  %vm11598_vm14 = vcmask 310272   ;;  %s11951_s10 = smov 24   ;;  %v1925_v26 = vrot.slane %v1917_v44, %v8264_v56  ;;  %v11956_v60 = vld [vmem:[#allocation61_spill] sm:$0xff] }
 0x348   :  { %v7066_v63 = vsel %vm11598_vm14, %v7064_v52, %v8683_v9  ;;  %v1900_v16 = vrot.slane %v1886_v4, %v7837_v5  ;;  %v1969_v14 = vcombine.low %v11956_v60, %v11955_v19 }
 0x349   :  { %v5327_v0 = vpop.permute.xlu1 %5326  ;;  %v5331_v13 = vpop.permute.xlu0 %5330  ;;  %v1949_v11 = vcombine.high %v1925_v26, %v11824_v17 }
 0x34a   :  { %v7170_v57 = vsel %vm11595_vm15, %v7169_v24, %v5327_v0  ;;  %vm11599_vm15 = vcmask 326656   ;;  %v1933_v24 = vcombine.low %v1900_v16, %v1916_v42  ;;  %v1934_v39 = vcombine.high %v1900_v16, %v1916_v42 }
 0x34b   :  { %5558 = vrot.lane.b32.xlu1 %v1882_v47, %s11950_s1  ;;  %v7171_v15 = vsel %vm11596_vm12, %v7170_v57, %v5331_v13  ;;  %5562 = vrot.lane.b32.xlu0 %v1873_v1, %s11951_s10  ;;  %s11952_s1 = smov 26   ;;  %v7068_v37 = vsel %vm11599_vm15, %v7066_v63, %v8688_v28  ;;  %vm11600_vm12 = vcmask 343040   ;;  %s11953_s10 = smov 28   ;;  %v11958_v47 = vld [vmem:[#allocation111_spill] sm:$0xff]  ;;  %v11959_v1 = vld [vmem:[#allocation33_spill] sm:$0xff] }
 0x34c   :  { %v7070_v27 = vsel %vm11600_vm12, %v7068_v37, %v8693_v53  ;;  %v1932_v53 = vrot.slane %v1918_v36, %v8264_v56  ;;  %v1953_v57 = vcombine.low %v11959_v1, %v11958_v47  ;;  %v1941_v44 = vrot.slane %v1933_v24, %v8264_v56 }
 0x34d   :  { %v5335_v61 = vpop.permute.xlu1 %5334  ;;  %v5339_v18 = vpop.permute.xlu0 %5338  ;;  %v1954_v36 = vcombine.high %v11959_v1, %v11958_v47  ;;  %v11970_v1 = vld [vmem:[#allocation112_spill] sm:$0xff] }
 0x34e   :  { %v7172_v23 = vsel %vm11597_vm13, %v7171_v15, %v5335_v61  ;;  %vm11601_vm13 = vcmask 359424   ;;  %v1977_v15 = vrot.slane %v1969_v14, %v7837_v5  ;;  %v1950_v52 = vcombine.high %v1932_v53, %v11824_v17  ;;  %v11967_v14 = vld [vmem:[#allocation162_spill] sm:$0xff] }
 0x34f   :  { %5566 = vrot.lane.b32.xlu1 %v1883_v54, %s11952_s1  ;;  %v7173_v32 = vsel %vm11598_vm14, %v7172_v23, %v5339_v18  ;;  %5570 = vrot.lane.b32.xlu0 %v1880_v38, %s11953_s10  ;;  %s11954_s1 = smov 30   ;;  %v7072_v7 = vsel %vm11601_vm13, %v7070_v27, %v8699_v6  ;;  %vm11602_vm14 = vcmask 375808   ;;  %s11957_s10 = smov 32   ;;  %v1961_v54 = vrot.slane %v1953_v57, %v7837_v5  ;;  %v11971_v57 = vld [vmem:[#allocation35_spill] sm:$0xff] }
 0x350   :  { %v7074_v13 = vsel %vm11602_vm14, %v7072_v7, %v8705_v55  ;;  %v1970_v23 = vcombine.high %v11956_v60, %v11955_v19  ;;  %v1968_v19 = vrot.slane %v1954_v36, %v7837_v5  ;;  %v11968_v7 = vld [vmem:[#allocation62_spill] sm:$0xff] }
 0x351   :  { %v5343_v62 = vpop.permute.xlu1 %5342  ;;  %v5347_v50 = vpop.permute.xlu0 %5346  ;;  %v1985_v4 = vcombine.low %v1961_v54, %v1977_v15  ;;  %v2037_v24 = vcombine.low %v11968_v7, %v11967_v14 }
 0x352   :  { %v7174_v9 = vsel %vm11599_vm15, %v7173_v32, %v5343_v62  ;;  %vm11603_vm15 = vcmask 392192   ;;  %v1951_v32 = vcombine.high %v1941_v44, %v11824_v17 }
 0x353   :  { %5574 = vrot.lane.b32.xlu1 %v1884_v10, %s11954_s1  ;;  %v7175_v28 = vsel %vm11600_vm12, %v7174_v9, %v5347_v50  ;;  %5578 = vrot.lane.b32.xlu0 %v1925_v26, %s11957_s10  ;;  %s11960_s1 = smov 34   ;;  %v7076_v48 = vsel %vm11603_vm15, %v7074_v13, %v8713_v8  ;;  %vm11604_vm12 = vcmask 408576   ;;  %s11961_s10 = smov 36   ;;  %v1984_v10 = vrot.slane %v1970_v23, %v7837_v5 }
 0x354   :  { %v7078_v38 = vsel %vm11604_vm12, %v7076_v48, %v8719_v43  ;;  %v1948_v43 = vrot.slane %v1934_v39, %v8264_v56  ;;  %v1986_v9 = vcombine.high %v1961_v54, %v1977_v15  ;;  %v1993_v27 = vrot.slane %v1985_v4, %v8264_v56 }
 0x355   :  { %v5351_v51 = vpop.permute.xlu1 %5350  ;;  %v5355_v0 = vpop.permute.xlu0 %5354  ;;  %v2021_v13 = vcombine.low %v11971_v57, %v11970_v1  ;;  %v2002_v39 = vcombine.high %v1968_v19, %v1984_v10  ;;  %v2045_v15 = vrot.slane %v2037_v24, %v7837_v5 }
 0x356   :  { %v7176_v59 = vsel %vm11601_vm13, %v7175_v28, %v5351_v51  ;;  %vm11605_vm13 = vcmask 424960   ;;  %v1952_v16 = vcombine.high %v1948_v43, %v11824_v17 }
 0x357   :  { %5582 = vrot.lane.b32.xlu1 %v1949_v11, %s11960_s1  ;;  %v7177_v6 = vsel %vm11602_vm14, %v7176_v59, %v5355_v0  ;;  %5586 = vrot.lane.b32.xlu0 %v1932_v53, %s11961_s10  ;;  %s11962_s1 = smov 38   ;;  %v7080_v18 = vsel %vm11605_vm13, %v7078_v38, %v8725_v30  ;;  %vm11606_vm14 = vcmask 441344   ;;  %s11963_s10 = smov 40   ;;  %v2001_v11 = vcombine.low %v1968_v19, %v1984_v10 }
 0x358   :  { %v7082_v62 = vsel %vm11606_vm14, %v7080_v18, %v8730_v46  ;;  %v2017_v59 = vcombine.high %v1993_v27, %v11824_v17  ;;  %v2038_v38 = vcombine.high %v11968_v7, %v11967_v14 }
 0x359   :  { %v5359_v31 = vpop.permute.xlu1 %5358  ;;  %v5363_v61 = vpop.permute.xlu0 %5362 }
 0x35a   :  { %v7178_v55 = vsel %vm11603_vm15, %v7177_v6, %v5359_v31  ;;  %vm11607_vm15 = vcmask 457728  }
 0x35b   :  { %5590 = vrot.lane.b32.xlu1 %v1950_v52, %s11962_s1  ;;  %v7179_v8 = vsel %vm11604_vm12, %v7178_v55, %v5363_v61  ;;  %5594 = vrot.lane.b32.xlu0 %v1941_v44, %s11963_s10  ;;  %s11964_s1 = smov 42   ;;  %v7084_v26 = vsel %vm11607_vm15, %v7082_v62, %v8735_v49  ;;  %vm11608_vm12 = vcmask 474112   ;;  %s11965_s10 = smov 44   ;;  %v2009_v44 = vrot.slane %v2001_v11, %v8264_v56  ;;  %v11977_v11 = vld [vmem:[#allocation37_spill] sm:$0xff] }
 0x35c   :  { %v7086_v60 = vsel %vm11608_vm12, %v7084_v26, %v8742_v40  ;;  %v2000_v40 = vrot.slane %v1986_v9, %v8264_v56  ;;  %v2029_v61 = vrot.slane %v2021_v13, %v7837_v5 }
 0x35d   :  { %v5367_v63 = vpop.permute.xlu1 %5366  ;;  %v5371_v37 = vpop.permute.xlu0 %5370  ;;  %v2019_v4 = vcombine.high %v2009_v44, %v11824_v17 }
 0x35e   :  { %v7180_v42 = vsel %vm11605_vm13, %v7179_v8, %v5367_v63  ;;  %vm11609_vm13 = vcmask 490496   ;;  %v2018_v52 = vcombine.high %v2000_v40, %v11824_v17  ;;  %v2053_v23 = vcombine.low %v2029_v61, %v2045_v15 }
 0x35f   :  { %5598 = vrot.lane.b32.xlu1 %v1951_v32, %s11964_s1  ;;  %v7181_v30 = vsel %vm11606_vm14, %v7180_v42, %v5371_v37  ;;  %5602 = vrot.lane.b32.xlu0 %v1948_v43, %s11965_s10  ;;  %s11966_s1 = smov 46   ;;  %v7088_v51 = vsel %vm11609_vm13, %v7086_v60, %v8750_v22  ;;  %vm11610_vm14 = vcmask 506880   ;;  %s11969_s10 = smov 48   ;;  %v2022_v43 = vcombine.high %v11971_v57, %v11970_v1 }
 0x360   :  { %v7090_v6 = vsel %vm11610_vm14, %v7088_v51, %v8755_v20  ;;  %v2052_v37 = vrot.slane %v2038_v38, %v7837_v5  ;;  %v2054_v62 = vcombine.high %v2029_v61, %v2045_v15  ;;  %v2061_v26 = vrot.slane %v2053_v23, %v8264_v56  ;;  %v11976_v51 = vld [vmem:[#allocation113_spill] sm:$0xff] }
 0x361   :  { %v5375_v50 = vpop.permute.xlu1 %5374  ;;  %v5379_v28 = vpop.permute.xlu0 %5378  ;;  %v2090_v38 = vcombine.high %v11977_v11, %v11976_v51 }
 0x362   :  { %v7182_v46 = vsel %vm11607_vm15, %v7181_v30, %v5375_v50  ;;  %vm11611_vm15 = vcmask 523264   ;;  %v2036_v50 = vrot.slane %v2022_v43, %v7837_v5  ;;  %v2085_v14 = vcombine.high %v2061_v26, %v11824_v17 }
 0x363   :  { %5606 = vrot.lane.b32.xlu1 %v1952_v16, %s11966_s1  ;;  %v7183_v49 = vsel %vm11608_vm12, %v7182_v46, %v5379_v28  ;;  %5610 = vrot.lane.b32.xlu0 %v1993_v27, %s11969_s10  ;;  %s11972_s1 = smov 50   ;;  %v7092_v48 = vsel %vm11611_vm15, %v7090_v6, %v8761_v29  ;;  %vm11612_vm12 = vcmask 539648   ;;  %s11973_s10 = smov 52   ;;  %v11974_v27 = vld [vmem:[#allocation163_spill] sm:$0xff] }
 0x364   :  { %v7094_v54 = vsel %vm11612_vm12, %v7092_v48, %v8767_v3  ;;  %v2016_v3 = vrot.slane %v2002_v39, %v8264_v56  ;;  %v11975_v46 = vld [vmem:[#allocation63_spill] sm:$0xff]  ;;  %v2069_v60 = vcombine.low %v2036_v50, %v2052_v37 }
 0x365   :  { %v5383_v53 = vpop.permute.xlu1 %5382  ;;  %v5387_v47 = vpop.permute.xlu0 %5386  ;;  %v2105_v28 = vcombine.low %v11975_v46, %v11974_v27  ;;  %v11978_v39 = vld [vmem:[#allocation207_spill] sm:$0xff]  ;;  %v2106_v15 = vcombine.high %v11975_v46, %v11974_v27 }
 0x366   :  { %v7184_v0 = vsel %vm11609_vm13, %v7183_v49, %v5383_v53  ;;  %vm11613_vm13 = vcmask 556032   ;;  %v2020_v10 = vcombine.high %v2016_v3, %v11824_v17  ;;  %v2089_v53 = vcombine.low %v11977_v11, %v11976_v51 }
 0x367   :  { %5614 = vrot.lane.b32.xlu1 %v2017_v59, %s11972_s1  ;;  %v7185_v22 = vsel %vm11610_vm14, %v7184_v0, %v5387_v47  ;;  %5618 = vrot.lane.b32.xlu0 %v2000_v40, %s11973_s10  ;;  %v7096_v8 = vsel %vm11613_vm13, %v7094_v54, %v8772_v41  ;;  %vm11614_vm14 = vcmask 572416   ;;  %v2070_v40 = vcombine.high %v2036_v50, %v2052_v37 }
 0x368   :  { %v7098_v42 = vsel %vm11614_vm14, %v7096_v8, %v8777_v25  ;;  %v2113_v47 = vrot.slane %v2105_v28, %v7837_v5  ;;  %v2077_v13 = vrot.slane %v2069_v60, %v8264_v56  ;;  %v11980_v8 = vld [vmem:[#allocation209_spill] sm:$0xff] }
 0x369   :  { %v5391_v31 = vpop.permute.xlu1 %5390  ;;  %v5395_v55 = vpop.permute.xlu0 %5394  ;;  %v2084_v61 = vrot.slane %v2070_v40, %v8264_v56 }
 0x36a   :  { %v7186_v20 = vsel %vm11611_vm15, %v7185_v22, %v5391_v31  ;;  %vm11615_vm15 = vcmask 588800   ;;  %v2097_v22 = vrot.slane %v2089_v53, %v7837_v5  ;;  %v11979_v31 = vld [vmem:[#allocation208_spill] sm:$0xff]  ;;  %v11988_v53 = vld [vmem:[#allocation123_spill] sm:$0xff] }
 0x36b   :  { %5622 = vrot.lane.b32.xlu1 %v2018_v52, %s11864_s4  ;;  %v7187_v29 = vsel %vm11612_vm12, %v7186_v20, %v5395_v55  ;;  %5626 = vrot.lane.b32.xlu0 %v2009_v44, %s11865_s5  ;;  %v7100_v36 = vsel %vm11615_vm15, %v7098_v42, %v8783_v12  ;;  %vm11616_vm12 = vcmask 605184   ;;  %v2087_v55 = vcombine.high %v2077_v13, %v11824_v17 }
 0x36c   :  { %v7102_v16 = vsel %vm11616_vm12, %v7100_v36, %v8789_v35  ;;  %v2068_v35 = vrot.slane %v2054_v62, %v8264_v56  ;;  %v2121_v44 = vcombine.low %v2097_v22, %v2113_v47  ;;  %v2088_v42 = vcombine.high %v2084_v61, %v11824_v17 }
 0x36d   :  { %v5399_v18 = vpop.permute.xlu1 %5398  ;;  %v5403_v32 = vpop.permute.xlu0 %5402  ;;  %v2104_v62 = vrot.slane %v2090_v38, %v7837_v5 }
 0x36e   :  { %v7188_v63 = vsel %vm11613_vm13, %v7187_v29, %v5399_v18  ;;  %vm11617_vm13 = vcmask 621568   ;;  %v2086_v57 = vcombine.high %v2068_v35, %v11824_v17 }
 0x36f   :  { %5630 = vrot.lane.b32.xlu1 %v2019_v4, %s11866_s6  ;;  %v7189_v41 = vsel %vm11614_vm14, %v7188_v63, %v5403_v32  ;;  %5634 = vrot.lane.b32.xlu0 %v2016_v3, %s11867_s3  ;;  %v7104_v19 = vsel %vm11617_vm13, %v7102_v16, %v8794_v58  ;;  %vm11618_vm14 = vcmask 637952   ;;  %v2120_v4 = vrot.slane %v2106_v15, %v7837_v5  ;;  %v11981_v3 = vld [vmem:[#allocation210_spill] sm:$0xff]  ;;  %v11985_v16 = vld [vmem:[#allocation73_spill] sm:$0xff] }
 0x370   :  { %v7106_v59 = vsel %vm11618_vm14, %v7104_v19, %v8799_v45  ;;  %v2122_v32 = vcombine.high %v2097_v22, %v2113_v47 }
 0x371   :  { %v5407_v30 = vpop.permute.xlu1 %5406  ;;  %v5411_v9 = vpop.permute.xlu0 %5410  ;;  %v2137_v27 = vcombine.low %v2104_v62, %v2120_v4  ;;  %v2138_v11 = vcombine.high %v2104_v62, %v2120_v4  ;;  %v11994_v62 = vld [vmem:[#allocation165_spill] sm:$0xff] }
 0x372   :  { %v7190_v25 = vsel %vm11615_vm15, %v7189_v41, %v5407_v30  ;;  %vm11619_vm15 = vcmask 654336   ;;  %v2129_v41 = vrot.slane %v2121_v44, %v8264_v56  ;;  %v11982_v30 = vld [vmem:[#allocation211_spill] sm:$0xff]  ;;  %v2136_v19 = vrot.slane %v2122_v32, %v8264_v56 }
 0x373   :  { %5638 = vrot.lane.b32.xlu1 %v2020_v10, %s11868_s2  ;;  %v7191_v12 = vsel %vm11616_vm12, %v7190_v25, %v5411_v9  ;;  %5642 = vrot.lane.b32.xlu0 %v2061_v26, %s11869_s30  ;;  %v7108_v0 = vsel %vm11619_vm15, %v7106_v59, %v8809_v34  ;;  %vm11620_vm12 = vcmask 670720   ;;  %v11983_v25 = vld [vmem:[#allocation164_spill] sm:$0xff]  ;;  %v2145_v47 = vrot.slane %v2137_v27, %v8264_v56 }
 0x374   :  { %v7110_v48 = vsel %vm11620_vm12, %v7108_v0, %v11978_v39  ;;  %v11984_v9 = vld [vmem:[#allocation64_spill] sm:$0xff]  ;;  %v2153_v28 = vcombine.high %v2129_v41, %v11824_v17  ;;  %v2154_v0 = vcombine.high %v2136_v19, %v11824_v17 }
 0x375   :  { %v5415_v49 = vpop.permute.xlu1 %5414  ;;  %v5419_v24 = vpop.permute.xlu0 %5418  ;;  %v2173_v50 = vcombine.low %v11984_v9, %v11983_v25  ;;  %v2174_v22 = vcombine.high %v11984_v9, %v11983_v25  ;;  %v11990_v39 = vld [vmem:[#allocation212_spill] sm:$0xff] }
 0x376   :  { %v7192_v7 = vsel %vm11617_vm13, %v7191_v12, %v5415_v49  ;;  %vm11621_vm13 = vcmask 687104  }
 0x377   :  { %5646 = vrot.lane.b32.xlu1 %v2085_v14, %s11870_s29  ;;  %v7193_v58 = vsel %vm11618_vm14, %v7192_v7, %v5419_v24  ;;  %5650 = vrot.lane.b32.xlu0 %v2068_v35, %s11872_s28  ;;  %v7112_v52 = vsel %vm11621_vm13, %v7110_v48, %v11979_v31  ;;  %vm11622_vm14 = vcmask 703488   ;;  %v11986_v14 = vld [vmem:[#allocation114_spill] sm:$0xff]  ;;  %v11987_v35 = vld [vmem:[#allocation39_spill] sm:$0xff]  ;;  %v2155_v31 = vcombine.high %v2145_v47, %v11824_v17 }
 0x378   :  { %v7114_v23 = vsel %vm11622_vm14, %v7112_v52, %v11980_v8  ;;  %v2157_v7 = vcombine.low %v11987_v35, %v11986_v14  ;;  %v2152_v52 = vrot.slane %v2138_v11, %v8264_v56  ;;  %v2188_v38 = vrot.slane %v2174_v22, %v7837_v5  ;;  %v11992_v8 = vld [vmem:[#allocation214_spill] sm:$0xff] }
 0x379   :  { %v5423_v1 = vpop.permute.xlu1 %5422  ;;  %v5427_v6 = vpop.permute.xlu0 %5426 }
 0x37a   :  { %v7194_v45 = vsel %vm11619_vm15, %v7193_v58, %v5423_v1  ;;  %vm11623_vm15 = vcmask 719872   ;;  %v2181_v58 = vrot.slane %v2173_v50, %v7837_v5 }
 0x37b   :  { %5654 = vrot.lane.b32.xlu1 %v2086_v57, %s11873_s27  ;;  %v7195_v34 = vsel %vm11620_vm12, %v7194_v45, %v5427_v6  ;;  %5658 = vrot.lane.b32.xlu0 %v2077_v13, %s11876_s26  ;;  %v7116_v63 = vsel %vm11623_vm15, %v7114_v23, %v11981_v3  ;;  %vm11624_vm12 = vcmask 736256   ;;  %v2165_v57 = vrot.slane %v2157_v7, %v7837_v5  ;;  %v11989_v13 = vld [vmem:[#allocation23_spill] sm:$0xff] }
 0x37c   :  { %v7118_v10 = vsel %vm11624_vm12, %v7116_v63, %v11982_v30  ;;  %v2156_v3 = vcombine.high %v2152_v52, %v11824_v17  ;;  %v11995_v30 = vld [vmem:[#allocation65_spill] sm:$0xff] }
 0x37d   :  { %v5431_v20 = vpop.permute.xlu1 %5430  ;;  %v5435_v29 = vpop.permute.xlu0 %5434 }
 0x37e   :  { %v7196_v54 = vsel %vm11621_vm13, %v7195_v34, %v5431_v20  ;;  %vm11625_vm13 = vcmask 752640   ;;  %v2189_v34 = vcombine.low %v2165_v57, %v2181_v58 }
 0x37f   :  { %5662 = vrot.lane.b32.xlu1 %v2087_v55, %s11877_s25  ;;  %v7197_v18 = vsel %vm11622_vm14, %v7196_v54, %v5435_v29  ;;  %5666 = vrot.lane.b32.xlu0 %v2084_v61, %s11879_s24  ;;  %v7120_v12 = vsel %vm11625_vm13, %v7118_v10, %v11985_v16  ;;  %vm11626_vm14 = vcmask 769024   ;;  %v2158_v55 = vcombine.high %v11987_v35, %v11986_v14  ;;  %v11991_v61 = vld [vmem:[#allocation213_spill] sm:$0xff] }
 0x380   :  { %v7122_v24 = vsel %vm11626_vm14, %v7120_v12, %v8851_v21  ;;  %v2197_v63 = vrot.slane %v2189_v34, %v8264_v56  ;;  %v2241_v10 = vcombine.low %v11995_v30, %v11994_v62 }
 0x381   :  { %v5439_v43 = vpop.permute.xlu1 %5438  ;;  %v5443_v36 = vpop.permute.xlu0 %5442 }
 0x382   :  { %v7198_v37 = vsel %vm11623_vm15, %v7197_v18, %v5439_v43  ;;  %vm11627_vm15 = vcmask 785408   ;;  %v2190_v18 = vcombine.high %v2165_v57, %v2181_v58  ;;  %v2221_v16 = vcombine.high %v2197_v63, %v11824_v17 }
 0x383   :  { %5670 = vrot.lane.b32.xlu1 %v2088_v42, %s11881_s23  ;;  %v7199_v26 = vsel %vm11624_vm12, %v7198_v37, %v5443_v36  ;;  %5674 = vrot.lane.b32.xlu0 %v2129_v41, %s11884_s22  ;;  %v7124_v59 = vsel %vm11627_vm15, %v7122_v24, %v11988_v53  ;;  %vm11628_vm12 = vcmask 801792   ;;  %v2172_v42 = vrot.slane %v2158_v55, %v7837_v5  ;;  %v11993_v41 = vld [vmem:[#allocation215_spill] sm:$0xff]  ;;  %v12001_v24 = vld [vmem:[#allocation25_spill] sm:$0xff] }
 0x384   :  { %v7126_v45 = vsel %vm11628_vm12, %v7124_v59, %v11989_v13  ;;  %v2204_v12 = vrot.slane %v2190_v18, %v8264_v56  ;;  %v2249_v11 = vrot.slane %v2241_v10, %v7837_v5  ;;  %v2242_v13 = vcombine.high %v11995_v30, %v11994_v62  ;;  %v12009_v62 = vld [vmem:[#allocation116_spill] sm:$0xff]  ;;  %v12010_v30 = vld [vmem:[#allocation43_spill] sm:$0xff] }
 0x385   :  { %v5447_v46 = vpop.permute.xlu1 %5446  ;;  %v5451_v49 = vpop.permute.xlu0 %5450  ;;  %v2205_v9 = vcombine.low %v2172_v42, %v2188_v38  ;;  %v2206_v7 = vcombine.high %v2172_v42, %v2188_v38  ;;  %v2293_v10 = vcombine.low %v12010_v30, %v12009_v62 }
 0x386   :  { %v7200_v60 = vsel %vm11625_vm13, %v7199_v26, %v5447_v46  ;;  %vm11629_vm13 = vcmask 818176   ;;  %v11996_v26 = vld [vmem:[#allocation75_spill] sm:$0xff]  ;;  %v2222_v59 = vcombine.high %v2204_v12, %v11824_v17 }
 0x387   :  { %5678 = vrot.lane.b32.xlu1 %v2153_v28, %s11887_s21  ;;  %v7201_v51 = vsel %vm11626_vm14, %v7200_v60, %v5451_v49  ;;  %5682 = vrot.lane.b32.xlu0 %v2136_v19, %s11889_s20  ;;  %v7128_v48 = vsel %vm11629_vm13, %v7126_v45, %v11990_v39  ;;  %vm11630_vm14 = vcmask 834560   ;;  %v11997_v28 = vld [vmem:[#allocation115_spill] sm:$0xff]  ;;  %v11998_v19 = vld [vmem:[#allocation41_spill] sm:$0xff]  ;;  %v2213_v58 = vrot.slane %v2205_v9, %v8264_v56 }
 0x388   :  { %v7130_v54 = vsel %vm11630_vm14, %v7128_v48, %v11991_v61  ;;  %v2225_v60 = vcombine.low %v11998_v19, %v11997_v28  ;;  %v11999_v49 = vld [vmem:[#allocation125_spill] sm:$0xff]  ;;  %v2220_v34 = vrot.slane %v2206_v7, %v8264_v56  ;;  %v2256_v61 = vrot.slane %v2242_v13, %v7837_v5 }
 0x389   :  { %v5455_v40 = vpop.permute.xlu1 %5454  ;;  %v5459_v1 = vpop.permute.xlu0 %5458  ;;  %v12003_v45 = vld [vmem:[#allocation217_spill] sm:$0xff]  ;;  %v2223_v48 = vcombine.high %v2213_v58, %v11824_v17 }
 0x38a   :  { %v7202_v21 = vsel %vm11627_vm15, %v7201_v51, %v5455_v40  ;;  %vm11631_vm15 = vcmask 850944  }
 0x38b   :  { %5686 = vrot.lane.b32.xlu1 %v2154_v0, %s11890_s19  ;;  %v7203_v6 = vsel %vm11628_vm12, %v7202_v21, %v5459_v1  ;;  %5690 = vrot.lane.b32.xlu0 %v2145_v47, %s11893_s18  ;;  %v7132_v23 = vsel %vm11631_vm15, %v7130_v54, %v11992_v8  ;;  %vm11633_vm12 = vcmask 867328   ;;  %v2233_v47 = vrot.slane %v2225_v60, %v7837_v5  ;;  %v12002_v21 = vld [vmem:[#allocation216_spill] sm:$0xff]  ;;  %v12005_v54 = vld [vmem:[#allocation219_spill] sm:$0xff] }
 0x38c   :  { %v7134_v37 = vsel %vm11633_vm12, %v7132_v23, %v11993_v41  ;;  %v2224_v23 = vcombine.high %v2220_v34, %v11824_v17  ;;  %v12008_v41 = vld [vmem:[#allocation166_spill] sm:$0xff] }
 0x38d   :  { %v5463_v15 = vpop.permute.xlu1 %5462  ;;  %v5467_v20 = vpop.permute.xlu0 %5466  ;;  %v2257_v22 = vcombine.low %v2233_v47, %v2249_v11  ;;  %v2258_v38 = vcombine.high %v2233_v47, %v2249_v11 }
 0x38e   :  { %v7204_v44 = vsel %vm11629_vm13, %v7203_v6, %v5463_v15  ;;  %vm11634_vm13 = vcmask 883712  }
 0x38f   :  { %5694 = vrot.lane.b32.xlu1 %v2155_v31, %s11894_s17  ;;  %v7205_v29 = vsel %vm11630_vm14, %v7204_v44, %v5467_v20  ;;  %5698 = vrot.lane.b32.xlu0 %v2152_v52, %s11897_s16  ;;  %v7136_v25 = vsel %vm11634_vm13, %v7134_v37, %v11996_v26  ;;  %vm11635_vm14 = vcmask 900096   ;;  %v2226_v52 = vcombine.high %v11998_v19, %v11997_v28  ;;  %v12004_v44 = vld [vmem:[#allocation218_spill] sm:$0xff] }
 0x390   :  { %v7138_v14 = vsel %vm11635_vm14, %v7136_v25, %v11999_v49  ;;  %v2265_v18 = vrot.slane %v2257_v22, %v8264_v56  ;;  %v12011_v26 = vld [vmem:[#allocation158_spill] sm:$0xff]  ;;  %v2301_v49 = vrot.slane %v2293_v10, %v7837_v5 }
 0x391   :  { %v5471_v4 = vpop.permute.xlu1 %5470  ;;  %v5475_v43 = vpop.permute.xlu0 %5474  ;;  %v2240_v42 = vrot.slane %v2226_v52, %v7837_v5 }
 0x392   :  { %v7206_v32 = vsel %vm11631_vm15, %v7205_v29, %v5471_v4  ;;  %vm11636_vm15 = vcmask 916480   ;;  %v12006_v4 = vld [vmem:[#allocation167_spill] sm:$0xff] }
 0x393   :  { %5702 = vrot.lane.b32.xlu1 %v2156_v3, %s11898_s15  ;;  %v7207_v36 = vsel %vm11633_vm12, %v7206_v32, %v5475_v43  ;;  %5706 = vrot.lane.b32.xlu0 %v2197_v63, %s11902_s14  ;;  %s12000_s15 = smov 98   ;;  %v7140_v51 = vsel %vm11636_vm15, %v7138_v14, %v12001_v24  ;;  %vm11637_vm12 = vcmask 932864   ;;  %v12007_v3 = vld [vmem:[#allocation66_spill] sm:$0xff]  ;;  %v2273_v9 = vcombine.low %v2240_v42, %v2256_v61 }
 0x394   :  { %v7142_v1 = vsel %vm11637_vm12, %v7140_v51, %v12002_v21  ;;  %v2309_v63 = vcombine.low %v12007_v3, %v12006_v4  ;;  %v2310_v11 = vcombine.high %v12007_v3, %v12006_v4 }
 0x395   :  { %v5479_v50 = vpop.permute.xlu1 %5478  ;;  %v5483_v46 = vpop.permute.xlu0 %5482  ;;  %v2281_v51 = vrot.slane %v2273_v9, %v8264_v56 }
 0x396   :  { %v7208_v27 = vsel %vm11634_vm13, %v7207_v36, %v5479_v50  ;;  %vm11638_vm13 = vcmask 949248   ;;  %v2324_v47 = vrot.slane %v2310_v11, %v7837_v5 }
 0x397   :  { %5710 = vrot.lane.b32.xlu1 %v2221_v16, %s12000_s15  ;;  %v7209_v35 = vsel %vm11635_vm14, %v7208_v27, %v5483_v46  ;;  %5714 = vrot.lane.b32.xlu0 %v2204_v12, %s11907_s12  ;;  %v7144_v6 = vsel %vm11638_vm13, %v7142_v1, %v12003_v45  ;;  %vm11639_vm14 = vcmask 965632   ;;  %v2289_v16 = vcombine.high %v2265_v18, %v11824_v17 }
 0x398   :  { %v7146_v20 = vsel %vm11639_vm14, %v7144_v6, %v12004_v44  ;;  %v2272_v12 = vrot.slane %v2258_v38, %v8264_v56  ;;  %v2317_v27 = vrot.slane %v2309_v63, %v7837_v5  ;;  %v12021_v44 = vld [vmem:[#allocation117_spill] sm:$0xff] }
 0x399   :  { %v5487_v53 = vpop.permute.xlu1 %5486  ;;  %v5491_v0 = vpop.permute.xlu0 %5490 }
 0x39a   :  { %v7210_v40 = vsel %vm11636_vm15, %v7209_v35, %v5487_v53  ;;  %vm7147_vm15 = vcmask 982016   ;;  %v2274_v35 = vcombine.high %v2240_v42, %v2256_v61  ;;  %v2290_v24 = vcombine.high %v2272_v12, %v11824_v17 }
 0x39b   :  { %5718 = vrot.lane.b32.xlu1 %v2222_v59, %s11908_s11  ;;  %v7211_v57 = vsel %vm11637_vm12, %v7210_v40, %v5491_v0  ;;  %5722 = vrot.lane.b32.xlu0 %v2213_v58, %s11911_s7  ;;  %v7148_v29 = vsel %vm7147_vm15, %v7146_v20, %v12005_v54  ;;  %vm7149_vm12 = vcmask 998400   ;;  %v2294_v59 = vcombine.high %v12010_v30, %v12009_v62  ;;  %v12022_v20 = vld [vmem:[#allocation45_spill] sm:$0xff] }
 0x39c   :  { %v7150_v37 = vsel %vm7149_vm12, %v7148_v29, %v12008_v41  ;;  %v2291_v40 = vcombine.high %v2281_v51, %v11824_v17  ;;  %v2288_v0 = vrot.slane %v2274_v35, %v8264_v56  ;;  %v2326_v21 = vcombine.high %v2301_v49, %v2317_v27 }
 0x39d   :  { %v5495_v39 = vpop.permute.xlu1 %5494  ;;  %v5499_v31 = vpop.permute.xlu0 %5498  ;;  %v2308_v13 = vrot.slane %v2294_v59, %v7837_v5  ;;  %v2362_v41 = vcombine.high %v12022_v20, %v12021_v44 }
 0x39e   :  { %v7212_v15 = vsel %vm11638_vm13, %v7211_v57, %v5495_v39  ;;  %vm7151_vm13 = vcmask 1014784   ;;  %v2292_v6 = vcombine.high %v2288_v0, %v11824_v17  ;;  %v12018_v39 = vld [vmem:[#allocation168_spill] sm:$0xff]  ;;  %v2340_v52 = vrot.slane %v2326_v21, %v8264_v56 }
 0x39f   :  { %5726 = vrot.lane.b32.xlu1 %v2223_v48, %s11912_s0  ;;  %v7213_v55 = vsel %vm11639_vm14, %v7212_v15, %v5499_v31  ;;  %5730 = vrot.lane.b32.xlu0 %v2220_v34, %s11916_s13  ;;  %v7152_v25 = vsel %vm7151_vm13, %v7150_v37, %v12011_v26  ;;  %vm7153_vm14 = vcmask 1031168   ;;  %s12017_s13 = smov 124   ;;  %v2341_v22 = vcombine.low %v2308_v13, %v2324_v47  ;;  %v12019_v48 = vld [vmem:[#allocation67_spill] sm:$0xff] }
 0x3a0   :  { %v7154_v19 = vsel %vm7153_vm14, %v7152_v25, %v8947_v2  ;;  %v2325_v2 = vcombine.low %v2301_v49, %v2317_v27  ;;  %v2377_v34 = vcombine.low %v12019_v48, %v12018_v39  ;;  %v2342_v54 = vcombine.high %v2308_v13, %v2324_v47  ;;  %v12034_v49 = vld [vmem:[#allocation47_spill] sm:$0xff] }
 0x3a1   :  { %v5503_v8 = vpop.permute.xlu1 %5502  ;;  %v5507_v43 = vpop.permute.xlu0 %5506  ;;  %v2378_v3 = vcombine.high %v12019_v48, %v12018_v39  ;;  %v2376_v25 = vrot.slane %v2362_v41, %v7837_v5  ;;  %v12046_v41 = vld [vmem:[#allocation49_spill] sm:$0xff] }
 0x3a2   :  { %v7214_v32 = vsel %vm7147_vm15, %v7213_v55, %v5503_v8  ;;  %v9381_v57 = vrot.slane %v2325_v2, %v8264_v56  ;;  %v2361_v55 = vcombine.low %v12022_v20, %v12021_v44  ;;  %v2385_v29 = vrot.slane %v2377_v34, %v7837_v5 }
 0x3a3   :  { %5734 = vrot.lane.b32.xlu1 %v2224_v23, %s11917_s8  ;;  %v7215_v36 = vsel %vm7149_vm12, %v7214_v32, %v5507_v43  ;;  %5738 = vrot.lane.b32.xlu0 %v2265_v18, %s11924_s9  ;;  %s12012_s8 = smov 114   ;;  %s12013_s9 = smov 116   ;;  %v2358_v8 = vcombine.high %v2340_v52, %v11824_v17  ;;  %v2349_v23 = vrot.slane %v2341_v22, %v8264_v56 }
 0x3a4   :  { %v2357_v31 = vcombine.high %v9381_v57, %v11824_v17  ;;  %v2369_v18 = vrot.slane %v2361_v55, %v7837_v5  ;;  %v2356_v42 = vrot.slane %v2342_v54, %v8264_v56 }
 0x3a5   :  { %v5511_v50 = vpop.permute.xlu1 %5510  ;;  %v5515_v28 = vpop.permute.xlu0 %5514  ;;  %v2359_v43 = vcombine.high %v2349_v23, %v11824_v17 }
 0x3a6   :  { %v7216_v46 = vsel %vm7151_vm13, %v7215_v36, %v5511_v50  ;;  %v2393_v63 = vcombine.low %v2369_v18, %v2385_v29  ;;  %v2392_v36 = vrot.slane %v2378_v3, %v7837_v5  ;;  %v2394_v62 = vcombine.high %v2369_v18, %v2385_v29 }
 0x3a7   :  { %5742 = vrot.lane.b32.xlu1 %v2289_v16, %s12012_s8  ;;  %v7217_v60 = vsel %vm7153_vm14, %v7216_v46, %v5515_v28  ;;  %5746 = vrot.lane.b32.xlu0 %v2272_v12, %s12013_s9  ;;  %s12014_s8 = smov 118   ;;  %s12015_s9 = smov 120   ;;  %v2360_v10 = vcombine.high %v2356_v42, %v11824_v17  ;;  %v12030_v16 = vld [vmem:[#allocation169_spill] sm:$0xff]  ;;  %v12031_v12 = vld [vmem:[#allocation68_spill] sm:$0xff] }
 0x3a8   :  { %v7604_v14 = vcombine.low %v7154_v19, %v7217_v60  ;;  %v2401_v26 = vrot.slane %v2393_v63, %v8264_v56  ;;  %v2409_v50 = vcombine.low %v2376_v25, %v2392_v36  ;;  %v2445_v27 = vcombine.low %v12031_v12, %v12030_v16  ;;  %v12033_v60 = vld [vmem:[#allocation118_spill] sm:$0xff] }
 0x3a9   :  { %v9361_v7 = vpop.permute.xlu1 %5518  ;;  %v9367_v53 = vpop.permute.xlu0 %5522  ;;  %v2408_v19 = vrot.slane %v2394_v62, %v8264_v56  ;;  %v2446_v47 = vcombine.high %v12031_v12, %v12030_v16  ;;  %v2430_v39 = vcombine.high %v12034_v49, %v12033_v60 }
 0x3aa   :  { %7612 = vst [vmem:[#allocation5] sm:$0xff] %v7604_v14  ;;  %v2425_v28 = vcombine.high %v2401_v26, %v11824_v17  ;;  %v2429_v14 = vcombine.low %v12034_v49, %v12033_v60  ;;  %v2417_v59 = vrot.slane %v2409_v50, %v8264_v56 }
 0x3ab   :  { %5750 = vrot.lane.b32.xlu1 %v2290_v24, %s12014_s8  ;;  %5754 = vrot.lane.b32.xlu0 %v2281_v51, %s12015_s9  ;;  %s12016_s8 = smov 122   ;;  %s12024_s9 = smov 4   ;;  %v2410_v24 = vcombine.high %v2376_v25, %v2392_v36  ;;  %v2453_v51 = vrot.slane %v2445_v27, %v7837_v5  ;;  %v2426_v2 = vcombine.high %v2408_v19, %v11824_v17 }
 0x3ac   :  { %v2460_v34 = vrot.slane %v2446_v47, %v7837_v5  ;;  %v2444_v55 = vrot.slane %v2430_v39, %v7837_v5 }
 0x3ad   :  { %v9373_v58 = vpop.permute.xlu1 %5526  ;;  %v9378_v1 = vpop.permute.xlu0 %5530  ;;  %v2424_v22 = vrot.slane %v2410_v24, %v8264_v56 }
 0x3ae   :  { %v2477_v29 = vcombine.low %v2444_v55, %v2460_v34 }
 0x3af   :  { %5758 = vrot.lane.b32.xlu1 %v2291_v40, %s12016_s8  ;;  %5762 = vrot.lane.b32.xlu0 %v2288_v0, %s12017_s13  ;;  %s12020_s8 = smov 126   ;;  %s12023_s13 = smov 2   ;;  %v2437_v40 = vrot.slane %v2429_v14, %v7837_v5  ;;  %v2428_v44 = vcombine.high %v2424_v22, %v11824_v17 }
 0x3b0   :  { %v2485_v16 = vrot.slane %v2477_v29, %v8264_v56 }
 0x3b1   :  { %v9386_v45 = vpop.permute.xlu1 %5534  ;;  %v9391_v15 = vpop.permute.xlu0 %5538  ;;  %v2461_v21 = vcombine.low %v2437_v40, %v2453_v51 }
 0x3b2   :  { %v2495_v49 = vcombine.high %v2485_v16, %v11824_v17 }
 0x3b3   :  { %5766 = vrot.lane.b32.xlu1 %v2292_v6, %s12020_s8  ;;  %5770 = vrot.lane.b32.xlu0 %v2357_v31, %s12023_s13  ;;  %s12025_s8 = smov 6   ;;  %s12026_s13 = smov 8   ;;  %v2427_v6 = vcombine.high %v2417_v59, %v11824_v17  ;;  %v2462_v31 = vcombine.high %v2437_v40, %v2453_v51  ;;  %v2469_v20 = vrot.slane %v2461_v21, %v8264_v56 }
 0x3b5   :  { %v9400_v61 = vpop.permute.xlu1 %5542  ;;  %v9403_v38 = vpop.permute.xlu0 %5546  ;;  %v2493_v63 = vcombine.high %v2469_v20, %v11824_v17 }
 0x3b7   :  { %5774 = vrot.lane.b32.xlu1 %v2340_v52, %s12024_s9  ;;  %5778 = vrot.lane.b32.xlu0 %v2358_v8, %s12025_s8  ;;  %s12027_s9 = smov 10   ;;  %s12028_s8 = smov 12   ;;  %v12042_v8 = vld [vmem:[#allocation170_spill] sm:$0xff] }
 0x3b9   :  { %v9410_v4 = vpop.permute.xlu1 %5550  ;;  %v9414_v32 = vpop.permute.xlu0 %5554 }
 0x3bb   :  { %5782 = vrot.lane.b32.xlu1 %v2349_v23, %s12026_s13  ;;  %5786 = vrot.lane.b32.xlu0 %v2359_v43, %s12027_s9  ;;  %s12029_s13 = smov 14   ;;  %s12032_s9 = smov 16   ;;  %v12043_v23 = vld [vmem:[#allocation69_spill] sm:$0xff]  ;;  %v2476_v43 = vrot.slane %v2462_v31, %v8264_v56  ;;  %v12055_v31 = vld [vmem:[#allocation70_spill] sm:$0xff] }
 0x3bc   :  { %v2513_v18 = vcombine.low %v12043_v23, %v12042_v8 }
 0x3bd   :  { %v9422_v37 = vpop.permute.xlu1 %5558  ;;  %v9425_v30 = vpop.permute.xlu0 %5562  ;;  %v2494_v50 = vcombine.high %v2476_v43, %v11824_v17 }
 0x3bf   :  { %5790 = vrot.lane.b32.xlu1 %v2356_v42, %s12028_s8  ;;  %5794 = vrot.lane.b32.xlu0 %v2360_v10, %s12029_s13  ;;  %s12035_s8 = smov 18   ;;  %s12036_s13 = smov 20   ;;  %v12045_v42 = vld [vmem:[#allocation119_spill] sm:$0xff]  ;;  %v2478_v10 = vcombine.high %v2444_v55, %v2460_v34 }
 0x3c0   :  { %v2497_v36 = vcombine.low %v12046_v41, %v12045_v42  ;;  %v2498_v24 = vcombine.high %v12046_v41, %v12045_v42  ;;  %v12054_v34 = vld [vmem:[#allocation171_spill] sm:$0xff] }
 0x3c1   :  { %v9432_v9 = vpop.permute.xlu1 %5566  ;;  %v9436_v46 = vpop.permute.xlu0 %5570  ;;  %v2492_v14 = vrot.slane %v2478_v10, %v8264_v56 }
 0x3c2   :  { %v2505_v12 = vrot.slane %v2497_v36, %v7837_v5 }
 0x3c3   :  { %5798 = vrot.lane.b32.xlu1 %v2401_v26, %s12032_s9  ;;  %5802 = vrot.lane.b32.xlu0 %v2425_v28, %s12035_s8  ;;  %s12037_s9 = smov 22   ;;  %s12038_s8 = smov 24   ;;  %v2521_v26 = vrot.slane %v2513_v18, %v7837_v5  ;;  %v2514_v28 = vcombine.high %v12043_v23, %v12042_v8  ;;  %v2496_v47 = vcombine.high %v2492_v14, %v11824_v17  ;;  %v12057_v8 = vld [vmem:[#allocation120_spill] sm:$0xff]  ;;  %v12058_v23 = vld [vmem:[#allocation51_spill] sm:$0xff] }
 0x3c4   :  { %v2565_v18 = vcombine.low %v12058_v23, %v12057_v8 }
 0x3c5   :  { %v9444_v35 = vpop.permute.xlu1 %5574  ;;  %v9447_v11 = vpop.permute.xlu0 %5578 }
 0x3c7   :  { %5806 = vrot.lane.b32.xlu1 %v2408_v19, %s12036_s13  ;;  %5810 = vrot.lane.b32.xlu0 %v2426_v2, %s12037_s9  ;;  %s12039_s13 = smov 26   ;;  %s12040_s9 = smov 28   ;;  %v2529_v19 = vcombine.low %v2505_v12, %v2521_v26  ;;  %v2528_v2 = vrot.slane %v2514_v28, %v7837_v5 }
 0x3c9   :  { %v9454_v0 = vpop.permute.xlu1 %5582  ;;  %v9458_v13 = vpop.permute.xlu0 %5586  ;;  %v2537_v21 = vrot.slane %v2529_v19, %v8264_v56 }
 0x3cb   :  { %5814 = vrot.lane.b32.xlu1 %v2417_v59, %s12038_s8  ;;  %5818 = vrot.lane.b32.xlu0 %v2427_v6, %s12039_s13  ;;  %s12041_s8 = smov 30   ;;  %s12044_s13 = smov 32   ;;  %v2530_v59 = vcombine.high %v2505_v12, %v2521_v26  ;;  %v2512_v6 = vrot.slane %v2498_v24, %v7837_v5  ;;  %v2561_v55 = vcombine.high %v2537_v21, %v11824_v17 }
 0x3cc   :  { %v2573_v26 = vrot.slane %v2565_v18, %v7837_v5 }
 0x3cd   :  { %v9466_v48 = vpop.permute.xlu1 %5590  ;;  %v9469_v52 = vpop.permute.xlu0 %5594  ;;  %v2545_v39 = vcombine.low %v2512_v6, %v2528_v2  ;;  %v2544_v29 = vrot.slane %v2530_v59, %v8264_v56 }
 0x3cf   :  { %5822 = vrot.lane.b32.xlu1 %v2424_v22, %s12040_s9  ;;  %5826 = vrot.lane.b32.xlu0 %v2428_v44, %s12041_s8  ;;  %s12047_s9 = smov 34   ;;  %s12048_s8 = smov 36   ;;  %v2581_v44 = vcombine.low %v12055_v31, %v12054_v34  ;;  %v2562_v36 = vcombine.high %v2544_v29, %v11824_v17  ;;  %v2553_v10 = vrot.slane %v2545_v39, %v8264_v56 }
 0x3d1   :  { %v9476_v54 = vpop.permute.xlu1 %5598  ;;  %v9480_v3 = vpop.permute.xlu0 %5602  ;;  %v2589_v42 = vrot.slane %v2581_v44, %v7837_v5  ;;  %v2563_v19 = vcombine.high %v2553_v10, %v11824_v17  ;;  %v12059_v44 = vld [vmem:[#allocation172_spill] sm:$0xff] }
 0x3d3   :  { %5830 = vrot.lane.b32.xlu1 %v2469_v20, %s12044_s13  ;;  %5834 = vrot.lane.b32.xlu0 %v2493_v63, %s12047_s9  ;;  %s12049_s13 = smov 38   ;;  %s12050_s9 = smov 40   ;;  %v2597_v12 = vcombine.low %v2573_v26, %v2589_v42  ;;  %v2598_v59 = vcombine.high %v2573_v26, %v2589_v42  ;;  %v12062_v42 = vld [vmem:[#allocation53_spill] sm:$0xff] }
 0x3d5   :  { %v9488_v62 = vpop.permute.xlu1 %5606  ;;  %v9491_v25 = vpop.permute.xlu0 %5610  ;;  %v2612_v18 = vrot.slane %v2598_v59, %v8264_v56 }
 0x3d7   :  { %5838 = vrot.lane.b32.xlu1 %v2476_v43, %s12048_s8  ;;  %5842 = vrot.lane.b32.xlu0 %v2494_v50, %s12049_s13  ;;  %s12051_s8 = smov 42   ;;  %s12052_s13 = smov 44   ;;  %v2546_v43 = vcombine.high %v2512_v6, %v2528_v2  ;;  %v2605_v6 = vrot.slane %v2597_v12, %v8264_v56 }
 0x3d9   :  { %v9498_v27 = vpop.permute.xlu1 %5614  ;;  %v9502_v60 = vpop.permute.xlu0 %5618 }
 0x3db   :  { %5846 = vrot.lane.b32.xlu1 %v2485_v16, %s12050_s9  ;;  %5850 = vrot.lane.b32.xlu0 %v2495_v49, %s12051_s8  ;;  %s12053_s9 = smov 46   ;;  %s12056_s8 = smov 48   ;;  %v2582_v16 = vcombine.high %v12055_v31, %v12054_v34  ;;  %v2560_v49 = vrot.slane %v2546_v43, %v8264_v56  ;;  %v12061_v43 = vld [vmem:[#allocation121_spill] sm:$0xff] }
 0x3dd   :  { %v9510_v51 = vpop.permute.xlu1 %5622  ;;  %v9513_v40 = vpop.permute.xlu0 %5626  ;;  %v2596_v2 = vrot.slane %v2582_v16, %v7837_v5 }
 0x3df   :  { %5854 = vrot.lane.b32.xlu1 %v2492_v14, %s12052_s13  ;;  %5858 = vrot.lane.b32.xlu0 %v2496_v47, %s12053_s9  ;;  %v2566_v14 = vcombine.high %v12058_v23, %v12057_v8  ;;  %v2629_v23 = vcombine.high %v2605_v6, %v11824_v17 }
 0x3e1   :  { %v9520_v22 = vpop.permute.xlu1 %5630  ;;  %v9524_v20 = vpop.permute.xlu0 %5634  ;;  %v2580_v39 = vrot.slane %v2566_v14, %v7837_v5 }
 0x3e3   :  { %5862 = vrot.lane.b32.xlu1 %v2537_v21, %s12056_s8  ;;  %5866 = vrot.lane.b32.xlu0 %v2561_v55, %s11972_s1  ;;  %v2564_v21 = vcombine.high %v2560_v49, %v11824_v17  ;;  %v2613_v31 = vcombine.low %v2580_v39, %v2596_v2  ;;  %v12060_v55 = vld [vmem:[#allocation71_spill] sm:$0xff]  ;;  %v2614_v26 = vcombine.high %v2580_v39, %v2596_v2 }
 0x3e5   :  { %v9532_v63 = vpop.permute.xlu1 %5638  ;;  %v9535_v41 = vpop.permute.xlu0 %5642 }
 0x3e7   :  { %5870 = vrot.lane.b32.xlu1 %v2544_v29, %s11973_s10  ;;  %5874 = vrot.lane.b32.xlu0 %v2562_v36, %s11864_s4  ;;  %v2649_v29 = vcombine.low %v12060_v55, %v12059_v44  ;;  %v2633_v36 = vcombine.low %v12062_v42, %v12061_v43 }
 0x3e9   :  { %v9542_v50 = vpop.permute.xlu1 %5646  ;;  %v9546_v28 = vpop.permute.xlu0 %5650  ;;  %v2657_v16 = vrot.slane %v2649_v29, %v7837_v5  ;;  %v2641_v14 = vrot.slane %v2633_v36, %v7837_v5  ;;  %v2628_v29 = vrot.slane %v2614_v26, %v8264_v56 }
 0x3eb   :  { %5878 = vrot.lane.b32.xlu1 %v2553_v10, %s11865_s5  ;;  %5882 = vrot.lane.b32.xlu0 %v2563_v19, %s11866_s6  ;;  %v2630_v19 = vcombine.high %v2612_v18, %v11824_v17  ;;  %v2665_v2 = vcombine.low %v2641_v14, %v2657_v16  ;;  %v2666_v36 = vcombine.high %v2641_v14, %v2657_v16 }
 0x3ed   :  { %v9554_v24 = vpop.permute.xlu1 %5654  ;;  %v9557_v47 = vpop.permute.xlu0 %5658  ;;  %v2680_v14 = vrot.slane %v2666_v36, %v8264_v56 }
 0x3ef   :  { %5886 = vrot.lane.b32.xlu1 %v2560_v49, %s11867_s3  ;;  %5890 = vrot.lane.b32.xlu0 %v2564_v21, %s11868_s2  ;;  %v2621_v49 = vrot.slane %v2613_v31, %v8264_v56  ;;  %v2650_v21 = vcombine.high %v12060_v55, %v12059_v44  ;;  %v2634_v31 = vcombine.high %v12062_v42, %v12061_v43 }
 0x3f0   :  { %v2632_v55 = vcombine.high %v2628_v29, %v11824_v17 }
 0x3f1   :  { %v9564_v34 = vpop.permute.xlu1 %5662  ;;  %v9568_v8 = vpop.permute.xlu0 %5666  ;;  %v2631_v39 = vcombine.high %v2621_v49, %v11824_v17  ;;  %v2648_v26 = vrot.slane %v2634_v31, %v7837_v5 }
 0x3f3   :  { %5894 = vrot.lane.b32.xlu1 %v2605_v6, %s11869_s30  ;;  %5898 = vrot.lane.b32.xlu0 %v2629_v23, %s11870_s29 }
 0x3f5   :  { %v9576_v10 = vpop.permute.xlu1 %5670  ;;  %v9579_v12 = vpop.permute.xlu0 %5674 }
 0x3f6   :  { %12063 = vst [vmem:[#allocation58_spill] sm:$0xff] %v9579_v12 }
 0x3f7   :  { %5902 = vrot.lane.b32.xlu1 %v2612_v18, %s11872_s28  ;;  %5906 = vrot.lane.b32.xlu0 %v2630_v19, %s11873_s27  ;;  %v2664_v18 = vrot.slane %v2650_v21, %v7837_v5  ;;  %v2673_v19 = vrot.slane %v2665_v2, %v8264_v56  ;;  %v12072_v2 = vld [vmem:[#allocation122_spill] sm:$0xff] }
 0x3f9   :  { %v9586_v59 = vpop.permute.xlu1 %5678  ;;  %v9590_v6 = vpop.permute.xlu0 %5682  ;;  %v2681_v42 = vcombine.low %v2648_v26, %v2664_v18  ;;  %v2697_v16 = vcombine.high %v2673_v19, %v11824_v17 }
 0x3fa   :  { %12064 = vst [vmem:[#allocation108_spill] sm:$0xff] %v9586_v59  ;;  %12065 = vst [vmem:[#allocation27_spill] sm:$0xff] %v9590_v6 }
 0x3fb   :  { %5910 = vrot.lane.b32.xlu1 %v2621_v49, %s11876_s26  ;;  %5914 = vrot.lane.b32.xlu0 %v2631_v39, %s11877_s25  ;;  %v12069_v49 = vld [vmem:[#allocation173_spill] sm:$0xff]  ;;  %v12070_v39 = vld [vmem:[#allocation72_spill] sm:$0xff]  ;;  %v2689_v59 = vrot.slane %v2681_v42, %v8264_v56 }
 0x3fd   :  { %v9598_v23 = vpop.permute.xlu1 %5686  ;;  %v9601_v44 = vpop.permute.xlu0 %5690 }
 0x3fe   :  { %12066 = vst [vmem:[#allocation159_spill] sm:$0xff] %v9598_v23  ;;  %12067 = vst [vmem:[#allocation59_spill] sm:$0xff] %v9601_v44  ;;  %v2717_v23 = vcombine.low %v12070_v39, %v12069_v49 }
 0x3ff   :  { %5918 = vrot.lane.b32.xlu1 %v2628_v29, %s11879_s24  ;;  %5922 = vrot.lane.b32.xlu0 %v2632_v55, %s11881_s23  ;;  %v12073_v29 = vld [vmem:[#allocation55_spill] sm:$0xff]  ;;  %v2682_v55 = vcombine.high %v2648_v26, %v2664_v18 }
 0x400   :  { %v2701_v44 = vcombine.low %v12073_v29, %v12072_v2  ;;  %v2702_v42 = vcombine.high %v12073_v29, %v12072_v2 }
 0x401   :  { %v9608_v43 = vpop.permute.xlu1 %5694  ;;  %v9612_v21 = vpop.permute.xlu0 %5698 }
 0x402   :  { %12068 = vst [vmem:[#allocation109_spill] sm:$0xff] %v9608_v43  ;;  %12071 = vst [vmem:[#allocation29_spill] sm:$0xff] %v9612_v21  ;;  %v2725_v43 = vrot.slane %v2717_v23, %v7837_v5  ;;  %v2698_v21 = vcombine.high %v2680_v14, %v11824_v17  ;;  %v2709_v36 = vrot.slane %v2701_v44, %v7837_v5 }
 0x403   :  { %5926 = vrot.lane.b32.xlu1 %v2673_v19, %s11884_s22  ;;  %5930 = vrot.lane.b32.xlu0 %v2697_v16, %s11887_s21  ;;  %v2718_v16 = vcombine.high %v12070_v39, %v12069_v49  ;;  %v2699_v23 = vcombine.high %v2689_v59, %v11824_v17 }
 0x404   :  { %v2733_v18 = vcombine.low %v2709_v36, %v2725_v43 }
 0x405   :  { %v9620_v31 = vpop.permute.xlu1 %5702  ;;  %v9623_v6 = vpop.permute.xlu0 %5706 }
 0x406   :  { %12074 = vst [vmem:[#allocation160_spill] sm:$0xff] %v9620_v31  ;;  %12075 = vst [vmem:[#allocation60_spill] sm:$0xff] %v9623_v6  ;;  %v2696_v6 = vrot.slane %v2682_v55, %v8264_v56  ;;  %v12082_v55 = vld [vmem:[#allocation174_spill] sm:$0xff] }
 0x407   :  { %5934 = vrot.lane.b32.xlu1 %v2680_v14, %s11889_s20  ;;  %5938 = vrot.lane.b32.xlu0 %v2698_v21, %s11890_s19  ;;  %v2732_v21 = vrot.slane %v2718_v16, %v7837_v5  ;;  %v2734_v14 = vcombine.high %v2709_v36, %v2725_v43 }
 0x408   :  { %v2700_v39 = vcombine.high %v2696_v6, %v11824_v17 }
 0x409   :  { %v9630_v19 = vpop.permute.xlu1 %5710  ;;  %v9634_v26 = vpop.permute.xlu0 %5714  ;;  %v2748_v36 = vrot.slane %v2734_v14, %v8264_v56 }
 0x40a   :  { %12076 = vst [vmem:[#allocation110_spill] sm:$0xff] %v9630_v19  ;;  %12077 = vst [vmem:[#allocation31_spill] sm:$0xff] %v9634_v26  ;;  %v2741_v26 = vrot.slane %v2733_v18, %v8264_v56  ;;  %v12085_v18 = vld [vmem:[#allocation124_spill] sm:$0xff] }
 0x40b   :  { %5942 = vrot.lane.b32.xlu1 %v2689_v59, %s11893_s18  ;;  %5946 = vrot.lane.b32.xlu0 %v2699_v23, %s11894_s17  ;;  %v2716_v59 = vrot.slane %v2702_v42, %v7837_v5  ;;  %s12080_s18 = smov 94   ;;  %v12083_v23 = vld [vmem:[#allocation74_spill] sm:$0xff] }
 0x40c   :  { %v2765_v43 = vcombine.high %v2741_v26, %v11824_v17 }
 0x40d   :  { %v9642_v44 = vpop.permute.xlu1 %5718  ;;  %v9645_v49 = vpop.permute.xlu0 %5722  ;;  %v2749_v29 = vcombine.low %v2716_v59, %v2732_v21 }
 0x40e   :  { %12078 = vst [vmem:[#allocation161_spill] sm:$0xff] %v9642_v44  ;;  %12079 = vst [vmem:[#allocation61_spill] sm:$0xff] %v9645_v49  ;;  %v2785_v44 = vcombine.low %v12083_v23, %v12082_v55 }
 0x40f   :  { %5950 = vrot.lane.b32.xlu1 %v2696_v6, %s11897_s16  ;;  %5954 = vrot.lane.b32.xlu0 %v2700_v39, %s12080_s18  ;;  %v12086_v6 = vld [vmem:[#allocation57_spill] sm:$0xff]  ;;  %v2750_v39 = vcombine.high %v2716_v59, %v2732_v21  ;;  %v2757_v31 = vrot.slane %v2749_v29, %v8264_v56 }
 0x410   :  { %v2769_v49 = vcombine.low %v12086_v6, %v12085_v18  ;;  %v2770_v29 = vcombine.high %v12086_v6, %v12085_v18  ;;  %v12095_v18 = vld [vmem:[#allocation176_spill] sm:$0xff]  ;;  %v12096_v6 = vld [vmem:[#allocation77_spill] sm:$0xff] }
 0x411   :  { %v9652_v2 = vpop.permute.xlu1 %5726  ;;  %v9656_v16 = vpop.permute.xlu0 %5730 }
 0x412   :  { %12081 = vst [vmem:[#allocation111_spill] sm:$0xff] %v9652_v2  ;;  %12084 = vst [vmem:[#allocation33_spill] sm:$0xff] %v9656_v16  ;;  %v2793_v2 = vrot.slane %v2785_v44, %v7837_v5  ;;  %v2766_v16 = vcombine.high %v2748_v36, %v11824_v17  ;;  %v2767_v44 = vcombine.high %v2757_v31, %v11824_v17 }
 0x413   :  { %5958 = vrot.lane.b32.xlu1 %v2741_v26, %s11902_s14  ;;  %5962 = vrot.lane.b32.xlu0 %v2765_v43, %s12000_s15  ;;  %v2777_v26 = vrot.slane %v2769_v49, %v7837_v5  ;;  %v2786_v43 = vcombine.high %v12083_v23, %v12082_v55 }
 0x415   :  { %v9664_v42 = vpop.permute.xlu1 %5734  ;;  %v9667_v19 = vpop.permute.xlu0 %5738  ;;  %v2801_v21 = vcombine.low %v2777_v26, %v2793_v2 }
 0x416   :  { %12087 = vst [vmem:[#allocation162_spill] sm:$0xff] %v9664_v42  ;;  %12088 = vst [vmem:[#allocation62_spill] sm:$0xff] %v9667_v19  ;;  %v2764_v19 = vrot.slane %v2750_v39, %v8264_v56  ;;  %v2853_v39 = vcombine.low %v12096_v6, %v12095_v18 }
 0x417   :  { %5966 = vrot.lane.b32.xlu1 %v2748_v36, %s11907_s12  ;;  %5970 = vrot.lane.b32.xlu0 %v2766_v16, %s11908_s11  ;;  %v2800_v16 = vrot.slane %v2786_v43, %v7837_v5  ;;  %v2802_v36 = vcombine.high %v2777_v26, %v2793_v2  ;;  %s12093_s11 = smov 108  }
 0x418   :  { %v2768_v23 = vcombine.high %v2764_v19, %v11824_v17 }
 0x419   :  { %v9674_v14 = vpop.permute.xlu1 %5742  ;;  %v9678_v59 = vpop.permute.xlu0 %5746  ;;  %v2816_v26 = vrot.slane %v2802_v36, %v8264_v56  ;;  %v7218_v36 = vsel %vm7029_vm0, %v8973_v33, %v9361_v7 }
 0x41a   :  { %12089 = vst [vmem:[#allocation112_spill] sm:$0xff] %v9674_v14  ;;  %12090 = vst [vmem:[#allocation35_spill] sm:$0xff] %v9678_v59  ;;  %v2809_v59 = vrot.slane %v2801_v21, %v8264_v56  ;;  %v12100_v21 = vld [vmem:[#allocation8_spill] sm:$0xff] }
 0x41b   :  { %5974 = vrot.lane.b32.xlu1 %v2757_v31, %s11911_s7  ;;  %5978 = vrot.lane.b32.xlu0 %v2767_v44, %s11912_s0  ;;  %v2784_v31 = vrot.slane %v2770_v29, %v7837_v5  ;;  %s12094_s7 = smov 110   ;;  %s12102_s0 = smov 114   ;;  %v2834_v42 = vcombine.high %v2816_v26, %v11824_v17 }
 0x41c   :  { %v2833_v2 = vcombine.high %v2809_v59, %v11824_v17 }
 0x41d   :  { %v9686_v49 = vpop.permute.xlu1 %5750  ;;  %v9689_v55 = vpop.permute.xlu0 %5754 }
 0x41e   :  { %12091 = vst [vmem:[#allocation163_spill] sm:$0xff] %v9686_v49  ;;  %12092 = vst [vmem:[#allocation63_spill] sm:$0xff] %v9689_v55  ;;  %v2817_v49 = vcombine.low %v2784_v31, %v2800_v16  ;;  %v12099_v55 = vld [vmem:[#allocation127_spill] sm:$0xff] }
 0x41f   :  { %5982 = vrot.lane.b32.xlu1 %v2764_v19, %s12093_s11  ;;  %5986 = vrot.lane.b32.xlu0 %v2768_v23, %s12094_s7  ;;  %v2837_v14 = vcombine.low %v12100_v21, %v12099_v55  ;;  %s12101_s11 = smov 112   ;;  %v2861_v19 = vrot.slane %v2853_v39, %v7837_v5  ;;  %v2818_v23 = vcombine.high %v2784_v31, %v2800_v16  ;;  %s12103_s7 = smov 116  }
 0x420   :  { %v7219_v39 = vsel %vm7031_vm1, %v7218_v36, %v9367_v53  ;;  %v2854_v16 = vcombine.high %v12096_v6, %v12095_v18 }
 0x421   :  { %v9698_v44 = vpop.permute.xlu1 %5758  ;;  %v9700_v43 = vpop.permute.xlu0 %5762  ;;  %v2845_v12 = vrot.slane %v2837_v14, %v7837_v5  ;;  %v2832_v7 = vrot.slane %v2818_v23, %v8264_v56  ;;  %v7220_v53 = vsel %vm7033_vm2, %v7219_v39, %v9373_v58  ;;  %v12110_v39 = vld [vmem:[#allocation79_spill] sm:$0xff] }
 0x422   :  { %12097 = vst [vmem:[#allocation113_spill] sm:$0xff] %v9698_v44  ;;  %12098 = vst [vmem:[#allocation37_spill] sm:$0xff] %v9700_v43  ;;  %v2825_v43 = vrot.slane %v2817_v49, %v8264_v56  ;;  %v7221_v18 = vsel %vm7035_vm3, %v7220_v53, %v9378_v1  ;;  %v2868_v6 = vrot.slane %v2854_v16, %v7837_v5 }
 0x423   :  { %5990 = vrot.lane.b32.xlu1 %v2809_v59, %s12101_s11  ;;  %5994 = vrot.lane.b32.xlu0 %v2833_v2, %s12102_s0  ;;  %s12104_s0 = smov 118   ;;  %v2869_v49 = vcombine.low %v2845_v12, %v2861_v19  ;;  %v2836_v58 = vcombine.high %v2832_v7, %v11824_v17  ;;  %v7222_v36 = vsel %vm7037_vm4, %v7221_v18, %v9386_v45 }
 0x424   :  { %v2835_v33 = vcombine.high %v2825_v43, %v11824_v17 }
 0x425   :  { %v9709_v29 = vpop.permute.xlu1 %5766  ;;  %v5771_v44 = vpop.permute.xlu0 %5770  ;;  %v9739_v23 = vrot.slane %v2869_v49, %v8264_v56 }
 0x426   :  { %v7281_v59 = vsel %vm7029_vm0, %v9381_v57, %v5771_v44  ;;  %v2838_v57 = vcombine.high %v12100_v21, %v12099_v55  ;;  %v2870_v44 = vcombine.high %v2845_v12, %v2861_v19  ;;  %v7223_v12 = vsel %vm7039_vm5, %v7222_v36, %v9391_v15 }
 0x427   :  { %5998 = vrot.lane.b32.xlu1 %v2816_v26, %s12103_s7  ;;  %6002 = vrot.lane.b32.xlu0 %v2834_v42, %s12104_s0  ;;  %s12105_s7 = smov 120   ;;  %s12106_s0 = smov 122   ;;  %v7224_v15 = vsel %vm7041_vm6, %v7223_v12, %v9400_v61 }
 0x429   :  { %v5775_v31 = vpop.permute.xlu1 %5774  ;;  %v5779_v2 = vpop.permute.xlu0 %5778 }
 0x42a   :  { %v7282_v14 = vsel %vm7031_vm1, %v7281_v59, %v5775_v31  ;;  %v12109_v59 = vld [vmem:[#allocation178_spill] sm:$0xff]  ;;  %v2901_v31 = vcombine.high %v9739_v23, %v11824_v17 }
 0x42b   :  { %6006 = vrot.lane.b32.xlu1 %v2825_v43, %s12105_s7  ;;  %v7283_v42 = vsel %vm7033_vm2, %v7282_v14, %v5779_v2  ;;  %6010 = vrot.lane.b32.xlu0 %v2835_v33, %s12106_s0  ;;  %v2852_v43 = vrot.slane %v2838_v57, %v7837_v5  ;;  %s12107_s7 = smov 124   ;;  %s12108_s0 = smov 126   ;;  %v2921_v16 = vcombine.low %v12110_v39, %v12109_v59  ;;  %v12111_v33 = vld [vmem:[#allocation129_spill] sm:$0xff] }
 0x42c   :  { %v2884_v14 = vrot.slane %v2870_v44, %v8264_v56 }
 0x42d   :  { %v5783_v26 = vpop.permute.xlu1 %5782  ;;  %v5787_v21 = vpop.permute.xlu0 %5786  ;;  %v2885_v19 = vcombine.low %v2852_v43, %v2868_v6  ;;  %v2886_v18 = vcombine.high %v2852_v43, %v2868_v6  ;;  %v2929_v44 = vrot.slane %v2921_v16, %v7837_v5  ;;  %v2922_v43 = vcombine.high %v12110_v39, %v12109_v59 }
 0x42e   :  { %v7284_v55 = vsel %vm7035_vm3, %v7283_v42, %v5783_v26  ;;  %v7225_v42 = vsel %vm7043_vm7, %v7224_v15, %v9403_v38 }
 0x42f   :  { %6014 = vrot.lane.b32.xlu1 %v2832_v7, %s12107_s7  ;;  %v7285_v1 = vsel %vm7037_vm4, %v7284_v55, %v5787_v21  ;;  %6018 = vrot.lane.b32.xlu0 %v2836_v58, %s12108_s0  ;;  %v12112_v7 = vld [vmem:[#allocation9_spill] sm:$0xff]  ;;  %s12113_s0 = smov 2   ;;  %s12114_s7 = smov 4   ;;  %v2902_v55 = vcombine.high %v2884_v14, %v11824_v17  ;;  %v2893_v21 = vrot.slane %v2885_v19, %v8264_v56 }
 0x430   :  { %v2905_v57 = vcombine.low %v12112_v7, %v12111_v33  ;;  %v2936_v39 = vrot.slane %v2922_v43, %v7837_v5 }
 0x431   :  { %v5791_v49 = vpop.permute.xlu1 %5790  ;;  %v5795_v2 = vpop.permute.xlu0 %5794  ;;  %v2903_v16 = vcombine.high %v2893_v21, %v11824_v17 }
 0x432   :  { %v7286_v45 = vsel %vm7039_vm5, %v7285_v1, %v5791_v49  ;;  %v2913_v36 = vrot.slane %v2905_v57, %v7837_v5  ;;  %v7226_v1 = vsel %vm11649_vm8, %v7225_v42, %v9410_v4  ;;  %v2900_v49 = vrot.slane %v2886_v18, %v8264_v56 }
 0x433   :  { %6022 = vrot.lane.b32.xlu1 %v2901_v31, %s12113_s0  ;;  %v7287_v53 = vsel %vm7041_vm6, %v7286_v45, %v5795_v2  ;;  %6026 = vrot.lane.b32.xlu0 %v2884_v14, %s12114_s7  ;;  %s12115_s0 = smov 6   ;;  %v7227_v6 = vsel %vm11648_vm9, %v7226_v1, %v9414_v32  ;;  %s12116_s7 = smov 8   ;;  %v2906_v14 = vcombine.high %v12112_v7, %v12111_v33 }
 0x434   :  { %v2937_v12 = vcombine.low %v2913_v36, %v2929_v44  ;;  %v7228_v32 = vsel %vm11647_vm10, %v7227_v6, %v9422_v37  ;;  %v2938_v2 = vcombine.high %v2913_v36, %v2929_v44  ;;  %v2904_v15 = vcombine.high %v2900_v49, %v11824_v17  ;;  %v12128_v6 = vld [vmem:[#allocation10_spill] sm:$0xff] }
 0x435   :  { %v5799_v26 = vpop.permute.xlu1 %5798  ;;  %v5803_v61 = vpop.permute.xlu0 %5802  ;;  %v7229_v59 = vsel %vm11650_vm11, %v7228_v32, %v9425_v30 }
 0x436   :  { %v7288_v58 = vsel %vm7043_vm7, %v7287_v53, %v5799_v26  ;;  %v2945_v33 = vrot.slane %v2937_v12, %v8264_v56  ;;  %v2920_v53 = vrot.slane %v2906_v14, %v7837_v5  ;;  %v12124_v26 = vld [vmem:[#allocation180_spill] sm:$0xff]  ;;  %v2952_v36 = vrot.slane %v2938_v2, %v8264_v56 }
 0x437   :  { %6030 = vrot.lane.b32.xlu1 %v2902_v55, %s12115_s0  ;;  %v7289_v38 = vsel %vm11649_vm8, %v7288_v58, %v5803_v61  ;;  %6034 = vrot.lane.b32.xlu0 %v2893_v21, %s12116_s7  ;;  %s12117_s0 = smov 10   ;;  %s12118_s7 = smov 12   ;;  %vm12122_vm8 = vcmask 228352   ;;  %v12125_v55 = vld [vmem:[#allocation81_spill] sm:$0xff] }
 0x438   :  { %v2953_v44 = vcombine.low %v2920_v53, %v2936_v39  ;;  %v2989_v21 = vcombine.low %v12125_v55, %v12124_v26  ;;  %v2969_v61 = vcombine.high %v2945_v33, %v11824_v17  ;;  %v2990_v2 = vcombine.high %v12125_v55, %v12124_v26 }
 0x439   :  { %v5807_v19 = vpop.permute.xlu1 %5806  ;;  %v5811_v31 = vpop.permute.xlu0 %5810 }
 0x43a   :  { %v7290_v4 = vsel %vm11648_vm9, %v7289_v38, %v5807_v19  ;;  %v12127_v38 = vld [vmem:[#allocation131_spill] sm:$0xff]  ;;  %v2961_v14 = vrot.slane %v2953_v44, %v8264_v56 }
 0x43b   :  { %6038 = vrot.lane.b32.xlu1 %v2903_v16, %s12117_s0  ;;  %v7291_v45 = vsel %vm11647_vm10, %v7290_v4, %v5811_v31  ;;  %6042 = vrot.lane.b32.xlu0 %v2900_v49, %s12118_s7  ;;  %vm12119_vm10 = vcmask 211968   ;;  %s12120_s0 = smov 14   ;;  %s12123_s7 = smov 16   ;;  %v2973_v43 = vcombine.low %v12128_v6, %v12127_v38  ;;  %v2954_v16 = vcombine.high %v2920_v53, %v2936_v39 }
 0x43c   :  { %v7230_v42 = vsel %vm12119_vm10, %v7229_v59, %v9432_v9  ;;  %vm12121_vm9 = vmmov %vm12119_vm10  ;;  %vm12132_vm10 = vcmask 261120   ;;  %v2997_v49 = vrot.slane %v2989_v21, %v7837_v5  ;;  %v2970_v31 = vcombine.high %v2952_v36, %v11824_v17 }
 0x43d   :  { %v5815_v57 = vpop.permute.xlu1 %5814  ;;  %v5819_v37 = vpop.permute.xlu0 %5818  ;;  %v7231_v18 = vsel %vm12122_vm8, %v7230_v42, %v9436_v46  ;;  %v2974_v53 = vcombine.high %v12128_v6, %v12127_v38  ;;  %v12152_v38 = vld [vmem:[#allocation182_spill] sm:$0xff]  ;;  %v12153_v6 = vld [vmem:[#allocation83_spill] sm:$0xff] }
 0x43e   :  { %v7292_v7 = vsel %vm11650_vm11, %v7291_v45, %v5815_v57  ;;  %vm12126_vm11 = vmmov %vm12122_vm8  ;;  %v2981_v45 = vrot.slane %v2973_v43, %v7837_v5  ;;  %v3057_v43 = vcombine.low %v12153_v6, %v12152_v38 }
 0x43f   :  { %6046 = vrot.lane.b32.xlu1 %v2904_v15, %s12120_s0  ;;  %v7293_v30 = vsel %vm12121_vm9, %v7292_v7, %v5819_v37  ;;  %6050 = vrot.lane.b32.xlu0 %v2945_v33, %s12123_s7  ;;  %vm12129_vm9 = vcmask 244736   ;;  %s12130_s0 = smov 18   ;;  %s12133_s7 = smov 20   ;;  %v2971_v33 = vcombine.high %v2961_v14, %v11824_v17  ;;  %v2968_v7 = vrot.slane %v2954_v16, %v8264_v56 }
 0x440   :  { %v7232_v46 = vsel %vm12129_vm9, %v7231_v18, %v9444_v35  ;;  %vm12131_vm8 = vmmov %vm12129_vm9  ;;  %vm12135_vm9 = vcmask 277504   ;;  %v3005_v57 = vcombine.low %v2981_v45, %v2997_v49  ;;  %v3004_v18 = vrot.slane %v2990_v2, %v7837_v5 }
 0x441   :  { %v5823_v58 = vpop.permute.xlu1 %5822  ;;  %v5827_v1 = vpop.permute.xlu0 %5826  ;;  %v7233_v19 = vsel %vm12132_vm10, %v7232_v46, %v9447_v11  ;;  %v3006_v44 = vcombine.high %v2981_v45, %v2997_v49  ;;  %v2972_v55 = vcombine.high %v2968_v7, %v11824_v17  ;;  %v12155_v49 = vld [vmem:[#allocation133_spill] sm:$0xff]  ;;  %v3065_v45 = vrot.slane %v3057_v43, %v7837_v5 }
 0x442   :  { %v7294_v9 = vsel %vm12126_vm11, %v7293_v30, %v5823_v58  ;;  %vm12134_vm11 = vmmov %vm12132_vm10  ;;  %v7234_v59 = vsel %vm12135_vm9, %v7233_v19, %v9454_v0  ;;  %vm12138_vm10 = vcmask 293888   ;;  %v3013_v21 = vrot.slane %v3005_v57, %v8264_v56 }
 0x443   :  { %6054 = vrot.lane.b32.xlu1 %v2969_v61, %s12130_s0  ;;  %v7295_v12 = vsel %vm12131_vm8, %v7294_v9, %v5827_v1  ;;  %6058 = vrot.lane.b32.xlu0 %v2952_v36, %s12133_s7  ;;  %s12136_s0 = smov 22   ;;  %vm12137_vm8 = vmmov %vm12135_vm9  ;;  %v7235_v39 = vsel %vm12138_vm10, %v7234_v59, %v9458_v13  ;;  %s12139_s7 = smov 24   ;;  %vm12141_vm9 = vcmask 310272   ;;  %v2988_v61 = vrot.slane %v2974_v53, %v7837_v5 }
 0x444   :  { %v7236_v13 = vsel %vm12141_vm9, %v7235_v39, %v9466_v48  ;;  %v3020_v19 = vrot.slane %v3006_v44, %v8264_v56 }
 0x445   :  { %v5831_v4 = vpop.permute.xlu1 %5830  ;;  %v5835_v35 = vpop.permute.xlu0 %5834  ;;  %v3021_v1 = vcombine.low %v2988_v61, %v3004_v18 }
 0x446   :  { %v7296_v32 = vsel %vm12134_vm11, %v7295_v12, %v5831_v4  ;;  %vm12140_vm11 = vmmov %vm12138_vm10  ;;  %vm12144_vm10 = vcmask 326656   ;;  %v3037_v12 = vcombine.high %v3013_v21, %v11824_v17  ;;  %v12156_v4 = vld [vmem:[#allocation11_spill] sm:$0xff] }
 0x447   :  { %6062 = vrot.lane.b32.xlu1 %v2970_v31, %s12136_s0  ;;  %v7297_v11 = vsel %vm12137_vm8, %v7296_v32, %v5835_v35  ;;  %6066 = vrot.lane.b32.xlu0 %v2961_v14, %s12139_s7  ;;  %s12142_s0 = smov 26   ;;  %vm12143_vm8 = vmmov %vm12141_vm9  ;;  %v7237_v30 = vsel %vm12144_vm10, %v7236_v13, %v9469_v52  ;;  %s12145_s7 = smov 28   ;;  %vm12147_vm9 = vcmask 343040   ;;  %v3041_v31 = vcombine.low %v12156_v4, %v12155_v49 }
 0x448   :  { %v7238_v36 = vsel %vm12147_vm9, %v7237_v30, %v9476_v54  ;;  %v3022_v35 = vcombine.high %v2988_v61, %v3004_v18  ;;  %v3029_v39 = vrot.slane %v3021_v1, %v8264_v56  ;;  %v3042_v30 = vcombine.high %v12156_v4, %v12155_v49  ;;  %v12181_v49 = vld [vmem:[#allocation12_spill] sm:$0xff] }
 0x449   :  { %v5839_v15 = vpop.permute.xlu1 %5838  ;;  %v5843_v37 = vpop.permute.xlu0 %5842  ;;  %v3049_v57 = vrot.slane %v3041_v31, %v7837_v5 }
 0x44a   :  { %v7298_v0 = vsel %vm12140_vm11, %v7297_v11, %v5839_v15  ;;  %vm12146_vm11 = vmmov %vm12144_vm10  ;;  %vm12150_vm10 = vcmask 359424   ;;  %v3038_v11 = vcombine.high %v3020_v19, %v11824_v17  ;;  %v3039_v53 = vcombine.high %v3029_v39, %v11824_v17 }
 0x44b   :  { %6070 = vrot.lane.b32.xlu1 %v2971_v33, %s12142_s0  ;;  %v7299_v42 = vsel %vm12143_vm8, %v7298_v0, %v5843_v37  ;;  %6074 = vrot.lane.b32.xlu0 %v2968_v7, %s12145_s7  ;;  %s12148_s0 = smov 30   ;;  %vm12149_vm8 = vmmov %vm12147_vm9  ;;  %v7239_v9 = vsel %vm12150_vm10, %v7238_v36, %v9480_v3  ;;  %s12151_s7 = smov 32   ;;  %vm12157_vm9 = vcmask 375808   ;;  %v3058_v7 = vcombine.high %v12153_v6, %v12152_v38  ;;  %v12177_v38 = vld [vmem:[#allocation184_spill] sm:$0xff]  ;;  %v12178_v6 = vld [vmem:[#allocation85_spill] sm:$0xff] }
 0x44c   :  { %v7240_v3 = vsel %vm12157_vm9, %v7239_v9, %v9488_v62  ;;  %v3073_v0 = vcombine.low %v3049_v57, %v3065_v45  ;;  %v3036_v13 = vrot.slane %v3022_v35, %v8264_v56  ;;  %v3056_v36 = vrot.slane %v3042_v30, %v7837_v5 }
 0x44d   :  { %v5847_v26 = vpop.permute.xlu1 %5846  ;;  %v5851_v48 = vpop.permute.xlu0 %5850  ;;  %v3125_v43 = vcombine.low %v12178_v6, %v12177_v38 }
 0x44e   :  { %v7300_v58 = vsel %vm12146_vm11, %v7299_v42, %v5847_v26  ;;  %vm12154_vm11 = vmmov %vm12150_vm10  ;;  %vm12160_vm10 = vcmask 392192   ;;  %v3072_v26 = vrot.slane %v3058_v7, %v7837_v5 }
 0x44f   :  { %6078 = vrot.lane.b32.xlu1 %v2972_v55, %s12148_s0  ;;  %v7301_v52 = vsel %vm12149_vm8, %v7300_v58, %v5851_v48  ;;  %6082 = vrot.lane.b32.xlu0 %v3013_v21, %s12151_s7  ;;  %s12158_s0 = smov 34   ;;  %vm12159_vm8 = vmmov %vm12157_vm9  ;;  %v7241_v32 = vsel %vm12160_vm10, %v7240_v3, %v9491_v25  ;;  %s12161_s7 = smov 36   ;;  %vm12163_vm9 = vcmask 408576   ;;  %v3074_v55 = vcombine.high %v3049_v57, %v3065_v45 }
 0x450   :  { %v7242_v15 = vsel %vm12163_vm9, %v7241_v32, %v9498_v27  ;;  %v3040_v58 = vcombine.high %v3036_v13, %v11824_v17  ;;  %v3081_v48 = vrot.slane %v3073_v0, %v8264_v56  ;;  %v3089_v1 = vcombine.low %v3056_v36, %v3072_v26 }
 0x451   :  { %v5855_v46 = vpop.permute.xlu1 %5854  ;;  %v5859_v16 = vpop.permute.xlu0 %5858  ;;  %v3133_v32 = vrot.slane %v3125_v43, %v7837_v5  ;;  %v3126_v57 = vcombine.high %v12178_v6, %v12177_v38  ;;  %v12201_v38 = vld [vmem:[#allocation13_spill] sm:$0xff] }
 0x452   :  { %v7302_v54 = vsel %vm12154_vm11, %v7301_v52, %v5855_v46  ;;  %vm12162_vm11 = vmmov %vm12160_vm10  ;;  %vm12166_vm10 = vcmask 424960  }
 0x453   :  { %6086 = vrot.lane.b32.xlu1 %v3037_v12, %s12158_s0  ;;  %v7303_v14 = vsel %vm12159_vm8, %v7302_v54, %v5859_v16  ;;  %6090 = vrot.lane.b32.xlu0 %v3020_v19, %s12161_s7  ;;  %s12164_s0 = smov 38   ;;  %vm12165_vm8 = vmmov %vm12163_vm9  ;;  %v7243_v33 = vsel %vm12166_vm10, %v7242_v15, %v9502_v60  ;;  %s12167_s7 = smov 40   ;;  %vm12169_vm9 = vcmask 441344   ;;  %v3105_v12 = vcombine.high %v3081_v48, %v11824_v17  ;;  %v12180_v16 = vld [vmem:[#allocation135_spill] sm:$0xff] }
 0x454   :  { %v7244_v60 = vsel %vm12169_vm9, %v7243_v33, %v9510_v51  ;;  %v3088_v19 = vrot.slane %v3074_v55, %v8264_v56  ;;  %v3109_v4 = vcombine.low %v12181_v49, %v12180_v16 }
 0x455   :  { %v5863_v59 = vpop.permute.xlu1 %5862  ;;  %v5867_v62 = vpop.permute.xlu0 %5866 }
 0x456   :  { %v7304_v2 = vsel %vm12162_vm11, %v7303_v14, %v5863_v59  ;;  %vm12168_vm11 = vmmov %vm12166_vm10  ;;  %vm12172_vm10 = vcmask 457728   ;;  %v3090_v14 = vcombine.high %v3056_v36, %v3072_v26  ;;  %v3106_v45 = vcombine.high %v3088_v19, %v11824_v17 }
 0x457   :  { %6094 = vrot.lane.b32.xlu1 %v3038_v11, %s12164_s0  ;;  %v7305_v25 = vsel %vm12165_vm8, %v7304_v2, %v5867_v62  ;;  %6098 = vrot.lane.b32.xlu0 %v3029_v39, %s12167_s7  ;;  %s12170_s0 = smov 42   ;;  %vm12171_vm8 = vmmov %vm12169_vm9  ;;  %v7245_v44 = vsel %vm12172_vm10, %v7244_v60, %v9513_v40  ;;  %vm12174_vm9 = vcmask 474112   ;;  %v3097_v59 = vrot.slane %v3089_v1, %v8264_v56  ;;  %v12200_v1 = vld [vmem:[#allocation137_spill] sm:$0xff] }
 0x458   :  { %v7246_v52 = vsel %vm12174_vm9, %v7245_v44, %v9520_v22  ;;  %v3117_v39 = vrot.slane %v3109_v4, %v7837_v5  ;;  %v3104_v7 = vrot.slane %v3090_v14, %v8264_v56  ;;  %v3177_v6 = vcombine.low %v12201_v38, %v12200_v1 }
 0x459   :  { %v5871_v37 = vpop.permute.xlu1 %5870  ;;  %v5875_v42 = vpop.permute.xlu0 %5874  ;;  %v3107_v33 = vcombine.high %v3097_v59, %v11824_v17 }
 0x45a   :  { %v7306_v27 = vsel %vm12168_vm11, %v7305_v25, %v5871_v37  ;;  %vm12173_vm11 = vmmov %vm12172_vm10  ;;  %vm12176_vm10 = vcmask 490496   ;;  %v3141_v15 = vcombine.low %v3117_v39, %v3133_v32  ;;  %v3110_v37 = vcombine.high %v12181_v49, %v12180_v16 }
 0x45b   :  { %6102 = vrot.lane.b32.xlu1 %v3039_v53, %s12170_s0  ;;  %v7307_v18 = vsel %vm12171_vm8, %v7306_v27, %v5875_v42  ;;  %6106 = vrot.lane.b32.xlu0 %v3036_v13, %s12052_s13  ;;  %vm12175_vm8 = vmmov %vm12174_vm9  ;;  %v7247_v9 = vsel %vm12176_vm10, %v7246_v52, %v9524_v20  ;;  %vm12182_vm9 = vcmask 506880   ;;  %v3140_v27 = vrot.slane %v3126_v57, %v7837_v5  ;;  %v12213_v57 = vld [vmem:[#allocation159_spill] sm:$0xff] }
 0x45c   :  { %v7248_v20 = vsel %vm12182_vm9, %v7247_v9, %v9532_v63  ;;  %v3142_v42 = vcombine.high %v3117_v39, %v3133_v32  ;;  %v3108_v60 = vcombine.high %v3104_v7, %v11824_v17  ;;  %v3124_v26 = vrot.slane %v3110_v37, %v7837_v5  ;;  %v12210_v32 = vld [vmem:[#allocation27_spill] sm:$0xff] }
 0x45d   :  { %v5879_v21 = vpop.permute.xlu1 %5878  ;;  %v5883_v51 = vpop.permute.xlu0 %5882 }
 0x45e   :  { %v7308_v61 = vsel %vm12173_vm11, %v7307_v18, %v5879_v21  ;;  %vm12179_vm11 = vmmov %vm12176_vm10  ;;  %vm12184_vm10 = vcmask 523264   ;;  %v3149_v18 = vrot.slane %v3141_v15, %v8264_v56 }
 0x45f   :  { %6110 = vrot.lane.b32.xlu1 %v3040_v58, %s12053_s9  ;;  %v7309_v40 = vsel %vm12175_vm8, %v7308_v61, %v5883_v51  ;;  %6114 = vrot.lane.b32.xlu0 %v3081_v48, %s12056_s8  ;;  %vm12183_vm8 = vmmov %vm12182_vm9  ;;  %v7249_v3 = vsel %vm12184_vm10, %v7248_v20, %v9535_v41  ;;  %vm12186_vm9 = vcmask 539648   ;;  %v3157_v58 = vcombine.low %v3124_v26, %v3140_v27  ;;  %v12197_v48 = vld [vmem:[#allocation186_spill] sm:$0xff]  ;;  %v12198_v61 = vld [vmem:[#allocation87_spill] sm:$0xff] }
 0x460   :  { %v7250_v2 = vsel %vm12186_vm9, %v7249_v3, %v9542_v50  ;;  %v3193_v51 = vcombine.low %v12198_v61, %v12197_v48  ;;  %v3173_v52 = vcombine.high %v3149_v18, %v11824_v17  ;;  %v3185_v20 = vrot.slane %v3177_v6, %v7837_v5  ;;  %v12232_v6 = vld [vmem:[#allocation60_spill] sm:$0xff] }
 0x461   :  { %v5887_v46 = vpop.permute.xlu1 %5886  ;;  %v5891_v54 = vpop.permute.xlu0 %5890  ;;  %v3165_v49 = vrot.slane %v3157_v58, %v8264_v56 }
 0x462   :  { %v7310_v22 = vsel %vm12179_vm11, %v7309_v40, %v5887_v46  ;;  %vm12185_vm11 = vmmov %vm12184_vm10  ;;  %vm12188_vm10 = vcmask 556032   ;;  %v3156_v40 = vrot.slane %v3142_v42, %v8264_v56  ;;  %v12204_v46 = vld [vmem:[#allocation58_spill] sm:$0xff] }
 0x463   :  { %6118 = vrot.lane.b32.xlu1 %v3105_v12, %s11972_s1  ;;  %v7311_v31 = vsel %vm12183_vm8, %v7310_v22, %v5891_v54  ;;  %6122 = vrot.lane.b32.xlu0 %v3088_v19, %s11973_s10  ;;  %vm12187_vm8 = vmmov %vm12186_vm9  ;;  %v7251_v62 = vsel %vm12188_vm10, %v7250_v2, %v9546_v28  ;;  %vm12190_vm9 = vcmask 572416   ;;  %v3158_v19 = vcombine.high %v3124_v26, %v3140_v27 }
 0x464   :  { %v7252_v28 = vsel %vm12190_vm9, %v7251_v62, %v9554_v24  ;;  %v3201_v22 = vrot.slane %v3193_v51, %v7837_v5  ;;  %v3174_v16 = vcombine.high %v3156_v40, %v11824_v17  ;;  %v3178_v62 = vcombine.high %v12201_v38, %v12200_v1 }
 0x465   :  { %v5895_v35 = vpop.permute.xlu1 %5894  ;;  %v5899_v63 = vpop.permute.xlu0 %5898  ;;  %v3172_v39 = vrot.slane %v3158_v19, %v8264_v56 }
 0x466   :  { %v7312_v11 = vsel %vm12185_vm11, %v7311_v31, %v5895_v35  ;;  %vm12189_vm11 = vmmov %vm12188_vm10  ;;  %vm12192_vm10 = vcmask 588800   ;;  %v12207_v31 = vld [vmem:[#allocation108_spill] sm:$0xff]  ;;  %v3192_v42 = vrot.slane %v3178_v62, %v7837_v5 }
 0x467   :  { %6126 = vrot.lane.b32.xlu1 %v3106_v45, %s11864_s4  ;;  %v7313_v41 = vsel %vm12187_vm8, %v7312_v11, %v5899_v63  ;;  %6130 = vrot.lane.b32.xlu0 %v3097_v59, %s11865_s5  ;;  %vm12191_vm8 = vmmov %vm12190_vm9  ;;  %v7253_v13 = vsel %vm12192_vm10, %v7252_v28, %v9557_v47  ;;  %vm12194_vm9 = vcmask 605184   ;;  %v3194_v45 = vcombine.high %v12198_v61, %v12197_v48 }
 0x468   :  { %v7254_v55 = vsel %vm12194_vm9, %v7253_v13, %v9564_v34  ;;  %v3209_v59 = vcombine.low %v3185_v20, %v3201_v22  ;;  %v3175_v63 = vcombine.high %v3165_v49, %v11824_v17  ;;  %v3176_v28 = vcombine.high %v3172_v39, %v11824_v17 }
 0x469   :  { %v5903_v25 = vpop.permute.xlu1 %5902  ;;  %v5907_v0 = vpop.permute.xlu0 %5906 }
 0x46a   :  { %v7314_v50 = vsel %vm12189_vm11, %v7313_v41, %v5903_v25  ;;  %vm12193_vm11 = vmmov %vm12192_vm10  ;;  %vm12196_vm10 = vcmask 621568  }
 0x46b   :  { %6134 = vrot.lane.b32.xlu1 %v3107_v33, %s11866_s6  ;;  %v7315_v53 = vsel %vm12191_vm8, %v7314_v50, %v5907_v0  ;;  %6138 = vrot.lane.b32.xlu0 %v3104_v7, %s11867_s3  ;;  %vm12195_vm8 = vmmov %vm12194_vm9  ;;  %v7255_v21 = vsel %vm12196_vm10, %v7254_v55, %v9568_v8  ;;  %vm12202_vm9 = vcmask 637952   ;;  %v12216_v33 = vld [vmem:[#allocation59_spill] sm:$0xff]  ;;  %v3208_v50 = vrot.slane %v3194_v45, %v7837_v5  ;;  %v12224_v55 = vld [vmem:[#allocation188_spill] sm:$0xff] }
 0x46c   :  { %v7256_v8 = vsel %vm12202_vm9, %v7255_v21, %v9576_v10  ;;  %v3210_v0 = vcombine.high %v3185_v20, %v3201_v22 }
 0x46d   :  { %v5911_v30 = vpop.permute.xlu1 %5910  ;;  %v5915_v24 = vpop.permute.xlu0 %5914  ;;  %v3225_v26 = vcombine.low %v3192_v42, %v3208_v50 }
 0x46e   :  { %v7316_v44 = vsel %vm12193_vm11, %v7315_v53, %v5911_v30  ;;  %vm12199_vm11 = vmmov %vm12196_vm10  ;;  %vm12205_vm10 = vcmask 654336   ;;  %v3217_v53 = vrot.slane %v3209_v59, %v8264_v56  ;;  %v12219_v30 = vld [vmem:[#allocation109_spill] sm:$0xff]  ;;  %v3224_v61 = vrot.slane %v3210_v0, %v8264_v56 }
 0x46f   :  { %6142 = vrot.lane.b32.xlu1 %v3108_v60, %s11868_s2  ;;  %v7317_v47 = vsel %vm12195_vm8, %v7316_v44, %v5915_v24  ;;  %6146 = vrot.lane.b32.xlu0 %v3149_v18, %s11869_s30  ;;  %vm12203_vm8 = vmmov %vm12202_vm9  ;;  %v7257_v12 = vsel %vm12205_vm10, %v7256_v8, %v12204_v46  ;;  %vm12208_vm9 = vcmask 670720   ;;  %v12222_v44 = vld [vmem:[#allocation29_spill] sm:$0xff]  ;;  %v3233_v22 = vrot.slane %v3225_v26, %v8264_v56 }
 0x470   :  { %v7258_v3 = vsel %vm12208_vm9, %v7257_v12, %v12207_v31  ;;  %v3241_v48 = vcombine.high %v3217_v53, %v11824_v17  ;;  %v3242_v19 = vcombine.high %v3224_v61, %v11824_v17  ;;  %v12238_v31 = vld [vmem:[#allocation31_spill] sm:$0xff] }
 0x471   :  { %v5919_v36 = vpop.permute.xlu1 %5918  ;;  %v5923_v9 = vpop.permute.xlu0 %5922  ;;  %v3243_v45 = vcombine.high %v3233_v22, %v11824_v17 }
 0x472   :  { %v7318_v34 = vsel %vm12199_vm11, %v7317_v47, %v5919_v36  ;;  %vm12206_vm11 = vmmov %vm12205_vm10  ;;  %vm12211_vm10 = vcmask 687104   ;;  %v12225_v47 = vld [vmem:[#allocation89_spill] sm:$0xff] }
 0x473   :  { %6150 = vrot.lane.b32.xlu1 %v3173_v52, %s11870_s29  ;;  %v7319_v43 = vsel %vm12203_vm8, %v7318_v34, %v5923_v9  ;;  %6154 = vrot.lane.b32.xlu0 %v3156_v40, %s11872_s28  ;;  %vm12209_vm8 = vmmov %vm12208_vm9  ;;  %v7259_v35 = vsel %vm12211_vm10, %v7258_v3, %v12210_v32  ;;  %vm12214_vm9 = vcmask 703488   ;;  %v3261_v21 = vcombine.low %v12225_v47, %v12224_v55  ;;  %v12227_v52 = vld [vmem:[#allocation139_spill] sm:$0xff]  ;;  %v12228_v40 = vld [vmem:[#allocation14_spill] sm:$0xff] }
 0x474   :  { %v7260_v15 = vsel %vm12214_vm9, %v7259_v35, %v12213_v57  ;;  %v3245_v34 = vcombine.low %v12228_v40, %v12227_v52  ;;  %v12229_v9 = vld [vmem:[#allocation160_spill] sm:$0xff]  ;;  %v12245_v57 = vld [vmem:[#allocation61_spill] sm:$0xff] }
 0x475   :  { %v5927_v54 = vpop.permute.xlu1 %5926  ;;  %v5931_v10 = vpop.permute.xlu0 %5930  ;;  %v3269_v46 = vrot.slane %v3261_v21, %v7837_v5 }
 0x476   :  { %v7320_v4 = vsel %vm12206_vm11, %v7319_v43, %v5927_v54  ;;  %vm12212_vm11 = vmmov %vm12211_vm10  ;;  %vm12217_vm10 = vcmask 719872   ;;  %v3226_v43 = vcombine.high %v3192_v42, %v3208_v50 }
 0x477   :  { %6158 = vrot.lane.b32.xlu1 %v3174_v16, %s11873_s27  ;;  %v7321_v14 = vsel %vm12209_vm8, %v7320_v4, %v5931_v10  ;;  %6162 = vrot.lane.b32.xlu0 %v3165_v49, %s11876_s26  ;;  %vm12215_vm8 = vmmov %vm12214_vm9  ;;  %v7261_v7 = vsel %vm12217_vm10, %v7260_v15, %v12216_v33  ;;  %vm12220_vm9 = vcmask 736256   ;;  %v3253_v49 = vrot.slane %v3245_v34, %v7837_v5  ;;  %v12235_v4 = vld [vmem:[#allocation110_spill] sm:$0xff] }
 0x478   :  { %v7262_v60 = vsel %vm12220_vm9, %v7261_v7, %v12219_v30  ;;  %v3240_v59 = vrot.slane %v3226_v43, %v8264_v56  ;;  %v12251_v30 = vld [vmem:[#allocation33_spill] sm:$0xff] }
 0x479   :  { %v5935_v11 = vpop.permute.xlu1 %5934  ;;  %v5939_v41 = vpop.permute.xlu0 %5938  ;;  %v3277_v32 = vcombine.low %v3253_v49, %v3269_v46  ;;  %v3278_v33 = vcombine.high %v3253_v49, %v3269_v46 }
 0x47a   :  { %v7322_v2 = vsel %vm12212_vm11, %v7321_v14, %v5935_v11  ;;  %vm12218_vm11 = vmmov %vm12217_vm10  ;;  %vm12223_vm10 = vcmask 752640   ;;  %v3262_v14 = vcombine.high %v12225_v47, %v12224_v55  ;;  %v3244_v50 = vcombine.high %v3240_v59, %v11824_v17 }
 0x47b   :  { %6166 = vrot.lane.b32.xlu1 %v3175_v63, %s11877_s25  ;;  %v7323_v25 = vsel %vm12215_vm8, %v7322_v2, %v5939_v41  ;;  %6170 = vrot.lane.b32.xlu0 %v3172_v39, %s11879_s24  ;;  %vm12221_vm8 = vmmov %vm12220_vm9  ;;  %v7263_v24 = vsel %vm12223_vm10, %v7262_v60, %v12222_v44  ;;  %vm12230_vm9 = vcmask 769024   ;;  %v3246_v39 = vcombine.high %v12228_v40, %v12227_v52  ;;  %v12242_v2 = vld [vmem:[#allocation161_spill] sm:$0xff]  ;;  %v12253_v44 = vld [vmem:[#allocation191_spill] sm:$0xff] }
 0x47c   :  { %v7264_v1 = vsel %vm12230_vm9, %v7263_v24, %v12229_v9  ;;  %v3285_v0 = vrot.slane %v3277_v32, %v8264_v56  ;;  %v12254_v24 = vld [vmem:[#allocation91_spill] sm:$0xff]  ;;  %v3292_v21 = vrot.slane %v3278_v33, %v8264_v56  ;;  %v12258_v52 = vld [vmem:[#allocation162_spill] sm:$0xff] }
 0x47d   :  { %v5943_v37 = vpop.permute.xlu1 %5942  ;;  %v5947_v27 = vpop.permute.xlu0 %5946  ;;  %v3329_v26 = vcombine.low %v12254_v24, %v12253_v44  ;;  %v12261_v9 = vld [vmem:[#allocation62_spill] sm:$0xff] }
 0x47e   :  { %v7324_v13 = vsel %vm12218_vm11, %v7323_v25, %v5943_v37  ;;  %vm12226_vm11 = vmmov %vm12223_vm10  ;;  %vm12233_vm10 = vcmask 785408   ;;  %v3276_v25 = vrot.slane %v3262_v14, %v7837_v5  ;;  %v3309_v47 = vcombine.high %v3285_v0, %v11824_v17 }
 0x47f   :  { %6174 = vrot.lane.b32.xlu1 %v3176_v28, %s11881_s23  ;;  %v7325_v18 = vsel %vm12221_vm8, %v7324_v13, %v5947_v27  ;;  %6178 = vrot.lane.b32.xlu0 %v3217_v53, %s11884_s22  ;;  %vm12231_vm8 = vmmov %vm12230_vm9  ;;  %v7265_v8 = vsel %vm12233_vm10, %v7264_v1, %v12232_v6  ;;  %vm12236_vm9 = vcmask 801792   ;;  %v3260_v53 = vrot.slane %v3246_v39, %v7837_v5  ;;  %v12248_v13 = vld [vmem:[#allocation111_spill] sm:$0xff] }
 0x480   :  { %v7266_v10 = vsel %vm12236_vm9, %v7265_v8, %v12235_v4  ;;  %v3337_v6 = vrot.slane %v3329_v26, %v7837_v5  ;;  %v3310_v43 = vcombine.high %v3292_v21, %v11824_v17  ;;  %v12268_v4 = vld [vmem:[#allocation35_spill] sm:$0xff] }
 0x481   :  { %v5951_v58 = vpop.permute.xlu1 %5950  ;;  %v5955_v36 = vpop.permute.xlu0 %5954 }
 0x482   :  { %v7326_v51 = vsel %vm12226_vm11, %v7325_v18, %v5951_v58  ;;  %vm12234_vm11 = vmmov %vm12233_vm10  ;;  %vm12239_vm10 = vcmask 818176   ;;  %v3293_v18 = vcombine.low %v3260_v53, %v3276_v25 }
 0x483   :  { %6182 = vrot.lane.b32.xlu1 %v3241_v48, %s11887_s21  ;;  %v7327_v38 = vsel %vm12231_vm8, %v7326_v51, %v5955_v36  ;;  %6186 = vrot.lane.b32.xlu0 %v3224_v61, %s11889_s20  ;;  %vm12237_vm8 = vmmov %vm12236_vm9  ;;  %v7267_v3 = vsel %vm12239_vm10, %v7266_v10, %v12238_v31  ;;  %s12240_s20 = smov 88   ;;  %vm12243_vm9 = vcmask 834560   ;;  %v12256_v61 = vld [vmem:[#allocation141_spill] sm:$0xff]  ;;  %v12257_v51 = vld [vmem:[#allocation15_spill] sm:$0xff] }
 0x484   :  { %v7268_v41 = vsel %vm12243_vm9, %v7267_v3, %v12242_v2  ;;  %v3313_v36 = vcombine.low %v12257_v51, %v12256_v61  ;;  %v3301_v46 = vrot.slane %v3293_v18, %v8264_v56  ;;  %v12276_v2 = vld [vmem:[#allocation63_spill] sm:$0xff] }
 0x485   :  { %v5959_v12 = vpop.permute.xlu1 %5958  ;;  %v5963_v16 = vpop.permute.xlu0 %5962 }
 0x486   :  { %v7328_v54 = vsel %vm12234_vm11, %v7327_v38, %v5959_v12  ;;  %vm12241_vm11 = vmmov %vm12239_vm10  ;;  %vm12246_vm10 = vcmask 850944   ;;  %v3294_v38 = vcombine.high %v3260_v53, %v3276_v25  ;;  %v3311_v14 = vcombine.high %v3301_v46, %v11824_v17 }
 0x487   :  { %6190 = vrot.lane.b32.xlu1 %v3242_v19, %s11890_s19  ;;  %v7329_v20 = vsel %vm12237_vm8, %v7328_v54, %v5963_v16  ;;  %6194 = vrot.lane.b32.xlu0 %v3233_v22, %s12240_s20  ;;  %vm12244_vm8 = vmmov %vm12243_vm9  ;;  %v7269_v15 = vsel %vm12246_vm10, %v7268_v41, %v12245_v57  ;;  %vm12249_vm9 = vcmask 867328   ;;  %v3321_v22 = vrot.slane %v3313_v36, %v7837_v5  ;;  %v12264_v54 = vld [vmem:[#allocation112_spill] sm:$0xff] }
 0x488   :  { %v7270_v27 = vsel %vm12249_vm9, %v7269_v15, %v12248_v13  ;;  %v3308_v32 = vrot.slane %v3294_v38, %v8264_v56  ;;  %v12280_v13 = vld [vmem:[#allocation113_spill] sm:$0xff] }
 0x489   :  { %v5967_v35 = vpop.permute.xlu1 %5966  ;;  %v5971_v63 = vpop.permute.xlu0 %5970  ;;  %v3345_v31 = vcombine.low %v3321_v22, %v3337_v6  ;;  %v3346_v57 = vcombine.high %v3321_v22, %v3337_v6 }
 0x48a   :  { %v7330_v11 = vsel %vm12241_vm11, %v7329_v20, %v5967_v35  ;;  %vm12247_vm11 = vmmov %vm12246_vm10  ;;  %vm12252_vm10 = vcmask 883712   ;;  %v3330_v20 = vcombine.high %v12254_v24, %v12253_v44  ;;  %v3312_v25 = vcombine.high %v3308_v32, %v11824_v17  ;;  %v12284_v44 = vld [vmem:[#allocation37_spill] sm:$0xff] }
 0x48b   :  { %6198 = vrot.lane.b32.xlu1 %v3243_v45, %s11894_s17  ;;  %v7331_v62 = vsel %vm12244_vm8, %v7330_v11, %v5971_v63  ;;  %6202 = vrot.lane.b32.xlu0 %v3240_v59, %s11897_s16  ;;  %vm12250_vm8 = vmmov %vm12249_vm9  ;;  %v7271_v60 = vsel %vm12252_vm10, %v7270_v27, %v12251_v30  ;;  %vm12259_vm9 = vcmask 900096   ;;  %v3314_v59 = vcombine.high %v12257_v51, %v12256_v61  ;;  %v12272_v11 = vld [vmem:[#allocation163_spill] sm:$0xff] }
 0x48c   :  { %v7272_v40 = vsel %vm12259_vm9, %v7271_v60, %v12258_v52  ;;  %v3353_v33 = vrot.slane %v3345_v31, %v8264_v56  ;;  %v12282_v30 = vld [vmem:[#allocation143_spill] sm:$0xff]  ;;  %v12283_v60 = vld [vmem:[#allocation16_spill] sm:$0xff] }
 0x48d   :  { %v5975_v7 = vpop.permute.xlu1 %5974  ;;  %v5979_v28 = vpop.permute.xlu0 %5978  ;;  %v3328_v53 = vrot.slane %v3314_v59, %v7837_v5  ;;  %v3381_v18 = vcombine.low %v12283_v60, %v12282_v30 }
 0x48e   :  { %v7332_v37 = vsel %vm12247_vm11, %v7331_v62, %v5975_v7  ;;  %vm12255_vm11 = vmmov %vm12252_vm10  ;;  %vm12262_vm10 = vcmask 916480   ;;  %v3344_v62 = vrot.slane %v3330_v20, %v7837_v5  ;;  %v12278_v7 = vld [vmem:[#allocation193_spill] sm:$0xff] }
 0x48f   :  { %6206 = vrot.lane.b32.xlu1 %v3244_v50, %s12080_s18  ;;  %v7333_v42 = vsel %vm12250_vm8, %v7332_v37, %v5979_v28  ;;  %6210 = vrot.lane.b32.xlu0 %v3285_v0, %s11902_s14  ;;  %vm12260_vm8 = vmmov %vm12259_vm9  ;;  %v7273_v1 = vsel %vm12262_vm10, %v7272_v40, %v12261_v9  ;;  %vm12265_vm9 = vcmask 932864   ;;  %v12279_v50 = vld [vmem:[#allocation93_spill] sm:$0xff]  ;;  %v3389_v52 = vrot.slane %v3381_v18, %v7837_v5 }
 0x490   :  { %v7274_v16 = vsel %vm12265_vm9, %v7273_v1, %v12264_v54  ;;  %v3397_v0 = vcombine.low %v12279_v50, %v12278_v7  ;;  %v3361_v26 = vcombine.low %v3328_v53, %v3344_v62  ;;  %v3398_v6 = vcombine.high %v12279_v50, %v12278_v7 }
 0x491   :  { %v5983_v55 = vpop.permute.xlu1 %5982  ;;  %v5987_v48 = vpop.permute.xlu0 %5986 }
 0x492   :  { %v7334_v58 = vsel %vm12255_vm11, %v7333_v42, %v5983_v55  ;;  %vm12263_vm11 = vmmov %vm12262_vm10  ;;  %vm12269_vm10 = vcmask 949248   ;;  %v3369_v38 = vrot.slane %v3361_v26, %v8264_v56  ;;  %v3412_v22 = vrot.slane %v3398_v6, %v7837_v5 }
 0x493   :  { %6214 = vrot.lane.b32.xlu1 %v3309_v47, %s12000_s15  ;;  %v7335_v34 = vsel %vm12260_vm8, %v7334_v58, %v5987_v48  ;;  %6218 = vrot.lane.b32.xlu0 %v3292_v21, %s11907_s12  ;;  %s12266_s15 = smov 102   ;;  %vm12267_vm8 = vmmov %vm12265_vm9  ;;  %v7275_v10 = vsel %vm12269_vm10, %v7274_v16, %v12268_v4  ;;  %s12270_s12 = smov 104   ;;  %vm12273_vm9 = vcmask 965632   ;;  %v3377_v47 = vcombine.high %v3353_v33, %v11824_v17 }
 0x494   :  { %v7276_v63 = vsel %vm12273_vm9, %v7275_v10, %v12272_v11  ;;  %v3360_v21 = vrot.slane %v3346_v57, %v8264_v56  ;;  %v3405_v58 = vrot.slane %v3397_v0, %v7837_v5  ;;  %v12294_v11 = vld [vmem:[#allocation145_spill] sm:$0xff] }
 0x495   :  { %v5991_v8 = vpop.permute.xlu1 %5990  ;;  %v5995_v19 = vpop.permute.xlu0 %5994  ;;  %v7277_v41 = vsel %vm7147_vm15, %v7276_v63, %v12276_v2  ;;  %v12295_v63 = vld [vmem:[#allocation17_spill] sm:$0xff] }
 0x496   :  { %v7336_v12 = vsel %vm12263_vm11, %v7335_v34, %v5991_v8  ;;  %vm12271_vm11 = vmmov %vm12269_vm10  ;;  %v7278_v27 = vsel %vm7149_vm12, %v7277_v41, %v12280_v13  ;;  %v3362_v34 = vcombine.high %v3328_v53, %v3344_v62  ;;  %v3378_v1 = vcombine.high %v3360_v21, %v11824_v17 }
 0x497   :  { %6222 = vrot.lane.b32.xlu1 %v3310_v43, %s12266_s15  ;;  %v7337_v49 = vsel %vm12267_vm8, %v7336_v12, %v5995_v19  ;;  %6226 = vrot.lane.b32.xlu0 %v3301_v46, %s12270_s12  ;;  %s12274_s15 = smov 106   ;;  %vm12275_vm8 = vmmov %vm12273_vm9  ;;  %s12277_s12 = smov 108   ;;  %v7279_v24 = vsel %vm7151_vm13, %v7278_v27, %v12284_v44  ;;  %v3382_v43 = vcombine.high %v12283_v60, %v12282_v30  ;;  %vm12388_vm10 = vcmask 146432  }
 0x498   :  { %v7280_v51 = vsel %vm7153_vm14, %v7279_v24, %v9709_v29  ;;  %v3413_v29 = vcombine.low %v3389_v52, %v3405_v58  ;;  %v3379_v12 = vcombine.high %v3369_v38, %v11824_v17  ;;  %v3376_v19 = vrot.slane %v3362_v34, %v8264_v56 }
 0x499   :  { %v5999_v3 = vpop.permute.xlu1 %5998  ;;  %v6003_v45 = vpop.permute.xlu0 %6002  ;;  %v3414_v54 = vcombine.high %v3389_v52, %v3405_v58  ;;  %v3396_v4 = vrot.slane %v3382_v43, %v7837_v5  ;;  %v3450_v13 = vcombine.high %v12295_v63, %v12294_v11  ;;  %v12307_v52 = vld [vmem:[#allocation18_spill] sm:$0xff]  ;;  %vm12391_vm9 = vcmask 162816  }
 0x49a   :  { %v7338_v35 = vsel %vm12271_vm11, %v7337_v49, %v5999_v3  ;;  %v10150_v49 = vrot.slane %v3413_v29, %v8264_v56  ;;  %v3380_v20 = vcombine.high %v3376_v19, %v11824_v17  ;;  %v12291_v3 = vld [vmem:[#allocation196_spill] sm:$0xff]  ;;  %vm12390_vm11 = vmmov %vm12388_vm10 }
 0x49b   :  { %6230 = vrot.lane.b32.xlu1 %v3311_v14, %s12274_s15  ;;  %v7339_v39 = vsel %vm12275_vm8, %v7338_v35, %v6003_v45  ;;  %6234 = vrot.lane.b32.xlu0 %v3308_v32, %s12277_s12  ;;  %s12281_s12 = smov 110   ;;  %s12290_s15 = smov 124   ;;  %v3429_v31 = vcombine.low %v3396_v4, %v3412_v22  ;;  %v12292_v14 = vld [vmem:[#allocation95_spill] sm:$0xff]  ;;  %v3428_v59 = vrot.slane %v3414_v54, %v8264_v56  ;;  %vm12393_vm8 = vmmov %vm12391_vm9 }
 0x49c   :  { %v3465_v32 = vcombine.low %v12292_v14, %v12291_v3  ;;  %v3445_v45 = vcombine.high %v10150_v49, %v11824_v17  ;;  %v3430_v41 = vcombine.high %v3396_v4, %v3412_v22  ;;  %v3466_v50 = vcombine.high %v12292_v14, %v12291_v3 }
 0x49d   :  { %v6007_v15 = vpop.permute.xlu1 %6006  ;;  %v6011_v28 = vpop.permute.xlu0 %6010  ;;  %v3464_v24 = vrot.slane %v3450_v13, %v7837_v5  ;;  %v12319_v13 = vld [vmem:[#allocation19_spill] sm:$0xff] }
 0x49e   :  { %v7340_v37 = vsel %vm7147_vm15, %v7339_v39, %v6007_v15  ;;  %v3449_v39 = vcombine.low %v12295_v63, %v12294_v11  ;;  %v3473_v62 = vrot.slane %v3465_v32, %v7837_v5  ;;  %v3446_v15 = vcombine.high %v3428_v59, %v11824_v17 }
 0x49f   :  { %6238 = vrot.lane.b32.xlu1 %v3312_v25, %s12281_s12  ;;  %v7341_v42 = vsel %vm7149_vm12, %v7340_v37, %v6011_v28  ;;  %6242 = vrot.lane.b32.xlu0 %v3353_v33, %s12101_s11  ;;  %s12285_s12 = smov 114   ;;  %s12286_s11 = smov 116   ;;  %v3437_v25 = vrot.slane %v3429_v31, %v8264_v56  ;;  %v3444_v53 = vrot.slane %v3430_v41, %v8264_v56 }
 0x4a0   :  { %v3457_v33 = vrot.slane %v3449_v39, %v7837_v5 }
 0x4a1   :  { %v6015_v55 = vpop.permute.xlu1 %6014  ;;  %v6019_v61 = vpop.permute.xlu0 %6018  ;;  %v3447_v28 = vcombine.high %v3437_v25, %v11824_v17  ;;  %v3448_v18 = vcombine.high %v3444_v53, %v11824_v17 }
 0x4a2   :  { %v7342_v48 = vsel %vm7151_vm13, %v7341_v42, %v6015_v55  ;;  %v3481_v0 = vcombine.low %v3457_v33, %v3473_v62  ;;  %v3480_v42 = vrot.slane %v3466_v50, %v7837_v5  ;;  %v3482_v30 = vcombine.high %v3457_v33, %v3473_v62 }
 0x4a3   :  { %6246 = vrot.lane.b32.xlu1 %v3377_v47, %s12285_s12  ;;  %v7343_v36 = vsel %vm7153_vm14, %v7342_v48, %v6019_v61  ;;  %6250 = vrot.lane.b32.xlu0 %v3360_v21, %s12286_s11  ;;  %s12287_s12 = smov 118   ;;  %s12288_s11 = smov 120   ;;  %v12303_v47 = vld [vmem:[#allocation198_spill] sm:$0xff]  ;;  %v12304_v21 = vld [vmem:[#allocation97_spill] sm:$0xff] }
 0x4a4   :  { %v7605_v40 = vcombine.low %v7280_v51, %v7343_v36  ;;  %v3489_v44 = vrot.slane %v3481_v0, %v8264_v56  ;;  %v3497_v55 = vcombine.low %v3464_v24, %v3480_v42  ;;  %v3533_v58 = vcombine.low %v12304_v21, %v12303_v47  ;;  %v12306_v36 = vld [vmem:[#allocation147_spill] sm:$0xff] }
 0x4a5   :  { %v10130_v9 = vpop.permute.xlu1 %6022  ;;  %v10136_v8 = vpop.permute.xlu0 %6026  ;;  %v3496_v51 = vrot.slane %v3482_v30, %v8264_v56  ;;  %v3534_v22 = vcombine.high %v12304_v21, %v12303_v47  ;;  %v3518_v3 = vcombine.high %v12307_v52, %v12306_v36 }
 0x4a6   :  { %7613 = vst [vmem:[#allocation5 + $0x8] sm:$0xff] %v7605_v40  ;;  %v3513_v61 = vcombine.high %v3489_v44, %v11824_v17  ;;  %v3517_v40 = vcombine.low %v12307_v52, %v12306_v36  ;;  %v3505_v43 = vrot.slane %v3497_v55, %v8264_v56 }
 0x4a7   :  { %6254 = vrot.lane.b32.xlu1 %v3378_v1, %s12287_s12  ;;  %6258 = vrot.lane.b32.xlu0 %v3369_v38, %s12288_s11  ;;  %s12289_s12 = smov 122   ;;  %s12297_s11 = smov 4   ;;  %v3498_v1 = vcombine.high %v3464_v24, %v3480_v42  ;;  %v3541_v38 = vrot.slane %v3533_v58, %v7837_v5  ;;  %v3514_v29 = vcombine.high %v3496_v51, %v11824_v17 }
 0x4a8   :  { %v3548_v32 = vrot.slane %v3534_v22, %v7837_v5  ;;  %v3532_v39 = vrot.slane %v3518_v3, %v7837_v5 }
 0x4a9   :  { %v10142_v46 = vpop.permute.xlu1 %6030  ;;  %v10147_v16 = vpop.permute.xlu0 %6034  ;;  %v3512_v31 = vrot.slane %v3498_v1, %v8264_v56 }
 0x4aa   :  { %v3565_v62 = vcombine.low %v3532_v39, %v3548_v32 }
 0x4ab   :  { %6262 = vrot.lane.b32.xlu1 %v3379_v12, %s12289_s12  ;;  %6266 = vrot.lane.b32.xlu0 %v3376_v19, %s12290_s15  ;;  %s12293_s12 = smov 126   ;;  %s12296_s15 = smov 2   ;;  %v3525_v12 = vrot.slane %v3517_v40, %v7837_v5  ;;  %v3516_v11 = vcombine.high %v3512_v31, %v11824_v17 }
 0x4ac   :  { %v3573_v47 = vrot.slane %v3565_v62, %v8264_v56 }
 0x4ad   :  { %v10155_v10 = vpop.permute.xlu1 %6038  ;;  %v10160_v35 = vpop.permute.xlu0 %6042  ;;  %v3549_v54 = vcombine.low %v3525_v12, %v3541_v38 }
 0x4ae   :  { %v3583_v52 = vcombine.high %v3573_v47, %v11824_v17 }
 0x4af   :  { %6270 = vrot.lane.b32.xlu1 %v3380_v20, %s12293_s12  ;;  %6274 = vrot.lane.b32.xlu0 %v3445_v45, %s12296_s15  ;;  %s12298_s12 = smov 6   ;;  %s12299_s15 = smov 8   ;;  %v3515_v20 = vcombine.high %v3505_v43, %v11824_v17  ;;  %v3550_v45 = vcombine.high %v3525_v12, %v3541_v38  ;;  %v3557_v63 = vrot.slane %v3549_v54, %v8264_v56 }
 0x4b1   :  { %v10169_v2 = vpop.permute.xlu1 %6046  ;;  %v10172_v57 = vpop.permute.xlu0 %6050  ;;  %v3581_v0 = vcombine.high %v3557_v63, %v11824_v17 }
 0x4b3   :  { %6278 = vrot.lane.b32.xlu1 %v3428_v59, %s12297_s11  ;;  %6282 = vrot.lane.b32.xlu0 %v3446_v15, %s12298_s12  ;;  %s12300_s11 = smov 10   ;;  %s12301_s12 = smov 12   ;;  %v12315_v15 = vld [vmem:[#allocation200_spill] sm:$0xff] }
 0x4b5   :  { %v10179_v7 = vpop.permute.xlu1 %6054  ;;  %v10183_v37 = vpop.permute.xlu0 %6058 }
 0x4b7   :  { %6286 = vrot.lane.b32.xlu1 %v3437_v25, %s12299_s15  ;;  %6290 = vrot.lane.b32.xlu0 %v3447_v28, %s12300_s11  ;;  %s12302_s15 = smov 14   ;;  %s12305_s11 = smov 16   ;;  %v12316_v25 = vld [vmem:[#allocation99_spill] sm:$0xff]  ;;  %v3564_v28 = vrot.slane %v3550_v45, %v8264_v56  ;;  %v12324_v45 = vld [vmem:[#allocation101_spill] sm:$0xff] }
 0x4b8   :  { %v3601_v33 = vcombine.low %v12316_v25, %v12315_v15 }
 0x4b9   :  { %v10191_v27 = vpop.permute.xlu1 %6062  ;;  %v10194_v60 = vpop.permute.xlu0 %6066  ;;  %v3582_v55 = vcombine.high %v3564_v28, %v11824_v17 }
 0x4bb   :  { %6294 = vrot.lane.b32.xlu1 %v3444_v53, %s12301_s12  ;;  %6298 = vrot.lane.b32.xlu0 %v3448_v18, %s12302_s15  ;;  %s12308_s12 = smov 18   ;;  %s12309_s15 = smov 20   ;;  %v12318_v53 = vld [vmem:[#allocation149_spill] sm:$0xff]  ;;  %v3566_v18 = vcombine.high %v3532_v39, %v3548_v32  ;;  %v12323_v32 = vld [vmem:[#allocation202_spill] sm:$0xff] }
 0x4bc   :  { %v3585_v42 = vcombine.low %v12319_v13, %v12318_v53  ;;  %v3586_v1 = vcombine.high %v12319_v13, %v12318_v53 }
 0x4bd   :  { %v10201_v26 = vpop.permute.xlu1 %6070  ;;  %v10205_v48 = vpop.permute.xlu0 %6074  ;;  %v3580_v40 = vrot.slane %v3566_v18, %v8264_v56 }
 0x4be   :  { %v3593_v21 = vrot.slane %v3585_v42, %v7837_v5 }
 0x4bf   :  { %6302 = vrot.lane.b32.xlu1 %v3489_v44, %s12305_s11  ;;  %6306 = vrot.lane.b32.xlu0 %v3513_v61, %s12308_s12  ;;  %s12310_s11 = smov 22   ;;  %s12311_s12 = smov 24   ;;  %v3609_v44 = vrot.slane %v3601_v33, %v7837_v5  ;;  %v3602_v61 = vcombine.high %v12316_v25, %v12315_v15  ;;  %v3584_v22 = vcombine.high %v3580_v40, %v11824_v17  ;;  %v12325_v15 = vld [vmem:[#allocation151_spill] sm:$0xff]  ;;  %v12326_v25 = vld [vmem:[#allocation20_spill] sm:$0xff] }
 0x4c0   :  { %v3653_v33 = vcombine.low %v12326_v25, %v12325_v15 }
 0x4c1   :  { %v10213_v34 = vpop.permute.xlu1 %6078  ;;  %v10216_v6 = vpop.permute.xlu0 %6082 }
 0x4c3   :  { %6310 = vrot.lane.b32.xlu1 %v3496_v51, %s12309_s15  ;;  %6314 = vrot.lane.b32.xlu0 %v3514_v29, %s12310_s11  ;;  %s12312_s15 = smov 26   ;;  %s12313_s11 = smov 28   ;;  %v3617_v51 = vcombine.low %v3593_v21, %v3609_v44  ;;  %v3616_v29 = vrot.slane %v3602_v61, %v7837_v5 }
 0x4c5   :  { %v10223_v19 = vpop.permute.xlu1 %6086  ;;  %v10227_v4 = vpop.permute.xlu0 %6090  ;;  %v3625_v54 = vrot.slane %v3617_v51, %v8264_v56 }
 0x4c7   :  { %6318 = vrot.lane.b32.xlu1 %v3505_v43, %s12311_s12  ;;  %6322 = vrot.lane.b32.xlu0 %v3515_v20, %s12312_s15  ;;  %s12314_s12 = smov 30   ;;  %s12317_s15 = smov 32   ;;  %v3618_v43 = vcombine.high %v3593_v21, %v3609_v44  ;;  %v3600_v20 = vrot.slane %v3586_v1, %v7837_v5  ;;  %v3649_v39 = vcombine.high %v3625_v54, %v11824_v17 }
 0x4c8   :  { %v3661_v44 = vrot.slane %v3653_v33, %v7837_v5 }
 0x4c9   :  { %v10235_v14 = vpop.permute.xlu1 %6094  ;;  %v10238_v59 = vpop.permute.xlu0 %6098  ;;  %v3633_v3 = vcombine.low %v3600_v20, %v3616_v29  ;;  %v3632_v62 = vrot.slane %v3618_v43, %v8264_v56 }
 0x4cb   :  { %6326 = vrot.lane.b32.xlu1 %v3512_v31, %s12313_s11  ;;  %6330 = vrot.lane.b32.xlu0 %v3516_v11, %s12314_s12  ;;  %s12320_s11 = smov 34   ;;  %s12321_s12 = smov 36   ;;  %v3669_v11 = vcombine.low %v12324_v45, %v12323_v32  ;;  %v3650_v42 = vcombine.high %v3632_v62, %v11824_v17  ;;  %v3641_v18 = vrot.slane %v3633_v3, %v8264_v56 }
 0x4cd   :  { %v10245_v41 = vpop.permute.xlu1 %6102  ;;  %v10249_v50 = vpop.permute.xlu0 %6106  ;;  %v3677_v53 = vrot.slane %v3669_v11, %v7837_v5  ;;  %v3651_v51 = vcombine.high %v3641_v18, %v11824_v17  ;;  %v12327_v11 = vld [vmem:[#allocation204_spill] sm:$0xff] }
 0x4cf   :  { %6334 = vrot.lane.b32.xlu1 %v3557_v63, %s12317_s15  ;;  %6338 = vrot.lane.b32.xlu0 %v3581_v0, %s12320_s11  ;;  %s12322_s15 = smov 38   ;;  %v3685_v21 = vcombine.low %v3661_v44, %v3677_v53  ;;  %v3686_v43 = vcombine.high %v3661_v44, %v3677_v53  ;;  %v12330_v53 = vld [vmem:[#allocation21_spill] sm:$0xff] }
 0x4d1   :  { %v10257_v30 = vpop.permute.xlu1 %6110  ;;  %v10260_v24 = vpop.permute.xlu0 %6114  ;;  %v3700_v33 = vrot.slane %v3686_v43, %v8264_v56 }
 0x4d3   :  { %6342 = vrot.lane.b32.xlu1 %v3564_v28, %s12321_s12  ;;  %6346 = vrot.lane.b32.xlu0 %v3582_v55, %s12322_s15  ;;  %v3634_v28 = vcombine.high %v3600_v20, %v3616_v29  ;;  %v3693_v20 = vrot.slane %v3685_v21, %v8264_v56 }
 0x4d5   :  { %v10267_v58 = vpop.permute.xlu1 %6118  ;;  %v10271_v36 = vpop.permute.xlu0 %6122 }
 0x4d7   :  { %6350 = vrot.lane.b32.xlu1 %v3573_v47, %s12167_s7  ;;  %6354 = vrot.lane.b32.xlu0 %v3583_v52, %s12170_s0  ;;  %v3670_v47 = vcombine.high %v12324_v45, %v12323_v32  ;;  %v3648_v52 = vrot.slane %v3634_v28, %v8264_v56  ;;  %v12329_v28 = vld [vmem:[#allocation153_spill] sm:$0xff] }
 0x4d9   :  { %v10279_v38 = vpop.permute.xlu1 %6126  ;;  %v10282_v12 = vpop.permute.xlu0 %6130  ;;  %v3684_v29 = vrot.slane %v3670_v47, %v7837_v5 }
 0x4db   :  { %6358 = vrot.lane.b32.xlu1 %v3580_v40, %s12052_s13  ;;  %6362 = vrot.lane.b32.xlu0 %v3584_v22, %s12053_s9  ;;  %v3654_v40 = vcombine.high %v12326_v25, %v12325_v15  ;;  %v3717_v25 = vcombine.high %v3693_v20, %v11824_v17 }
 0x4dd   :  { %v10289_v31 = vpop.permute.xlu1 %6134  ;;  %v10293_v63 = vpop.permute.xlu0 %6138  ;;  %v3668_v3 = vrot.slane %v3654_v40, %v7837_v5 }
 0x4df   :  { %6366 = vrot.lane.b32.xlu1 %v3625_v54, %s12056_s8  ;;  %6370 = vrot.lane.b32.xlu0 %v3649_v39, %s11972_s1  ;;  %v3652_v54 = vcombine.high %v3648_v52, %v11824_v17  ;;  %v3701_v45 = vcombine.low %v3668_v3, %v3684_v29  ;;  %v12328_v39 = vld [vmem:[#allocation103_spill] sm:$0xff]  ;;  %v3702_v44 = vcombine.high %v3668_v3, %v3684_v29 }
 0x4e1   :  { %v10301_v0 = vpop.permute.xlu1 %6142  ;;  %v10304_v13 = vpop.permute.xlu0 %6146 }
 0x4e3   :  { %6374 = vrot.lane.b32.xlu1 %v3632_v62, %s11973_s10  ;;  %6378 = vrot.lane.b32.xlu0 %v3650_v42, %s11864_s4  ;;  %v3737_v62 = vcombine.low %v12328_v39, %v12327_v11  ;;  %v3721_v42 = vcombine.low %v12330_v53, %v12329_v28 }
 0x4e5   :  { %v10311_v55 = vpop.permute.xlu1 %6150  ;;  %v10315_v61 = vpop.permute.xlu0 %6154  ;;  %v3745_v47 = vrot.slane %v3737_v62, %v7837_v5  ;;  %v3729_v40 = vrot.slane %v3721_v42, %v7837_v5  ;;  %v3716_v62 = vrot.slane %v3702_v44, %v8264_v56 }
 0x4e7   :  { %6382 = vrot.lane.b32.xlu1 %v3641_v18, %s11865_s5  ;;  %6386 = vrot.lane.b32.xlu0 %v3651_v51, %s11866_s6  ;;  %v3718_v51 = vcombine.high %v3700_v33, %v11824_v17  ;;  %v3753_v29 = vcombine.low %v3729_v40, %v3745_v47  ;;  %v3754_v42 = vcombine.high %v3729_v40, %v3745_v47 }
 0x4e9   :  { %v10323_v1 = vpop.permute.xlu1 %6158  ;;  %v10326_v22 = vpop.permute.xlu0 %6162  ;;  %v3768_v40 = vrot.slane %v3754_v42, %v8264_v56 }
 0x4eb   :  { %6390 = vrot.lane.b32.xlu1 %v3648_v52, %s11867_s3  ;;  %6394 = vrot.lane.b32.xlu0 %v3652_v54, %s11868_s2  ;;  %v3709_v52 = vrot.slane %v3701_v45, %v8264_v56  ;;  %v3738_v54 = vcombine.high %v12328_v39, %v12327_v11  ;;  %v3722_v45 = vcombine.high %v12330_v53, %v12329_v28 }
 0x4ec   :  { %v3720_v39 = vcombine.high %v3716_v62, %v11824_v17 }
 0x4ed   :  { %v10333_v32 = vpop.permute.xlu1 %6166  ;;  %v10337_v15 = vpop.permute.xlu0 %6170  ;;  %v3719_v3 = vcombine.high %v3709_v52, %v11824_v17  ;;  %v3736_v44 = vrot.slane %v3722_v45, %v7837_v5 }
 0x4ef   :  { %6398 = vrot.lane.b32.xlu1 %v3693_v20, %s11869_s30  ;;  %6402 = vrot.lane.b32.xlu0 %v3717_v25, %s11870_s29 }
 0x4f1   :  { %v10345_v18 = vpop.permute.xlu1 %6174  ;;  %v10348_v21 = vpop.permute.xlu0 %6178 }
 0x4f2   :  { %12331 = vst [vmem:[#allocation207_spill] sm:$0xff] %v10348_v21 }
 0x4f3   :  { %6406 = vrot.lane.b32.xlu1 %v3700_v33, %s11872_s28  ;;  %6410 = vrot.lane.b32.xlu0 %v3718_v51, %s11873_s27  ;;  %v3752_v33 = vrot.slane %v3738_v54, %v7837_v5  ;;  %v3761_v51 = vrot.slane %v3753_v29, %v8264_v56  ;;  %v12340_v29 = vld [vmem:[#allocation155_spill] sm:$0xff] }
 0x4f5   :  { %v10355_v43 = vpop.permute.xlu1 %6182  ;;  %v10359_v20 = vpop.permute.xlu0 %6186  ;;  %v3769_v53 = vcombine.low %v3736_v44, %v3752_v33  ;;  %v3785_v47 = vcombine.high %v3761_v51, %v11824_v17 }
 0x4f6   :  { %12332 = vst [vmem:[#allocation208_spill] sm:$0xff] %v10355_v43  ;;  %12333 = vst [vmem:[#allocation209_spill] sm:$0xff] %v10359_v20 }
 0x4f7   :  { %6414 = vrot.lane.b32.xlu1 %v3709_v52, %s11876_s26  ;;  %6418 = vrot.lane.b32.xlu0 %v3719_v3, %s11877_s25  ;;  %v12337_v52 = vld [vmem:[#allocation205_spill] sm:$0xff]  ;;  %v3777_v43 = vrot.slane %v3769_v53, %v8264_v56 }
 0x4f8   :  { %v12338_v3 = vld [vmem:[#allocation105_spill] sm:$0xff] }
 0x4f9   :  { %v10367_v25 = vpop.permute.xlu1 %6190  ;;  %v10370_v11 = vpop.permute.xlu0 %6194 }
 0x4fa   :  { %12334 = vst [vmem:[#allocation210_spill] sm:$0xff] %v10367_v25  ;;  %12335 = vst [vmem:[#allocation211_spill] sm:$0xff] %v10370_v11  ;;  %v3805_v25 = vcombine.low %v12338_v3, %v12337_v52 }
 0x4fb   :  { %6422 = vrot.lane.b32.xlu1 %v3716_v62, %s11879_s24  ;;  %6426 = vrot.lane.b32.xlu0 %v3720_v39, %s11881_s23  ;;  %v12341_v62 = vld [vmem:[#allocation22_spill] sm:$0xff]  ;;  %v3770_v39 = vcombine.high %v3736_v44, %v3752_v33  ;;  %s12344_s23 = smov 84  }
 0x4fc   :  { %v3789_v11 = vcombine.low %v12341_v62, %v12340_v29  ;;  %v3790_v53 = vcombine.high %v12341_v62, %v12340_v29 }
 0x4fd   :  { %v10377_v28 = vpop.permute.xlu1 %6198  ;;  %v10381_v54 = vpop.permute.xlu0 %6202 }
 0x4fe   :  { %12336 = vst [vmem:[#allocation164_spill] sm:$0xff] %v10377_v28  ;;  %12339 = vst [vmem:[#allocation64_spill] sm:$0xff] %v10381_v54  ;;  %v3813_v28 = vrot.slane %v3805_v25, %v7837_v5  ;;  %v3786_v54 = vcombine.high %v3768_v40, %v11824_v17  ;;  %v3797_v42 = vrot.slane %v3789_v11, %v7837_v5 }
 0x4ff   :  { %6430 = vrot.lane.b32.xlu1 %v3761_v51, %s11884_s22  ;;  %6434 = vrot.lane.b32.xlu0 %v3785_v47, %s11887_s21  ;;  %v3806_v47 = vcombine.high %v12338_v3, %v12337_v52  ;;  %v3787_v25 = vcombine.high %v3777_v43, %v11824_v17 }
 0x500   :  { %v3821_v33 = vcombine.low %v3797_v42, %v3813_v28 }
 0x501   :  { %v10389_v45 = vpop.permute.xlu1 %6206  ;;  %v10392_v20 = vpop.permute.xlu0 %6210 }
 0x502   :  { %12342 = vst [vmem:[#allocation73_spill] sm:$0xff] %v10389_v45  ;;  %12343 = vst [vmem:[#allocation114_spill] sm:$0xff] %v10392_v20  ;;  %v3784_v20 = vrot.slane %v3770_v39, %v8264_v56  ;;  %v12350_v39 = vld [vmem:[#allocation206_spill] sm:$0xff] }
 0x503   :  { %6438 = vrot.lane.b32.xlu1 %v3768_v40, %s12344_s23  ;;  %6442 = vrot.lane.b32.xlu0 %v3786_v54, %s11890_s19  ;;  %v3820_v54 = vrot.slane %v3806_v47, %v7837_v5  ;;  %v3822_v40 = vcombine.high %v3797_v42, %v3813_v28 }
 0x504   :  { %v3788_v3 = vcombine.high %v3784_v20, %v11824_v17 }
 0x505   :  { %v10399_v51 = vpop.permute.xlu1 %6214  ;;  %v10403_v44 = vpop.permute.xlu0 %6218  ;;  %v3836_v42 = vrot.slane %v3822_v40, %v8264_v56 }
 0x506   :  { %12345 = vst [vmem:[#allocation39_spill] sm:$0xff] %v10399_v51  ;;  %12346 = vst [vmem:[#allocation123_spill] sm:$0xff] %v10403_v44  ;;  %v3829_v44 = vrot.slane %v3821_v33, %v8264_v56  ;;  %v12353_v33 = vld [vmem:[#allocation157_spill] sm:$0xff] }
 0x507   :  { %6446 = vrot.lane.b32.xlu1 %v3777_v43, %s12240_s20  ;;  %6450 = vrot.lane.b32.xlu0 %v3787_v25, %s11894_s17  ;;  %v3804_v43 = vrot.slane %v3790_v53, %v7837_v5  ;;  %v12351_v25 = vld [vmem:[#allocation107_spill] sm:$0xff] }
 0x508   :  { %v3853_v28 = vcombine.high %v3829_v44, %v11824_v17 }
 0x509   :  { %v10411_v11 = vpop.permute.xlu1 %6222  ;;  %v10414_v52 = vpop.permute.xlu0 %6226  ;;  %v3837_v62 = vcombine.low %v3804_v43, %v3820_v54 }
 0x50a   :  { %12347 = vst [vmem:[#allocation23_spill] sm:$0xff] %v10411_v11  ;;  %12348 = vst [vmem:[#allocation212_spill] sm:$0xff] %v10414_v52  ;;  %v3873_v11 = vcombine.low %v12351_v25, %v12350_v39 }
 0x50b   :  { %6454 = vrot.lane.b32.xlu1 %v3784_v20, %s11897_s16  ;;  %6458 = vrot.lane.b32.xlu0 %v3788_v3, %s12080_s18  ;;  %v12354_v20 = vld [vmem:[#allocation24_spill] sm:$0xff]  ;;  %s12355_s16 = smov 98   ;;  %v3838_v3 = vcombine.high %v3804_v43, %v3820_v54  ;;  %v3845_v45 = vrot.slane %v3837_v62, %v8264_v56  ;;  %s12358_s18 = smov 100  }
 0x50c   :  { %v3857_v52 = vcombine.low %v12354_v20, %v12353_v33  ;;  %v3858_v62 = vcombine.high %v12354_v20, %v12353_v33  ;;  %v12368_v33 = vld [vmem:[#allocation175_spill] sm:$0xff]  ;;  %v12369_v20 = vld [vmem:[#allocation76_spill] sm:$0xff] }
 0x50d   :  { %v10421_v29 = vpop.permute.xlu1 %6230  ;;  %v10425_v47 = vpop.permute.xlu0 %6234 }
 0x50e   :  { %12349 = vst [vmem:[#allocation213_spill] sm:$0xff] %v10421_v29  ;;  %12352 = vst [vmem:[#allocation214_spill] sm:$0xff] %v10425_v47  ;;  %v3881_v29 = vrot.slane %v3873_v11, %v7837_v5  ;;  %v3854_v47 = vcombine.high %v3836_v42, %v11824_v17  ;;  %v3855_v11 = vcombine.high %v3845_v45, %v11824_v17 }
 0x50f   :  { %6462 = vrot.lane.b32.xlu1 %v3829_v44, %s11902_s14  ;;  %6466 = vrot.lane.b32.xlu0 %v3853_v28, %s12355_s16  ;;  %v3865_v44 = vrot.slane %v3857_v52, %v7837_v5  ;;  %s12359_s14 = smov 102   ;;  %v3874_v28 = vcombine.high %v12351_v25, %v12350_v39  ;;  %s12362_s16 = smov 104  }
 0x511   :  { %v10433_v53 = vpop.permute.xlu1 %6238  ;;  %v10436_v51 = vpop.permute.xlu0 %6242  ;;  %v3889_v54 = vcombine.low %v3865_v44, %v3881_v29 }
 0x512   :  { %12356 = vst [vmem:[#allocation215_spill] sm:$0xff] %v10433_v53  ;;  %12357 = vst [vmem:[#allocation165_spill] sm:$0xff] %v10436_v51  ;;  %v3852_v51 = vrot.slane %v3838_v3, %v8264_v56  ;;  %v3941_v3 = vcombine.low %v12369_v20, %v12368_v33 }
 0x513   :  { %6470 = vrot.lane.b32.xlu1 %v3836_v42, %s12358_s18  ;;  %6474 = vrot.lane.b32.xlu0 %v3854_v47, %s12359_s14  ;;  %s12363_s18 = smov 106   ;;  %v3888_v47 = vrot.slane %v3874_v28, %v7837_v5  ;;  %v3890_v42 = vcombine.high %v3865_v44, %v3881_v29  ;;  %s12366_s14 = smov 108  }
 0x514   :  { %v3856_v25 = vcombine.high %v3852_v51, %v11824_v17 }
 0x515   :  { %v10443_v40 = vpop.permute.xlu1 %6246  ;;  %v10447_v43 = vpop.permute.xlu0 %6250  ;;  %v3904_v44 = vrot.slane %v3890_v42, %v8264_v56  ;;  %v7344_v42 = vsel %vm7029_vm0, %v9739_v23, %v10130_v9 }
 0x516   :  { %12360 = vst [vmem:[#allocation65_spill] sm:$0xff] %v10443_v40  ;;  %12361 = vst [vmem:[#allocation75_spill] sm:$0xff] %v10447_v43  ;;  %v3897_v43 = vrot.slane %v3889_v54, %v8264_v56  ;;  %v12373_v54 = vld [vmem:[#allocation26_spill] sm:$0xff] }
 0x517   :  { %6478 = vrot.lane.b32.xlu1 %v3845_v45, %s12362_s16  ;;  %6482 = vrot.lane.b32.xlu0 %v3855_v11, %s12363_s18  ;;  %v3872_v45 = vrot.slane %v3858_v62, %v7837_v5  ;;  %s12367_s16 = smov 110   ;;  %s12375_s18 = smov 114   ;;  %v3922_v53 = vcombine.high %v3904_v44, %v11824_v17 }
 0x518   :  { %v3921_v29 = vcombine.high %v3897_v43, %v11824_v17 }
 0x519   :  { %v10455_v52 = vpop.permute.xlu1 %6254  ;;  %v10458_v39 = vpop.permute.xlu0 %6258 }
 0x51a   :  { %12364 = vst [vmem:[#allocation115_spill] sm:$0xff] %v10455_v52  ;;  %12365 = vst [vmem:[#allocation41_spill] sm:$0xff] %v10458_v39  ;;  %v3905_v52 = vcombine.low %v3872_v45, %v3888_v47  ;;  %v12372_v39 = vld [vmem:[#allocation126_spill] sm:$0xff] }
 0x51b   :  { %6486 = vrot.lane.b32.xlu1 %v3852_v51, %s12366_s14  ;;  %6490 = vrot.lane.b32.xlu0 %v3856_v25, %s12367_s16  ;;  %v3925_v40 = vcombine.low %v12373_v54, %v12372_v39  ;;  %s12374_s14 = smov 112   ;;  %v3949_v51 = vrot.slane %v3941_v3, %v7837_v5  ;;  %v3906_v25 = vcombine.high %v3872_v45, %v3888_v47  ;;  %s12376_s16 = smov 116  }
 0x51c   :  { %v7345_v3 = vsel %vm7031_vm1, %v7344_v42, %v10136_v8  ;;  %v3942_v47 = vcombine.high %v12369_v20, %v12368_v33 }
 0x51d   :  { %v10467_v11 = vpop.permute.xlu1 %6262  ;;  %v10469_v28 = vpop.permute.xlu0 %6266  ;;  %v3933_v21 = vrot.slane %v3925_v40, %v7837_v5  ;;  %v3920_v9 = vrot.slane %v3906_v25, %v8264_v56  ;;  %v7346_v8 = vsel %vm7033_vm2, %v7345_v3, %v10142_v46  ;;  %v12383_v3 = vld [vmem:[#allocation78_spill] sm:$0xff] }
 0x51e   :  { %12370 = vst [vmem:[#allocation125_spill] sm:$0xff] %v10467_v11  ;;  %12371 = vst [vmem:[#allocation25_spill] sm:$0xff] %v10469_v28  ;;  %v3913_v28 = vrot.slane %v3905_v52, %v8264_v56  ;;  %v7347_v33 = vsel %vm7035_vm3, %v7346_v8, %v10147_v16  ;;  %v3956_v20 = vrot.slane %v3942_v47, %v7837_v5 }
 0x51f   :  { %6494 = vrot.lane.b32.xlu1 %v3897_v43, %s12374_s14  ;;  %6498 = vrot.lane.b32.xlu0 %v3921_v29, %s12375_s18  ;;  %s12377_s18 = smov 118   ;;  %v3957_v52 = vcombine.low %v3933_v21, %v3949_v51  ;;  %v3924_v46 = vcombine.high %v3920_v9, %v11824_v17  ;;  %v7348_v42 = vsel %vm7037_vm4, %v7347_v33, %v10155_v10 }
 0x520   :  { %v3923_v23 = vcombine.high %v3913_v28, %v11824_v17 }
 0x521   :  { %v10478_v62 = vpop.permute.xlu1 %6270  ;;  %v6275_v11 = vpop.permute.xlu0 %6274  ;;  %v10508_v25 = vrot.slane %v3957_v52, %v8264_v56 }
 0x522   :  { %v7407_v43 = vsel %vm7029_vm0, %v10150_v49, %v6275_v11  ;;  %v3926_v49 = vcombine.high %v12373_v54, %v12372_v39  ;;  %v3958_v11 = vcombine.high %v3933_v21, %v3949_v51  ;;  %v7349_v21 = vsel %vm7039_vm5, %v7348_v42, %v10160_v35 }
 0x523   :  { %6502 = vrot.lane.b32.xlu1 %v3904_v44, %s12376_s16  ;;  %6506 = vrot.lane.b32.xlu0 %v3922_v53, %s12377_s18  ;;  %s12378_s16 = smov 120   ;;  %s12379_s18 = smov 122   ;;  %v7350_v35 = vsel %vm7041_vm6, %v7349_v21, %v10169_v2 }
 0x525   :  { %v6279_v45 = vpop.permute.xlu1 %6278  ;;  %v6283_v29 = vpop.permute.xlu0 %6282 }
 0x526   :  { %v7408_v40 = vsel %vm7031_vm1, %v7407_v43, %v6279_v45  ;;  %v12382_v43 = vld [vmem:[#allocation177_spill] sm:$0xff]  ;;  %v3989_v45 = vcombine.high %v10508_v25, %v11824_v17 }
 0x527   :  { %6510 = vrot.lane.b32.xlu1 %v3913_v28, %s12378_s16  ;;  %v7409_v53 = vsel %vm7033_vm2, %v7408_v40, %v6283_v29  ;;  %6514 = vrot.lane.b32.xlu0 %v3923_v23, %s12379_s18  ;;  %v3940_v28 = vrot.slane %v3926_v49, %v7837_v5  ;;  %s12380_s16 = smov 124   ;;  %s12381_s18 = smov 126   ;;  %v4009_v47 = vcombine.low %v12383_v3, %v12382_v43  ;;  %v12384_v23 = vld [vmem:[#allocation128_spill] sm:$0xff] }
 0x528   :  { %v3972_v40 = vrot.slane %v3958_v11, %v8264_v56 }
 0x529   :  { %v6287_v44 = vpop.permute.xlu1 %6286  ;;  %v6291_v54 = vpop.permute.xlu0 %6290  ;;  %v3973_v51 = vcombine.low %v3940_v28, %v3956_v20  ;;  %v3974_v33 = vcombine.high %v3940_v28, %v3956_v20  ;;  %v4017_v11 = vrot.slane %v4009_v47, %v7837_v5  ;;  %v4010_v28 = vcombine.high %v12383_v3, %v12382_v43 }
 0x52a   :  { %v7410_v39 = vsel %vm7035_vm3, %v7409_v53, %v6287_v44  ;;  %v7351_v53 = vsel %vm7043_vm7, %v7350_v35, %v10172_v57 }
 0x52b   :  { %6518 = vrot.lane.b32.xlu1 %v3920_v9, %s12380_s16  ;;  %v7411_v16 = vsel %vm7037_vm4, %v7410_v39, %v6291_v54  ;;  %6522 = vrot.lane.b32.xlu0 %v3924_v46, %s12381_s18  ;;  %v12385_v9 = vld [vmem:[#allocation28_spill] sm:$0xff]  ;;  %s12386_s18 = smov 2   ;;  %s12387_s16 = smov 4   ;;  %v3990_v39 = vcombine.high %v3972_v40, %v11824_v17  ;;  %v3981_v54 = vrot.slane %v3973_v51, %v8264_v56 }
 0x52c   :  { %v3993_v49 = vcombine.low %v12385_v9, %v12384_v23  ;;  %v4024_v3 = vrot.slane %v4010_v28, %v7837_v5 }
 0x52d   :  { %v6295_v52 = vpop.permute.xlu1 %6294  ;;  %v6299_v29 = vpop.permute.xlu0 %6298  ;;  %v3991_v47 = vcombine.high %v3981_v54, %v11824_v17 }
 0x52e   :  { %v7412_v10 = vsel %vm7039_vm5, %v7411_v16, %v6295_v52  ;;  %v4001_v42 = vrot.slane %v3993_v49, %v7837_v5  ;;  %v7352_v16 = vsel %vm12388_vm10, %v7351_v53, %v10179_v7  ;;  %v3988_v52 = vrot.slane %v3974_v33, %v8264_v56 }
 0x52f   :  { %6526 = vrot.lane.b32.xlu1 %v3989_v45, %s12386_s18  ;;  %v7413_v8 = vsel %vm7041_vm6, %v7412_v10, %v6299_v29  ;;  %6530 = vrot.lane.b32.xlu0 %v3972_v40, %s12387_s16  ;;  %s12389_s18 = smov 6   ;;  %v7353_v20 = vsel %vm12391_vm9, %v7352_v16, %v10183_v37  ;;  %s12392_s16 = smov 8   ;;  %v3994_v40 = vcombine.high %v12385_v9, %v12384_v23  ;;  %vm12394_vm10 = vcmask 179200  }
 0x530   :  { %v4025_v21 = vcombine.low %v4001_v42, %v4017_v11  ;;  %v7354_v37 = vsel %vm12394_vm10, %v7353_v20, %v10191_v27  ;;  %vm12397_vm9 = vcmask 195584   ;;  %v4026_v29 = vcombine.high %v4001_v42, %v4017_v11  ;;  %v12409_v20 = vld [vmem:[#allocation30_spill] sm:$0xff] }
 0x531   :  { %v6303_v44 = vpop.permute.xlu1 %6302  ;;  %v6307_v2 = vpop.permute.xlu0 %6306  ;;  %v7355_v43 = vsel %vm12397_vm9, %v7354_v37, %v10194_v60  ;;  %v3992_v35 = vcombine.high %v3988_v52, %v11824_v17 }
 0x532   :  { %v7414_v46 = vsel %vm7043_vm7, %v7413_v8, %v6303_v44  ;;  %v4033_v23 = vrot.slane %v4025_v21, %v8264_v56  ;;  %v4008_v8 = vrot.slane %v3994_v40, %v7837_v5  ;;  %v12405_v44 = vld [vmem:[#allocation179_spill] sm:$0xff]  ;;  %v4040_v42 = vrot.slane %v4026_v29, %v8264_v56 }
 0x533   :  { %6534 = vrot.lane.b32.xlu1 %v3990_v39, %s12389_s18  ;;  %v7415_v57 = vsel %vm12390_vm11, %v7414_v46, %v6307_v2  ;;  %6538 = vrot.lane.b32.xlu0 %v3981_v54, %s12392_s16  ;;  %s12395_s18 = smov 10   ;;  %vm12396_vm11 = vmmov %vm12394_vm10  ;;  %s12398_s16 = smov 12   ;;  %vm12400_vm10 = vcmask 211968   ;;  %v12406_v39 = vld [vmem:[#allocation80_spill] sm:$0xff] }
 0x534   :  { %v7356_v53 = vsel %vm12400_vm10, %v7355_v43, %v10201_v26  ;;  %v4041_v11 = vcombine.low %v4008_v8, %v4024_v3  ;;  %v4077_v54 = vcombine.low %v12406_v39, %v12405_v44  ;;  %v4057_v2 = vcombine.high %v4033_v23, %v11824_v17 }
 0x535   :  { %v6311_v51 = vpop.permute.xlu1 %6310  ;;  %v6315_v45 = vpop.permute.xlu0 %6314  ;;  %v4078_v29 = vcombine.high %v12406_v39, %v12405_v44 }
 0x536   :  { %v7416_v7 = vsel %vm12393_vm8, %v7415_v57, %v6311_v51  ;;  %vm12399_vm8 = vmmov %vm12397_vm9  ;;  %vm12403_vm9 = vcmask 228352   ;;  %v12408_v57 = vld [vmem:[#allocation130_spill] sm:$0xff]  ;;  %v4049_v40 = vrot.slane %v4041_v11, %v8264_v56 }
 0x537   :  { %6542 = vrot.lane.b32.xlu1 %v3991_v47, %s12395_s18  ;;  %v7417_v10 = vsel %vm12396_vm11, %v7416_v7, %v6315_v45  ;;  %6546 = vrot.lane.b32.xlu0 %v3988_v52, %s12398_s16  ;;  %s12401_s18 = smov 14   ;;  %vm12402_vm11 = vmmov %vm12400_vm10  ;;  %v7357_v33 = vsel %vm12403_vm9, %v7356_v53, %v10205_v48  ;;  %s12404_s16 = smov 16   ;;  %v4061_v28 = vcombine.low %v12409_v20, %v12408_v57  ;;  %vm12410_vm10 = vcmask 244736  }
 0x538   :  { %v7358_v48 = vsel %vm12410_vm10, %v7357_v33, %v10213_v34  ;;  %v4042_v47 = vcombine.high %v4008_v8, %v4024_v3  ;;  %v4085_v52 = vrot.slane %v4077_v54, %v7837_v5  ;;  %v4058_v45 = vcombine.high %v4040_v42, %v11824_v17 }
 0x539   :  { %v6319_v49 = vpop.permute.xlu1 %6318  ;;  %v6323_v27 = vpop.permute.xlu0 %6322  ;;  %v4062_v8 = vcombine.high %v12409_v20, %v12408_v57  ;;  %v4092_v33 = vrot.slane %v4078_v29, %v7837_v5  ;;  %v12433_v57 = vld [vmem:[#allocation181_spill] sm:$0xff]  ;;  %v12434_v20 = vld [vmem:[#allocation82_spill] sm:$0xff] }
 0x53a   :  { %v7418_v9 = vsel %vm12399_vm8, %v7417_v10, %v6319_v49  ;;  %vm12407_vm8 = vmmov %vm12403_vm9  ;;  %vm12413_vm9 = vcmask 261120   ;;  %v4069_v10 = vrot.slane %v4061_v28, %v7837_v5  ;;  %v4145_v28 = vcombine.low %v12434_v20, %v12433_v57 }
 0x53b   :  { %6550 = vrot.lane.b32.xlu1 %v3992_v35, %s12401_s18  ;;  %v7419_v60 = vsel %vm12402_vm11, %v7418_v9, %v6323_v27  ;;  %6554 = vrot.lane.b32.xlu0 %v4033_v23, %s12404_s16  ;;  %s12411_s18 = smov 18   ;;  %vm12412_vm11 = vmmov %vm12410_vm10  ;;  %v7359_v51 = vsel %vm12413_vm9, %v7358_v48, %v10216_v6  ;;  %s12414_s16 = smov 20   ;;  %vm12416_vm10 = vcmask 277504   ;;  %v4059_v23 = vcombine.high %v4049_v40, %v11824_v17 }
 0x53c   :  { %v7360_v43 = vsel %vm12416_vm10, %v7359_v51, %v10223_v19  ;;  %v4093_v49 = vcombine.low %v4069_v10, %v4085_v52  ;;  %v4056_v9 = vrot.slane %v4042_v47, %v8264_v56  ;;  %v4094_v11 = vcombine.high %v4069_v10, %v4085_v52  ;;  %v12436_v52 = vld [vmem:[#allocation132_spill] sm:$0xff] }
 0x53d   :  { %v6327_v46 = vpop.permute.xlu1 %6326  ;;  %v6331_v16 = vpop.permute.xlu0 %6330  ;;  %v4153_v10 = vrot.slane %v4145_v28, %v7837_v5 }
 0x53e   :  { %v7420_v26 = vsel %vm12407_vm8, %v7419_v60, %v6327_v46  ;;  %vm12415_vm8 = vmmov %vm12413_vm9  ;;  %vm12419_vm9 = vcmask 293888   ;;  %v4060_v39 = vcombine.high %v4056_v9, %v11824_v17  ;;  %v4101_v54 = vrot.slane %v4093_v49, %v8264_v56 }
 0x53f   :  { %6558 = vrot.lane.b32.xlu1 %v4057_v2, %s12411_s18  ;;  %v7421_v21 = vsel %vm12412_vm11, %v7420_v26, %v6331_v16  ;;  %6562 = vrot.lane.b32.xlu0 %v4040_v42, %s12414_s16  ;;  %s12417_s18 = smov 22   ;;  %vm12418_vm11 = vmmov %vm12416_vm10  ;;  %v7361_v3 = vsel %vm12419_vm9, %v7360_v43, %v10227_v4  ;;  %s12420_s16 = smov 24   ;;  %vm12422_vm10 = vcmask 310272   ;;  %v4076_v2 = vrot.slane %v4062_v8, %v7837_v5 }
 0x540   :  { %v7362_v4 = vsel %vm12422_vm10, %v7361_v3, %v10235_v14  ;;  %v4108_v51 = vrot.slane %v4094_v11, %v8264_v56 }
 0x541   :  { %v6335_v7 = vpop.permute.xlu1 %6334  ;;  %v6339_v34 = vpop.permute.xlu0 %6338  ;;  %v4109_v16 = vcombine.low %v4076_v2, %v4092_v33 }
 0x542   :  { %v7422_v37 = vsel %vm12415_vm8, %v7421_v21, %v6335_v7  ;;  %vm12421_vm8 = vmmov %vm12419_vm9  ;;  %vm12425_vm9 = vcmask 326656   ;;  %v4125_v21 = vcombine.high %v4101_v54, %v11824_v17  ;;  %v12437_v7 = vld [vmem:[#allocation32_spill] sm:$0xff] }
 0x543   :  { %6566 = vrot.lane.b32.xlu1 %v4058_v45, %s12417_s18  ;;  %v7423_v6 = vsel %vm12418_vm11, %v7422_v37, %v6339_v34  ;;  %6570 = vrot.lane.b32.xlu0 %v4049_v40, %s12420_s16  ;;  %s12423_s18 = smov 26   ;;  %vm12424_vm11 = vmmov %vm12422_vm10  ;;  %v7363_v60 = vsel %vm12425_vm9, %v7362_v4, %v10238_v59  ;;  %s12426_s16 = smov 28   ;;  %vm12428_vm10 = vcmask 343040   ;;  %v4129_v45 = vcombine.low %v12437_v7, %v12436_v52 }
 0x544   :  { %v7364_v42 = vsel %vm12428_vm10, %v7363_v60, %v10245_v41  ;;  %v4110_v34 = vcombine.high %v4076_v2, %v4092_v33  ;;  %v4117_v3 = vrot.slane %v4109_v16, %v8264_v56  ;;  %v4130_v60 = vcombine.high %v12437_v7, %v12436_v52  ;;  %v12457_v52 = vld [vmem:[#allocation34_spill] sm:$0xff] }
 0x545   :  { %v6343_v35 = vpop.permute.xlu1 %6342  ;;  %v6347_v27 = vpop.permute.xlu0 %6346  ;;  %v4137_v49 = vrot.slane %v4129_v45, %v7837_v5 }
 0x546   :  { %v7424_v19 = vsel %vm12421_vm8, %v7423_v6, %v6343_v35  ;;  %vm12427_vm8 = vmmov %vm12425_vm9  ;;  %vm12431_vm9 = vcmask 359424   ;;  %v4126_v6 = vcombine.high %v4108_v51, %v11824_v17  ;;  %v4127_v8 = vcombine.high %v4117_v3, %v11824_v17 }
 0x547   :  { %6574 = vrot.lane.b32.xlu1 %v4059_v23, %s12423_s18  ;;  %v7425_v53 = vsel %vm12424_vm11, %v7424_v19, %v6347_v27  ;;  %6578 = vrot.lane.b32.xlu0 %v4056_v9, %s12426_s16  ;;  %s12429_s18 = smov 30   ;;  %vm12430_vm11 = vmmov %vm12428_vm10  ;;  %v7365_v26 = vsel %vm12431_vm9, %v7364_v42, %v10249_v50  ;;  %s12432_s16 = smov 32   ;;  %vm12438_vm10 = vcmask 375808   ;;  %v4146_v9 = vcombine.high %v12434_v20, %v12433_v57  ;;  %v12453_v57 = vld [vmem:[#allocation183_spill] sm:$0xff]  ;;  %v12454_v20 = vld [vmem:[#allocation84_spill] sm:$0xff] }
 0x548   :  { %v7366_v50 = vsel %vm12438_vm10, %v7365_v26, %v10257_v30  ;;  %v4161_v19 = vcombine.low %v4137_v49, %v4153_v10  ;;  %v4124_v4 = vrot.slane %v4110_v34, %v8264_v56  ;;  %v4144_v42 = vrot.slane %v4130_v60, %v7837_v5 }
 0x549   :  { %v6351_v44 = vpop.permute.xlu1 %6350  ;;  %v6355_v14 = vpop.permute.xlu0 %6354  ;;  %v4213_v28 = vcombine.low %v12454_v20, %v12453_v57 }
 0x54a   :  { %v7426_v46 = vsel %vm12427_vm8, %v7425_v53, %v6351_v44  ;;  %vm12435_vm8 = vmmov %vm12431_vm9  ;;  %vm12440_vm9 = vcmask 392192   ;;  %v4160_v44 = vrot.slane %v4146_v9, %v7837_v5 }
 0x54b   :  { %6582 = vrot.lane.b32.xlu1 %v4060_v39, %s12429_s18  ;;  %v7427_v59 = vsel %vm12430_vm11, %v7426_v46, %v6355_v14  ;;  %6586 = vrot.lane.b32.xlu0 %v4101_v54, %s12432_s16  ;;  %vm12439_vm11 = vmmov %vm12438_vm10  ;;  %v7367_v37 = vsel %vm12440_vm9, %v7366_v50, %v10260_v24  ;;  %vm12442_vm10 = vcmask 408576   ;;  %v4162_v39 = vcombine.high %v4137_v49, %v4153_v10 }
 0x54c   :  { %v7368_v35 = vsel %vm12442_vm10, %v7367_v37, %v10267_v58  ;;  %v4128_v46 = vcombine.high %v4124_v4, %v11824_v17  ;;  %v4169_v14 = vrot.slane %v4161_v19, %v8264_v56  ;;  %v4177_v16 = vcombine.low %v4144_v42, %v4160_v44 }
 0x54d   :  { %v6359_v48 = vpop.permute.xlu1 %6358  ;;  %v6363_v47 = vpop.permute.xlu0 %6362  ;;  %v4221_v37 = vrot.slane %v4213_v28, %v7837_v5  ;;  %v4214_v49 = vcombine.high %v12454_v20, %v12453_v57  ;;  %v12477_v57 = vld [vmem:[#allocation36_spill] sm:$0xff] }
 0x54e   :  { %v7428_v41 = vsel %vm12435_vm8, %v7427_v59, %v6359_v48  ;;  %vm12441_vm8 = vmmov %vm12440_vm9  ;;  %vm12444_vm9 = vcmask 424960  }
 0x54f   :  { %6590 = vrot.lane.b32.xlu1 %v4125_v21, %s12320_s11  ;;  %v7429_v40 = vsel %vm12439_vm11, %v7428_v41, %v6363_v47  ;;  %6594 = vrot.lane.b32.xlu0 %v4108_v51, %s12321_s12  ;;  %vm12443_vm11 = vmmov %vm12442_vm10  ;;  %v7369_v23 = vsel %vm12444_vm9, %v7368_v35, %v10271_v36  ;;  %vm12446_vm10 = vcmask 441344   ;;  %v4193_v21 = vcombine.high %v4169_v14, %v11824_v17  ;;  %v12456_v47 = vld [vmem:[#allocation134_spill] sm:$0xff] }
 0x550   :  { %v7370_v36 = vsel %vm12446_vm10, %v7369_v23, %v10279_v38  ;;  %v4176_v51 = vrot.slane %v4162_v39, %v8264_v56  ;;  %v4197_v7 = vcombine.low %v12457_v52, %v12456_v47 }
 0x551   :  { %v6367_v43 = vpop.permute.xlu1 %6366  ;;  %v6371_v30 = vpop.permute.xlu0 %6370 }
 0x552   :  { %v7430_v29 = vsel %vm12441_vm8, %v7429_v40, %v6367_v43  ;;  %vm12445_vm8 = vmmov %vm12444_vm9  ;;  %vm12448_vm9 = vcmask 457728   ;;  %v4178_v40 = vcombine.high %v4144_v42, %v4160_v44  ;;  %v4194_v10 = vcombine.high %v4176_v51, %v11824_v17 }
 0x553   :  { %6598 = vrot.lane.b32.xlu1 %v4126_v6, %s12322_s15  ;;  %v7431_v24 = vsel %vm12443_vm11, %v7430_v29, %v6371_v30  ;;  %6602 = vrot.lane.b32.xlu0 %v4117_v3, %s12167_s7  ;;  %vm12447_vm11 = vmmov %vm12446_vm10  ;;  %v7371_v11 = vsel %vm12448_vm9, %v7370_v36, %v10282_v12  ;;  %vm12450_vm10 = vcmask 474112   ;;  %v4185_v43 = vrot.slane %v4177_v16, %v8264_v56  ;;  %v12476_v16 = vld [vmem:[#allocation136_spill] sm:$0xff] }
 0x554   :  { %v7372_v59 = vsel %vm12450_vm10, %v7371_v11, %v10289_v31  ;;  %v4205_v3 = vrot.slane %v4197_v7, %v7837_v5  ;;  %v4192_v9 = vrot.slane %v4178_v40, %v8264_v56  ;;  %v4265_v20 = vcombine.low %v12477_v57, %v12476_v16 }
 0x555   :  { %v6375_v27 = vpop.permute.xlu1 %6374  ;;  %v6379_v53 = vpop.permute.xlu0 %6378  ;;  %v4195_v23 = vcombine.high %v4185_v43, %v11824_v17 }
 0x556   :  { %v7432_v58 = vsel %vm12445_vm8, %v7431_v24, %v6375_v27  ;;  %vm12449_vm8 = vmmov %vm12448_vm9  ;;  %vm12452_vm9 = vcmask 490496   ;;  %v4229_v35 = vcombine.low %v4205_v3, %v4221_v37  ;;  %v4198_v27 = vcombine.high %v12457_v52, %v12456_v47 }
 0x557   :  { %6606 = vrot.lane.b32.xlu1 %v4127_v8, %s12170_s0  ;;  %v7433_v33 = vsel %vm12447_vm11, %v7432_v58, %v6379_v53  ;;  %6610 = vrot.lane.b32.xlu0 %v4124_v4, %s12052_s13  ;;  %vm12451_vm11 = vmmov %vm12450_vm10  ;;  %v7373_v26 = vsel %vm12452_vm9, %v7372_v59, %v10293_v63  ;;  %vm12458_vm10 = vcmask 506880   ;;  %v4228_v58 = vrot.slane %v4214_v49, %v7837_v5  ;;  %v12489_v49 = vld [vmem:[#allocation210_spill] sm:$0xff] }
 0x558   :  { %v7374_v63 = vsel %vm12458_vm10, %v7373_v26, %v10301_v0  ;;  %v4230_v53 = vcombine.high %v4205_v3, %v4221_v37  ;;  %v4196_v36 = vcombine.high %v4192_v9, %v11824_v17  ;;  %v4212_v44 = vrot.slane %v4198_v27, %v7837_v5  ;;  %v12486_v37 = vld [vmem:[#allocation209_spill] sm:$0xff] }
 0x559   :  { %v6383_v54 = vpop.permute.xlu1 %6382  ;;  %v6387_v38 = vpop.permute.xlu0 %6386 }
 0x55a   :  { %v7434_v2 = vsel %vm12449_vm8, %v7433_v33, %v6383_v54  ;;  %vm12455_vm8 = vmmov %vm12452_vm9  ;;  %vm12460_vm9 = vcmask 523264   ;;  %v4237_v33 = vrot.slane %v4229_v35, %v8264_v56 }
 0x55b   :  { %6614 = vrot.lane.b32.xlu1 %v4128_v46, %s12053_s9  ;;  %v7435_v12 = vsel %vm12451_vm11, %v7434_v2, %v6387_v38  ;;  %6618 = vrot.lane.b32.xlu0 %v4169_v14, %s12056_s8  ;;  %vm12459_vm11 = vmmov %vm12458_vm10  ;;  %v7375_v50 = vsel %vm12460_vm9, %v7374_v63, %v10304_v13  ;;  %vm12462_vm10 = vcmask 539648   ;;  %v4245_v46 = vcombine.low %v4212_v44, %v4228_v58  ;;  %v12473_v14 = vld [vmem:[#allocation185_spill] sm:$0xff]  ;;  %v12474_v2 = vld [vmem:[#allocation86_spill] sm:$0xff] }
 0x55c   :  { %v7376_v29 = vsel %vm12462_vm10, %v7375_v50, %v10311_v55  ;;  %v4281_v38 = vcombine.low %v12474_v2, %v12473_v14  ;;  %v4261_v59 = vcombine.high %v4237_v33, %v11824_v17  ;;  %v4273_v63 = vrot.slane %v4265_v20, %v7837_v5  ;;  %v12509_v20 = vld [vmem:[#allocation114_spill] sm:$0xff] }
 0x55d   :  { %v6391_v48 = vpop.permute.xlu1 %6390  ;;  %v6395_v41 = vpop.permute.xlu0 %6394  ;;  %v4253_v52 = vrot.slane %v4245_v46, %v8264_v56 }
 0x55e   :  { %v7436_v31 = vsel %vm12455_vm8, %v7435_v12, %v6391_v48  ;;  %vm12461_vm8 = vmmov %vm12460_vm9  ;;  %vm12464_vm9 = vcmask 556032   ;;  %v4244_v12 = vrot.slane %v4230_v53, %v8264_v56  ;;  %v12480_v48 = vld [vmem:[#allocation207_spill] sm:$0xff] }
 0x55f   :  { %6622 = vrot.lane.b32.xlu1 %v4193_v21, %s11972_s1  ;;  %v7437_v45 = vsel %vm12459_vm11, %v7436_v31, %v6395_v41  ;;  %6626 = vrot.lane.b32.xlu0 %v4176_v51, %s11973_s10  ;;  %vm12463_vm11 = vmmov %vm12462_vm10  ;;  %v7377_v30 = vsel %vm12464_vm9, %v7376_v29, %v10315_v61  ;;  %vm12466_vm10 = vcmask 572416   ;;  %v4246_v51 = vcombine.high %v4212_v44, %v4228_v58 }
 0x560   :  { %v7378_v61 = vsel %vm12466_vm10, %v7377_v30, %v10323_v1  ;;  %v4289_v31 = vrot.slane %v4281_v38, %v7837_v5  ;;  %v4262_v47 = vcombine.high %v4244_v12, %v11824_v17  ;;  %v4266_v30 = vcombine.high %v12477_v57, %v12476_v16 }
 0x561   :  { %v6399_v34 = vpop.permute.xlu1 %6398  ;;  %v6403_v0 = vpop.permute.xlu0 %6402  ;;  %v4260_v3 = vrot.slane %v4246_v51, %v8264_v56 }
 0x562   :  { %v7438_v6 = vsel %vm12461_vm8, %v7437_v45, %v6399_v34  ;;  %vm12465_vm8 = vmmov %vm12464_vm9  ;;  %vm12468_vm9 = vcmask 588800   ;;  %v12483_v45 = vld [vmem:[#allocation208_spill] sm:$0xff]  ;;  %v4280_v53 = vrot.slane %v4266_v30, %v7837_v5 }
 0x563   :  { %6630 = vrot.lane.b32.xlu1 %v4194_v10, %s11864_s4  ;;  %v7439_v13 = vsel %vm12463_vm11, %v7438_v6, %v6403_v0  ;;  %6634 = vrot.lane.b32.xlu0 %v4185_v43, %s11865_s5  ;;  %vm12467_vm11 = vmmov %vm12466_vm10  ;;  %v7379_v4 = vsel %vm12468_vm9, %v7378_v61, %v10326_v22  ;;  %vm12470_vm10 = vcmask 605184   ;;  %v4282_v10 = vcombine.high %v12474_v2, %v12473_v14 }
 0x564   :  { %v7380_v39 = vsel %vm12470_vm10, %v7379_v4, %v10333_v32  ;;  %v4297_v43 = vcombine.low %v4273_v63, %v4289_v31  ;;  %v4263_v0 = vcombine.high %v4253_v52, %v11824_v17  ;;  %v4264_v61 = vcombine.high %v4260_v3, %v11824_v17 }
 0x565   :  { %v6407_v24 = vpop.permute.xlu1 %6406  ;;  %v6411_v19 = vpop.permute.xlu0 %6410 }
 0x566   :  { %v7440_v55 = vsel %vm12465_vm8, %v7439_v13, %v6407_v24  ;;  %vm12469_vm8 = vmmov %vm12468_vm9  ;;  %vm12472_vm9 = vcmask 621568  }
 0x567   :  { %6638 = vrot.lane.b32.xlu1 %v4195_v23, %s11866_s6  ;;  %v7441_v8 = vsel %vm12467_vm11, %v7440_v55, %v6411_v19  ;;  %6642 = vrot.lane.b32.xlu0 %v4192_v9, %s11867_s3  ;;  %vm12471_vm11 = vmmov %vm12470_vm10  ;;  %v7381_v54 = vsel %vm12472_vm9, %v7380_v39, %v10337_v15  ;;  %vm12478_vm10 = vcmask 637952   ;;  %v12492_v23 = vld [vmem:[#allocation211_spill] sm:$0xff]  ;;  %v4296_v55 = vrot.slane %v4282_v10, %v7837_v5 }
 0x568   :  { %v7382_v15 = vsel %vm12478_vm10, %v7381_v54, %v10345_v18  ;;  %v4298_v19 = vcombine.high %v4273_v63, %v4289_v31  ;;  %v12501_v39 = vld [vmem:[#allocation187_spill] sm:$0xff] }
 0x569   :  { %v6415_v60 = vpop.permute.xlu1 %6414  ;;  %v6419_v1 = vpop.permute.xlu0 %6418  ;;  %v4313_v44 = vcombine.low %v4280_v53, %v4296_v55 }
 0x56a   :  { %v7442_v11 = vsel %vm12469_vm8, %v7441_v8, %v6415_v60  ;;  %vm12475_vm8 = vmmov %vm12472_vm9  ;;  %vm12481_vm9 = vcmask 654336   ;;  %v4305_v8 = vrot.slane %v4297_v43, %v8264_v56  ;;  %v12495_v60 = vld [vmem:[#allocation164_spill] sm:$0xff]  ;;  %v4312_v2 = vrot.slane %v4298_v19, %v8264_v56 }
 0x56b   :  { %6646 = vrot.lane.b32.xlu1 %v4196_v36, %s11868_s2  ;;  %v7443_v22 = vsel %vm12471_vm11, %v7442_v11, %v6419_v1  ;;  %6650 = vrot.lane.b32.xlu0 %v4237_v33, %s11869_s30  ;;  %vm12479_vm11 = vmmov %vm12478_vm10  ;;  %v7383_v21 = vsel %vm12481_vm9, %v7382_v15, %v12480_v48  ;;  %vm12484_vm10 = vcmask 670720   ;;  %v12499_v11 = vld [vmem:[#allocation64_spill] sm:$0xff]  ;;  %v4321_v31 = vrot.slane %v4313_v44, %v8264_v56 }
 0x56c   :  { %v7384_v50 = vsel %vm12484_vm10, %v7383_v21, %v12483_v45  ;;  %v4329_v14 = vcombine.high %v4305_v8, %v11824_v17  ;;  %v4330_v51 = vcombine.high %v4312_v2, %v11824_v17  ;;  %v12515_v45 = vld [vmem:[#allocation123_spill] sm:$0xff] }
 0x56d   :  { %v6423_v42 = vpop.permute.xlu1 %6422  ;;  %v6427_v26 = vpop.permute.xlu0 %6426  ;;  %v4331_v10 = vcombine.high %v4321_v31, %v11824_v17 }
 0x56e   :  { %v7444_v32 = vsel %vm12475_vm8, %v7443_v22, %v6423_v42  ;;  %vm12482_vm8 = vmmov %vm12481_vm9  ;;  %vm12487_vm9 = vcmask 687104   ;;  %v12502_v22 = vld [vmem:[#allocation88_spill] sm:$0xff] }
 0x56f   :  { %6654 = vrot.lane.b32.xlu1 %v4261_v59, %s11870_s29  ;;  %v7445_v28 = vsel %vm12479_vm11, %v7444_v32, %v6427_v26  ;;  %6658 = vrot.lane.b32.xlu0 %v4244_v12, %s11872_s28  ;;  %vm12485_vm11 = vmmov %vm12484_vm10  ;;  %v7385_v34 = vsel %vm12487_vm9, %v7384_v50, %v12486_v37  ;;  %vm12490_vm10 = vcmask 703488   ;;  %v4349_v54 = vcombine.low %v12502_v22, %v12501_v39  ;;  %v12504_v59 = vld [vmem:[#allocation138_spill] sm:$0xff]  ;;  %v12506_v26 = vld [vmem:[#allocation73_spill] sm:$0xff] }
 0x570   :  { %v7386_v35 = vsel %vm12490_vm10, %v7385_v34, %v12489_v49  ;;  %v12505_v12 = vld [vmem:[#allocation38_spill] sm:$0xff]  ;;  %v12521_v49 = vld [vmem:[#allocation212_spill] sm:$0xff] }
 0x571   :  { %v6431_v41 = vpop.permute.xlu1 %6430  ;;  %v6435_v18 = vpop.permute.xlu0 %6434  ;;  %v4333_v32 = vcombine.low %v12505_v12, %v12504_v59  ;;  %v4357_v48 = vrot.slane %v4349_v54, %v7837_v5 }
 0x572   :  { %v7446_v7 = vsel %vm12482_vm8, %v7445_v28, %v6431_v41  ;;  %vm12488_vm8 = vmmov %vm12487_vm9  ;;  %vm12493_vm9 = vcmask 719872   ;;  %v4314_v28 = vcombine.high %v4280_v53, %v4296_v55 }
 0x573   :  { %6662 = vrot.lane.b32.xlu1 %v4262_v47, %s11873_s27  ;;  %v7447_v40 = vsel %vm12485_vm11, %v7446_v7, %v6435_v18  ;;  %6666 = vrot.lane.b32.xlu0 %v4253_v52, %s11876_s26  ;;  %vm12491_vm11 = vmmov %vm12490_vm10  ;;  %v7387_v9 = vsel %vm12493_vm9, %v7386_v35, %v12492_v23  ;;  %vm12496_vm10 = vcmask 736256   ;;  %v4341_v52 = vrot.slane %v4333_v32, %v7837_v5  ;;  %v12512_v7 = vld [vmem:[#allocation39_spill] sm:$0xff] }
 0x574   :  { %v7388_v36 = vsel %vm12496_vm10, %v7387_v9, %v12495_v60  ;;  %v4328_v43 = vrot.slane %v4314_v28, %v8264_v56  ;;  %v12529_v60 = vld [vmem:[#allocation214_spill] sm:$0xff] }
 0x575   :  { %v6439_v6 = vpop.permute.xlu1 %6438  ;;  %v6443_v13 = vpop.permute.xlu0 %6442  ;;  %v4365_v37 = vcombine.low %v4341_v52, %v4357_v48  ;;  %v4366_v23 = vcombine.high %v4341_v52, %v4357_v48 }
 0x576   :  { %v7448_v29 = vsel %vm12488_vm8, %v7447_v40, %v6439_v6  ;;  %vm12494_vm8 = vmmov %vm12493_vm9  ;;  %vm12500_vm9 = vcmask 752640   ;;  %v4350_v40 = vcombine.high %v12502_v22, %v12501_v39  ;;  %v4332_v55 = vcombine.high %v4328_v43, %v11824_v17 }
 0x577   :  { %6670 = vrot.lane.b32.xlu1 %v4263_v0, %s11877_s25  ;;  %v7449_v24 = vsel %vm12491_vm11, %v7448_v29, %v6443_v13  ;;  %6674 = vrot.lane.b32.xlu0 %v4260_v3, %s11879_s24  ;;  %s12497_s25 = smov 78   ;;  %vm12498_vm11 = vmmov %vm12496_vm10  ;;  %v7389_v1 = vsel %vm12500_vm9, %v7388_v36, %v12499_v11  ;;  %vm12507_vm10 = vcmask 769024   ;;  %v4334_v3 = vcombine.high %v12505_v12, %v12504_v59  ;;  %v12518_v29 = vld [vmem:[#allocation23_spill] sm:$0xff]  ;;  %v12532_v11 = vld [vmem:[#allocation189_spill] sm:$0xff] }
 0x578   :  { %v7390_v16 = vsel %vm12507_vm10, %v7389_v1, %v12506_v26  ;;  %v4373_v19 = vrot.slane %v4365_v37, %v8264_v56  ;;  %v12533_v1 = vld [vmem:[#allocation90_spill] sm:$0xff]  ;;  %v4380_v54 = vrot.slane %v4366_v23, %v8264_v56  ;;  %v12537_v59 = vld [vmem:[#allocation215_spill] sm:$0xff]  ;;  %v12541_v26 = vld [vmem:[#allocation165_spill] sm:$0xff] }
 0x579   :  { %v6447_v27 = vpop.permute.xlu1 %6446  ;;  %v6451_v58 = vpop.permute.xlu0 %6450  ;;  %v4417_v44 = vcombine.low %v12533_v1, %v12532_v11 }
 0x57a   :  { %v7450_v4 = vsel %vm12494_vm8, %v7449_v24, %v6447_v27  ;;  %vm12503_vm8 = vmmov %vm12500_vm9  ;;  %vm12510_vm9 = vcmask 785408   ;;  %v4364_v24 = vrot.slane %v4350_v40, %v7837_v5  ;;  %v4397_v22 = vcombine.high %v4373_v19, %v11824_v17 }
 0x57b   :  { %6678 = vrot.lane.b32.xlu1 %v4264_v61, %s12497_s25  ;;  %v7451_v33 = vsel %vm12498_vm11, %v7450_v4, %v6451_v58  ;;  %6682 = vrot.lane.b32.xlu0 %v4305_v8, %s11884_s22  ;;  %vm12508_vm11 = vmmov %vm12507_vm10  ;;  %v7391_v15 = vsel %vm12510_vm9, %v7390_v16, %v12509_v20  ;;  %vm12513_vm10 = vcmask 801792   ;;  %v4348_v8 = vrot.slane %v4334_v3, %v7837_v5  ;;  %v12525_v4 = vld [vmem:[#allocation213_spill] sm:$0xff] }
 0x57c   :  { %v7392_v18 = vsel %vm12513_vm10, %v7391_v15, %v12512_v7  ;;  %v4425_v20 = vrot.slane %v4417_v44, %v7837_v5  ;;  %v4398_v28 = vcombine.high %v4380_v54, %v11824_v17  ;;  %v12549_v7 = vld [vmem:[#allocation75_spill] sm:$0xff] }
 0x57d   :  { %v6455_v46 = vpop.permute.xlu1 %6454  ;;  %v6459_v42 = vpop.permute.xlu0 %6458 }
 0x57e   :  { %v7452_v38 = vsel %vm12503_vm8, %v7451_v33, %v6455_v46  ;;  %vm12511_vm8 = vmmov %vm12510_vm9  ;;  %vm12516_vm9 = vcmask 818176   ;;  %v4381_v33 = vcombine.low %v4348_v8, %v4364_v24 }
 0x57f   :  { %6686 = vrot.lane.b32.xlu1 %v4329_v14, %s11887_s21  ;;  %v7453_v57 = vsel %vm12508_vm11, %v7452_v38, %v6459_v42  ;;  %6690 = vrot.lane.b32.xlu0 %v4312_v2, %s12344_s23  ;;  %vm12514_vm11 = vmmov %vm12513_vm10  ;;  %v7393_v50 = vsel %vm12516_vm9, %v7392_v18, %v12515_v45  ;;  %vm12519_vm10 = vcmask 834560   ;;  %v12535_v2 = vld [vmem:[#allocation140_spill] sm:$0xff] }
 0x580   :  { %v7394_v13 = vsel %vm12519_vm10, %v7393_v50, %v12518_v29  ;;  %v12536_v38 = vld [vmem:[#allocation40_spill] sm:$0xff]  ;;  %v4389_v48 = vrot.slane %v4381_v33, %v8264_v56  ;;  %v12557_v29 = vld [vmem:[#allocation41_spill] sm:$0xff] }
 0x581   :  { %v6463_v21 = vpop.permute.xlu1 %6462  ;;  %v6467_v47 = vpop.permute.xlu0 %6466  ;;  %v4401_v42 = vcombine.low %v12536_v38, %v12535_v2 }
 0x582   :  { %v7454_v41 = vsel %vm12511_vm8, %v7453_v57, %v6463_v21  ;;  %vm12517_vm8 = vmmov %vm12516_vm9  ;;  %vm12522_vm9 = vcmask 850944   ;;  %v4382_v57 = vcombine.high %v4348_v8, %v4364_v24  ;;  %v4399_v40 = vcombine.high %v4389_v48, %v11824_v17 }
 0x583   :  { %6694 = vrot.lane.b32.xlu1 %v4330_v51, %s11890_s19  ;;  %v7455_v63 = vsel %vm12514_vm11, %v7454_v41, %v6467_v47  ;;  %6698 = vrot.lane.b32.xlu0 %v4321_v31, %s12240_s20  ;;  %vm12520_vm11 = vmmov %vm12519_vm10  ;;  %v7395_v35 = vsel %vm12522_vm9, %v7394_v13, %v12521_v49  ;;  %s12523_s20 = smov 92   ;;  %vm12526_vm10 = vcmask 867328   ;;  %v4409_v31 = vrot.slane %v4401_v42, %v7837_v5  ;;  %v12545_v41 = vld [vmem:[#allocation65_spill] sm:$0xff] }
 0x584   :  { %v7396_v58 = vsel %vm12526_vm10, %v7395_v35, %v12525_v4  ;;  %v4396_v37 = vrot.slane %v4382_v57, %v8264_v56  ;;  %v12561_v4 = vld [vmem:[#allocation125_spill] sm:$0xff] }
 0x585   :  { %v6471_v34 = vpop.permute.xlu1 %6470  ;;  %v6475_v0 = vpop.permute.xlu0 %6474  ;;  %v4433_v45 = vcombine.low %v4409_v31, %v4425_v20  ;;  %v4434_v49 = vcombine.high %v4409_v31, %v4425_v20 }
 0x586   :  { %v7456_v6 = vsel %vm12517_vm8, %v7455_v63, %v6471_v34  ;;  %vm12524_vm8 = vmmov %vm12522_vm9  ;;  %vm12530_vm9 = vcmask 883712   ;;  %v4418_v63 = vcombine.high %v12533_v1, %v12532_v11  ;;  %v4400_v24 = vcombine.high %v4396_v37, %v11824_v17  ;;  %v12565_v11 = vld [vmem:[#allocation25_spill] sm:$0xff] }
 0x587   :  { %6702 = vrot.lane.b32.xlu1 %v4331_v10, %s11894_s17  ;;  %v7457_v30 = vsel %vm12520_vm11, %v7456_v6, %v6475_v0  ;;  %6706 = vrot.lane.b32.xlu0 %v4328_v43, %s12523_s20  ;;  %s12527_s17 = smov 94   ;;  %vm12528_vm11 = vmmov %vm12526_vm10  ;;  %v7397_v36 = vsel %vm12530_vm9, %v7396_v58, %v12529_v60  ;;  %s12531_s20 = smov 96   ;;  %vm12538_vm10 = vcmask 900096   ;;  %v4402_v43 = vcombine.high %v12536_v38, %v12535_v2  ;;  %v12553_v6 = vld [vmem:[#allocation115_spill] sm:$0xff]  ;;  %v12563_v60 = vld [vmem:[#allocation142_spill] sm:$0xff] }
 0x588   :  { %v7398_v12 = vsel %vm12538_vm10, %v7397_v36, %v12537_v59  ;;  %v4441_v23 = vrot.slane %v4433_v45, %v8264_v56  ;;  %v12564_v36 = vld [vmem:[#allocation42_spill] sm:$0xff] }
 0x589   :  { %v6479_v9 = vpop.permute.xlu1 %6478  ;;  %v6483_v61 = vpop.permute.xlu0 %6482  ;;  %v4416_v8 = vrot.slane %v4402_v43, %v7837_v5  ;;  %v4469_v33 = vcombine.low %v12564_v36, %v12563_v60 }
 0x58a   :  { %v7458_v27 = vsel %vm12524_vm8, %v7457_v30, %v6479_v9  ;;  %vm12534_vm8 = vmmov %vm12530_vm9  ;;  %vm12542_vm9 = vcmask 916480   ;;  %v4432_v30 = vrot.slane %v4418_v63, %v7837_v5  ;;  %v12559_v9 = vld [vmem:[#allocation190_spill] sm:$0xff] }
 0x58b   :  { %6710 = vrot.lane.b32.xlu1 %v4332_v55, %s12527_s17  ;;  %v7459_v53 = vsel %vm12528_vm11, %v7458_v27, %v6483_v61  ;;  %6714 = vrot.lane.b32.xlu0 %v4373_v19, %s12531_s20  ;;  %s12539_s17 = smov 98   ;;  %vm12540_vm11 = vmmov %vm12538_vm10  ;;  %v7399_v16 = vsel %vm12542_vm9, %v7398_v12, %v12541_v26  ;;  %s12543_s20 = smov 100   ;;  %vm12546_vm10 = vcmask 932864   ;;  %v12560_v55 = vld [vmem:[#allocation92_spill] sm:$0xff]  ;;  %v4477_v59 = vrot.slane %v4469_v33, %v7837_v5 }
 0x58c   :  { %v7400_v47 = vsel %vm12546_vm10, %v7399_v16, %v12545_v41  ;;  %v4485_v19 = vcombine.low %v12560_v55, %v12559_v9  ;;  %v4449_v44 = vcombine.low %v4416_v8, %v4432_v30  ;;  %v4486_v20 = vcombine.high %v12560_v55, %v12559_v9 }
 0x58d   :  { %v6487_v39 = vpop.permute.xlu1 %6486  ;;  %v6491_v14 = vpop.permute.xlu0 %6490 }
 0x58e   :  { %v7460_v46 = vsel %vm12534_vm8, %v7459_v53, %v6487_v39  ;;  %vm12544_vm8 = vmmov %vm12542_vm9  ;;  %vm12550_vm9 = vcmask 949248   ;;  %v4457_v57 = vrot.slane %v4449_v44, %v8264_v56 }
 0x58f   :  { %6718 = vrot.lane.b32.xlu1 %v4397_v22, %s12539_s17  ;;  %v7461_v32 = vsel %vm12540_vm11, %v7460_v46, %v6491_v14  ;;  %6722 = vrot.lane.b32.xlu0 %v4380_v54, %s12543_s20  ;;  %s12547_s17 = smov 102   ;;  %vm12548_vm11 = vmmov %vm12546_vm10  ;;  %v7401_v18 = vsel %vm12550_vm9, %v7400_v47, %v12549_v7  ;;  %s12551_s20 = smov 104   ;;  %vm12554_vm10 = vcmask 965632   ;;  %v4465_v22 = vcombine.high %v4441_v23, %v11824_v17 }
 0x590   :  { %v7402_v0 = vsel %vm12554_vm10, %v7401_v18, %v12553_v6  ;;  %v4448_v54 = vrot.slane %v4434_v49, %v8264_v56  ;;  %v4493_v46 = vrot.slane %v4485_v19, %v7837_v5  ;;  %v4467_v31 = vcombine.high %v4457_v57, %v11824_v17  ;;  %v12576_v49 = vld [vmem:[#allocation44_spill] sm:$0xff] }
 0x591   :  { %v6495_v15 = vpop.permute.xlu1 %6494  ;;  %v6499_v51 = vpop.permute.xlu0 %6498  ;;  %v7403_v13 = vsel %vm7147_vm15, %v7402_v0, %v12557_v29  ;;  %v4500_v47 = vrot.slane %v4486_v20, %v7837_v5 }
 0x592   :  { %v7462_v21 = vsel %vm12544_vm8, %v7461_v32, %v6495_v15  ;;  %vm12552_vm8 = vmmov %vm12550_vm9  ;;  %v7404_v58 = vsel %vm7149_vm12, %v7403_v13, %v12561_v4  ;;  %v4450_v32 = vcombine.high %v4416_v8, %v4432_v30  ;;  %v4466_v16 = vcombine.high %v4448_v54, %v11824_v17  ;;  %v12575_v30 = vld [vmem:[#allocation144_spill] sm:$0xff] }
 0x593   :  { %6726 = vrot.lane.b32.xlu1 %v4398_v28, %s12547_s17  ;;  %v7463_v52 = vsel %vm12548_vm11, %v7462_v21, %v6499_v51  ;;  %6730 = vrot.lane.b32.xlu0 %v4389_v48, %s12551_s20  ;;  %s12555_s17 = smov 106   ;;  %vm12556_vm11 = vmmov %vm12554_vm10  ;;  %s12558_s20 = smov 108   ;;  %v7405_v1 = vsel %vm7151_vm13, %v7404_v58, %v12565_v11  ;;  %v4501_v15 = vcombine.low %v4477_v59, %v4493_v46  ;;  %vm12580_vm9 = vcmask 146432  }
 0x594   :  { %v7406_v38 = vsel %vm7153_vm14, %v7405_v1, %v10478_v62  ;;  %v4470_v21 = vcombine.high %v12564_v36, %v12563_v60  ;;  %v4464_v41 = vrot.slane %v4450_v32, %v8264_v56  ;;  %vm12584_vm10 = vcmask 179200   ;;  %v12588_v32 = vld [vmem:[#allocation194_spill] sm:$0xff] }
 0x595   :  { %v6503_v50 = vpop.permute.xlu1 %6502  ;;  %v6507_v10 = vpop.permute.xlu0 %6506  ;;  %v10915_v18 = vrot.slane %v4501_v15, %v8264_v56 }
 0x596   :  { %v7464_v34 = vsel %vm12552_vm8, %v7463_v52, %v6503_v50  ;;  %v4502_v52 = vcombine.high %v4477_v59, %v4493_v46  ;;  %v4484_v45 = vrot.slane %v4470_v21, %v7837_v5  ;;  %v12572_v50 = vld [vmem:[#allocation192_spill] sm:$0xff]  ;;  %vm12582_vm8 = vcmask 162816  }
 0x597   :  { %6734 = vrot.lane.b32.xlu1 %v4399_v40, %s12555_s17  ;;  %v7465_v3 = vsel %vm12556_vm11, %v7464_v34, %v6507_v10  ;;  %6738 = vrot.lane.b32.xlu0 %v4396_v37, %s12558_s20  ;;  %s12562_s20 = smov 110   ;;  %v12573_v40 = vld [vmem:[#allocation94_spill] sm:$0xff]  ;;  %v4468_v10 = vcombine.high %v4464_v41, %v11824_v17  ;;  %s12578_s17 = smov 4   ;;  %vm12586_vm11 = vcmask 195584  }
 0x598   :  { %v4553_v37 = vcombine.low %v12573_v40, %v12572_v50  ;;  %v4517_v43 = vcombine.low %v4484_v45, %v4500_v47  ;;  %v4516_v29 = vrot.slane %v4502_v52, %v8264_v56  ;;  %v4518_v9 = vcombine.high %v4484_v45, %v4500_v47 }
 0x599   :  { %v6511_v35 = vpop.permute.xlu1 %6510  ;;  %v6515_v61 = vpop.permute.xlu0 %6514  ;;  %v4554_v58 = vcombine.high %v12573_v40, %v12572_v50 }
 0x59a   :  { %v7466_v27 = vsel %vm7147_vm15, %v7465_v3, %v6511_v35  ;;  %v4533_v3 = vcombine.high %v10915_v18, %v11824_v17  ;;  %v4537_v35 = vcombine.low %v12576_v49, %v12575_v30  ;;  %v4532_v1 = vrot.slane %v4518_v9, %v8264_v56 }
 0x59b   :  { %6742 = vrot.lane.b32.xlu1 %v4400_v24, %s12562_s20  ;;  %v7467_v53 = vsel %vm7149_vm12, %v7466_v27, %v6515_v61  ;;  %6746 = vrot.lane.b32.xlu0 %v4441_v23, %s12374_s14  ;;  %s12566_s20 = smov 114   ;;  %s12567_s14 = smov 116   ;;  %v4561_v24 = vrot.slane %v4553_v37, %v7837_v5  ;;  %v4534_v27 = vcombine.high %v4516_v29, %v11824_v17 }
 0x59c   :  { %v4525_v61 = vrot.slane %v4517_v43, %v8264_v56  ;;  %v4545_v4 = vrot.slane %v4537_v35, %v7837_v5 }
 0x59d   :  { %v6519_v39 = vpop.permute.xlu1 %6518  ;;  %v6523_v2 = vpop.permute.xlu0 %6522 }
 0x59e   :  { %v7468_v14 = vsel %vm7151_vm13, %v7467_v53, %v6519_v39  ;;  %v4569_v60 = vcombine.low %v4545_v4, %v4561_v24  ;;  %v4535_v11 = vcombine.high %v4525_v61, %v11824_v17  ;;  %v4538_v39 = vcombine.high %v12576_v49, %v12575_v30 }
 0x59f   :  { %6750 = vrot.lane.b32.xlu1 %v4465_v22, %s12566_s20  ;;  %v7469_v42 = vsel %vm7153_vm14, %v7468_v14, %v6523_v2  ;;  %6754 = vrot.lane.b32.xlu0 %v4448_v54, %s12567_s14  ;;  %s12568_s20 = smov 118   ;;  %s12569_s14 = smov 120   ;;  %v4568_v22 = vrot.slane %v4554_v58, %v7837_v5  ;;  %v4570_v46 = vcombine.high %v4545_v4, %v4561_v24  ;;  %v12607_v58 = vld [vmem:[#allocation195_spill] sm:$0xff] }
 0x5a0   :  { %v7606_v12 = vcombine.low %v7406_v38, %v7469_v42  ;;  %v4536_v38 = vcombine.high %v4532_v1, %v11824_v17  ;;  %v4577_v42 = vrot.slane %v4569_v60, %v8264_v56 }
 0x5a1   :  { %v6527_v26 = vpop.permute.xlu1 %6526  ;;  %v6531_v28 = vpop.permute.xlu0 %6530 }
 0x5a2   :  { %7614 = vst [vmem:[#allocation5 + $0x10] sm:$0xff] %v7606_v12  ;;  %v7470_v62 = vsel %vm7029_vm0, %v10508_v25, %v6527_v26  ;;  %v4552_v12 = vrot.slane %v4538_v39, %v7837_v5  ;;  %v12589_v26 = vld [vmem:[#allocation96_spill] sm:$0xff] }
 0x5a3   :  { %6758 = vrot.lane.b32.xlu1 %v4466_v16, %s12568_s20  ;;  %v7471_v48 = vsel %vm7031_vm1, %v7470_v62, %v6531_v28  ;;  %6762 = vrot.lane.b32.xlu0 %v4457_v57, %s12569_s14  ;;  %s12570_s20 = smov 122   ;;  %s12571_s14 = smov 124   ;;  %v4621_v16 = vcombine.low %v12589_v26, %v12588_v32  ;;  %v4601_v28 = vcombine.high %v4577_v42, %v11824_v17  ;;  %v12611_v39 = vld [vmem:[#allocation148_spill] sm:$0xff] }
 0x5a4   :  { %v4585_v20 = vcombine.low %v4552_v12, %v4568_v22  ;;  %v4586_v47 = vcombine.high %v4552_v12, %v4568_v22  ;;  %v12612_v22 = vld [vmem:[#allocation48_spill] sm:$0xff] }
 0x5a5   :  { %v6535_v51 = vpop.permute.xlu1 %6534  ;;  %v6539_v7 = vpop.permute.xlu0 %6538 }
 0x5a6   :  { %v7472_v25 = vsel %vm7033_vm2, %v7471_v48, %v6535_v51  ;;  %v4584_v48 = vrot.slane %v4570_v46, %v8264_v56  ;;  %v12593_v51 = vld [vmem:[#allocation146_spill] sm:$0xff]  ;;  %v4593_v50 = vrot.slane %v4585_v20, %v8264_v56 }
 0x5a7   :  { %6766 = vrot.lane.b32.xlu1 %v4467_v31, %s12570_s20  ;;  %v7473_v63 = vsel %vm7035_vm3, %v7472_v25, %v6539_v7  ;;  %6770 = vrot.lane.b32.xlu0 %v4464_v41, %s12571_s14  ;;  %s12574_s20 = smov 126   ;;  %s12577_s14 = smov 2   ;;  %v12594_v31 = vld [vmem:[#allocation46_spill] sm:$0xff]  ;;  %v4629_v25 = vrot.slane %v4621_v16, %v7837_v5 }
 0x5a8   :  { %v4605_v41 = vcombine.low %v12594_v31, %v12593_v51  ;;  %v4602_v45 = vcombine.high %v4584_v48, %v11824_v17 }
 0x5a9   :  { %v6543_v34 = vpop.permute.xlu1 %6542  ;;  %v6547_v0 = vpop.permute.xlu0 %6546 }
 0x5aa   :  { %v7474_v6 = vsel %vm7037_vm4, %v7473_v63, %v6543_v34  ;;  %v4613_v37 = vrot.slane %v4605_v41, %v7837_v5  ;;  %v4622_v34 = vcombine.high %v12589_v26, %v12588_v32 }
 0x5ab   :  { %6774 = vrot.lane.b32.xlu1 %v4468_v10, %s12574_s20  ;;  %v7475_v13 = vsel %vm7039_vm5, %v7474_v6, %v6547_v0  ;;  %6778 = vrot.lane.b32.xlu0 %v4533_v3, %s12577_s14  ;;  %s12579_s20 = smov 6   ;;  %s12581_s14 = smov 8   ;;  %v4603_v3 = vcombine.high %v4593_v50, %v11824_v17 }
 0x5ac   :  { %v4637_v43 = vcombine.low %v4613_v37, %v4629_v25  ;;  %v4636_v49 = vrot.slane %v4622_v34, %v7837_v5  ;;  %v4638_v24 = vcombine.high %v4613_v37, %v4629_v25  ;;  %v12620_v37 = vld [vmem:[#allocation100_spill] sm:$0xff] }
 0x5ad   :  { %v6551_v23 = vpop.permute.xlu1 %6550  ;;  %v6555_v19 = vpop.permute.xlu0 %6554 }
 0x5ae   :  { %v7476_v55 = vsel %vm7041_vm6, %v7475_v13, %v6551_v23  ;;  %v4606_v13 = vcombine.high %v12594_v31, %v12593_v51  ;;  %v4674_v51 = vcombine.high %v12612_v22, %v12611_v39 }
 0x5af   :  { %6782 = vrot.lane.b32.xlu1 %v4516_v29, %s12578_s17  ;;  %v7477_v8 = vsel %vm7043_vm7, %v7476_v55, %v6555_v19  ;;  %6786 = vrot.lane.b32.xlu0 %v4534_v27, %s12579_s20  ;;  %s12583_s17 = smov 10   ;;  %s12585_s20 = smov 12   ;;  %v4600_v29 = vrot.slane %v4586_v47, %v8264_v56  ;;  %v4645_v19 = vrot.slane %v4637_v43, %v8264_v56 }
 0x5b0   :  { %v4620_v27 = vrot.slane %v4606_v13, %v7837_v5 }
 0x5b1   :  { %v6559_v53 = vpop.permute.xlu1 %6558  ;;  %v6563_v33 = vpop.permute.xlu0 %6562  ;;  %v4604_v55 = vcombine.high %v4600_v29, %v11824_v17 }
 0x5b2   :  { %v7478_v36 = vsel %vm12580_vm9, %v7477_v8, %v6559_v53  ;;  %vm12590_vm9 = vcmask 211968   ;;  %v4653_v8 = vcombine.low %v4620_v27, %v4636_v49  ;;  %v12608_v53 = vld [vmem:[#allocation98_spill] sm:$0xff]  ;;  %v4654_v46 = vcombine.high %v4620_v27, %v4636_v49 }
 0x5b3   :  { %6790 = vrot.lane.b32.xlu1 %v4525_v61, %s12581_s14  ;;  %v7479_v44 = vsel %vm12582_vm8, %v7478_v36, %v6563_v33  ;;  %6794 = vrot.lane.b32.xlu0 %v4535_v11, %s12583_s17  ;;  %s12587_s14 = smov 14   ;;  %s12591_s17 = smov 16   ;;  %vm12592_vm8 = vcmask 228352   ;;  %v4689_v60 = vcombine.low %v12608_v53, %v12607_v58  ;;  %v4669_v11 = vcombine.high %v4645_v19, %v11824_v17  ;;  %v12624_v49 = vld [vmem:[#allocation50_spill] sm:$0xff] }
 0x5b4   :  { %v4661_v12 = vrot.slane %v4653_v8, %v8264_v56  ;;  %v4690_v16 = vcombine.high %v12608_v53, %v12607_v58 }
 0x5b5   :  { %v6567_v54 = vpop.permute.xlu1 %6566  ;;  %v6571_v2 = vpop.permute.xlu0 %6570 }
 0x5b6   :  { %v7480_v14 = vsel %vm12584_vm10, %v7479_v44, %v6567_v54  ;;  %vm12596_vm10 = vcmask 244736   ;;  %v4673_v54 = vcombine.low %v12612_v22, %v12611_v39  ;;  %v4704_v31 = vrot.slane %v4690_v16, %v7837_v5  ;;  %v12631_v16 = vld [vmem:[#allocation199_spill] sm:$0xff] }
 0x5b7   :  { %6798 = vrot.lane.b32.xlu1 %v4532_v1, %s12585_s20  ;;  %v7481_v59 = vsel %vm12586_vm11, %v7480_v14, %v6571_v2  ;;  %6802 = vrot.lane.b32.xlu0 %v4536_v38, %s12587_s14  ;;  %s12595_s20 = smov 18   ;;  %s12597_s14 = smov 20   ;;  %vm12598_vm11 = vcmask 261120   ;;  %v4652_v1 = vrot.slane %v4638_v24, %v8264_v56  ;;  %v4697_v2 = vrot.slane %v4689_v60, %v7837_v5 }
 0x5b8   :  { %v4681_v26 = vrot.slane %v4673_v54, %v7837_v5 }
 0x5b9   :  { %v6575_v57 = vpop.permute.xlu1 %6574  ;;  %v6579_v62 = vpop.permute.xlu0 %6578 }
 0x5ba   :  { %v7482_v15 = vsel %vm12590_vm9, %v7481_v59, %v6575_v57  ;;  %vm12600_vm9 = vcmask 277504   ;;  %v4670_v59 = vcombine.high %v4652_v1, %v11824_v17  ;;  %v4705_v20 = vcombine.low %v4681_v26, %v4697_v2 }
 0x5bb   :  { %6806 = vrot.lane.b32.xlu1 %v4577_v42, %s12591_s17  ;;  %v7483_v21 = vsel %vm12592_vm8, %v7482_v15, %v6579_v62  ;;  %6810 = vrot.lane.b32.xlu0 %v4601_v28, %s12595_s20  ;;  %s12599_s17 = smov 22   ;;  %s12601_s20 = smov 24   ;;  %vm12602_vm8 = vcmask 293888   ;;  %v4671_v28 = vcombine.high %v4661_v12, %v11824_v17  ;;  %v4706_v47 = vcombine.high %v4681_v26, %v4697_v2 }
 0x5bd   :  { %v6583_v52 = vpop.permute.xlu1 %6582  ;;  %v6587_v63 = vpop.permute.xlu0 %6586 }
 0x5be   :  { %v7484_v7 = vsel %vm12596_vm10, %v7483_v21, %v6583_v52  ;;  %vm12604_vm10 = vcmask 310272  }
 0x5bf   :  { %6814 = vrot.lane.b32.xlu1 %v4584_v48, %s12597_s14  ;;  %v7485_v40 = vsel %vm12598_vm11, %v7484_v7, %v6587_v63  ;;  %6818 = vrot.lane.b32.xlu0 %v4602_v45, %s12599_s17  ;;  %s12603_s14 = smov 26   ;;  %s12605_s17 = smov 28   ;;  %vm12606_vm11 = vcmask 326656   ;;  %v4668_v48 = vrot.slane %v4654_v46, %v8264_v56  ;;  %v4713_v63 = vrot.slane %v4705_v20, %v8264_v56 }
 0x5c1   :  { %v6591_v10 = vpop.permute.xlu1 %6590  ;;  %v6595_v0 = vpop.permute.xlu0 %6594  ;;  %v4672_v7 = vcombine.high %v4668_v48, %v11824_v17 }
 0x5c2   :  { %v7486_v6 = vsel %vm12600_vm9, %v7485_v40, %v6591_v10  ;;  %vm12609_vm9 = vcmask 343040   ;;  %v12619_v40 = vld [vmem:[#allocation197_spill] sm:$0xff] }
 0x5c3   :  { %6822 = vrot.lane.b32.xlu1 %v4593_v50, %s12601_s20  ;;  %v7487_v30 = vsel %vm12602_vm8, %v7486_v6, %v6595_v0  ;;  %6826 = vrot.lane.b32.xlu0 %v4603_v3, %s12603_s14  ;;  %vm12610_vm8 = vcmask 359424   ;;  %v4688_v50 = vrot.slane %v4674_v51, %v7837_v5  ;;  %v4757_v34 = vcombine.low %v12620_v37, %v12619_v40  ;;  %v12635_v51 = vld [vmem:[#allocation152_spill] sm:$0xff] }
 0x5c4   :  { %v4737_v3 = vcombine.high %v4713_v63, %v11824_v17  ;;  %v4758_v58 = vcombine.high %v12620_v37, %v12619_v40 }
 0x5c5   :  { %v6599_v35 = vpop.permute.xlu1 %6598  ;;  %v6603_v9 = vpop.permute.xlu0 %6602  ;;  %v4721_v43 = vcombine.low %v4688_v50, %v4704_v31  ;;  %v4722_v24 = vcombine.high %v4688_v50, %v4704_v31  ;;  %v12636_v31 = vld [vmem:[#allocation52_spill] sm:$0xff] }
 0x5c6   :  { %v7488_v23 = vsel %vm12604_vm10, %v7487_v30, %v6599_v35  ;;  %vm12613_vm10 = vcmask 375808   ;;  %v12623_v30 = vld [vmem:[#allocation150_spill] sm:$0xff]  ;;  %v4772_v22 = vrot.slane %v4758_v58, %v7837_v5 }
 0x5c7   :  { %6830 = vrot.lane.b32.xlu1 %v4600_v29, %s12605_s17  ;;  %v7489_v61 = vsel %vm12606_vm11, %v7488_v23, %v6603_v9  ;;  %6834 = vrot.lane.b32.xlu0 %v4604_v55, %s12429_s18  ;;  %vm12614_vm11 = vcmask 392192   ;;  %v4720_v29 = vrot.slane %v4706_v47, %v8264_v56  ;;  %v4741_v35 = vcombine.low %v12624_v49, %v12623_v30  ;;  %s12669_s18 = smov 100  }
 0x5c8   :  { %v4765_v9 = vrot.slane %v4757_v34, %v7837_v5 }
 0x5c9   :  { %v6607_v4 = vpop.permute.xlu1 %6606  ;;  %v6611_v33 = vpop.permute.xlu0 %6610  ;;  %v4738_v27 = vcombine.high %v4720_v29, %v11824_v17 }
 0x5ca   :  { %v7490_v36 = vsel %vm12609_vm9, %v7489_v61, %v6607_v4  ;;  %vm12615_vm9 = vcmask 408576   ;;  %v4729_v61 = vrot.slane %v4721_v43, %v8264_v56  ;;  %v4749_v4 = vrot.slane %v4741_v35, %v7837_v5 }
 0x5cb   :  { %6838 = vrot.lane.b32.xlu1 %v4645_v19, %s12432_s16  ;;  %v7491_v44 = vsel %vm12610_vm8, %v7490_v36, %v6611_v33  ;;  %6842 = vrot.lane.b32.xlu0 %v4669_v11, %s12320_s11  ;;  %vm12616_vm8 = vcmask 424960   ;;  %s12655_s11 = smov 90   ;;  %s12667_s16 = smov 98  }
 0x5cc   :  { %v4773_v60 = vcombine.low %v4749_v4, %v4765_v9  ;;  %v4739_v11 = vcombine.high %v4729_v61, %v11824_v17  ;;  %v4774_v46 = vcombine.high %v4749_v4, %v4765_v9  ;;  %v12645_v4 = vld [vmem:[#allocation104_spill] sm:$0xff] }
 0x5cd   :  { %v6615_v14 = vpop.permute.xlu1 %6614  ;;  %v6619_v42 = vpop.permute.xlu0 %6618 }
 0x5ce   :  { %v7492_v38 = vsel %vm12613_vm10, %v7491_v44, %v6615_v14  ;;  %vm12617_vm10 = vcmask 441344   ;;  %v4742_v44 = vcombine.high %v12624_v49, %v12623_v30  ;;  %v4810_v30 = vcombine.high %v12636_v31, %v12635_v51 }
 0x5cf   :  { %6846 = vrot.lane.b32.xlu1 %v4652_v1, %s12321_s12  ;;  %v7493_v32 = vsel %vm12614_vm11, %v7492_v38, %v6619_v42  ;;  %6850 = vrot.lane.b32.xlu0 %v4670_v59, %s12322_s15  ;;  %vm12618_vm11 = vcmask 457728   ;;  %v4736_v1 = vrot.slane %v4722_v24, %v8264_v56  ;;  %v4781_v42 = vrot.slane %v4773_v60, %v8264_v56  ;;  %s12657_s12 = smov 92   ;;  %s12663_s15 = smov 96  }
 0x5d0   :  { %v4756_v59 = vrot.slane %v4742_v44, %v7837_v5 }
 0x5d1   :  { %v6623_v57 = vpop.permute.xlu1 %6622  ;;  %v6627_v62 = vpop.permute.xlu0 %6626  ;;  %v4740_v38 = vcombine.high %v4736_v1, %v11824_v17 }
 0x5d2   :  { %v7494_v15 = vsel %vm12615_vm9, %v7493_v32, %v6623_v57  ;;  %vm12621_vm9 = vcmask 474112   ;;  %v4789_v32 = vcombine.low %v4756_v59, %v4772_v22  ;;  %v12632_v57 = vld [vmem:[#allocation102_spill] sm:$0xff]  ;;  %v4790_v47 = vcombine.high %v4756_v59, %v4772_v22 }
 0x5d3   :  { %6854 = vrot.lane.b32.xlu1 %v4661_v12, %s12167_s7  ;;  %v7495_v21 = vsel %vm12616_vm8, %v7494_v15, %v6627_v62  ;;  %6858 = vrot.lane.b32.xlu0 %v4671_v28, %s12170_s0  ;;  %vm12622_vm8 = vcmask 490496   ;;  %v4825_v20 = vcombine.low %v12632_v57, %v12631_v16  ;;  %v4805_v28 = vcombine.high %v4781_v42, %v11824_v17  ;;  %v12649_v22 = vld [vmem:[#allocation54_spill] sm:$0xff]  ;;  %s12653_s0 = smov 88  }
 0x5d4   :  { %v4797_v50 = vrot.slane %v4789_v32, %v8264_v56  ;;  %v4826_v34 = vcombine.high %v12632_v57, %v12631_v16 }
 0x5d5   :  { %v6631_v41 = vpop.permute.xlu1 %6630  ;;  %v6635_v25 = vpop.permute.xlu0 %6634 }
 0x5d6   :  { %v7496_v52 = vsel %vm12617_vm10, %v7495_v21, %v6631_v41  ;;  %vm12625_vm10 = vcmask 506880   ;;  %v4809_v41 = vcombine.low %v12636_v31, %v12635_v51  ;;  %v4840_v49 = vrot.slane %v4826_v34, %v7837_v5 }
 0x5d7   :  { %6862 = vrot.lane.b32.xlu1 %v4668_v48, %s12052_s13  ;;  %v7497_v45 = vsel %vm12618_vm11, %v7496_v52, %v6635_v25  ;;  %6866 = vrot.lane.b32.xlu0 %v4672_v7, %s12053_s9  ;;  %vm12626_vm11 = vcmask 523264   ;;  %v4788_v48 = vrot.slane %v4774_v46, %v8264_v56  ;;  %v4833_v25 = vrot.slane %v4825_v20, %v7837_v5  ;;  %s12659_s13 = smov 94  }
 0x5d8   :  { %v4817_v37 = vrot.slane %v4809_v41, %v7837_v5 }
 0x5d9   :  { %v6639_v10 = vpop.permute.xlu1 %6638  ;;  %v6643_v0 = vpop.permute.xlu0 %6642 }
 0x5da   :  { %v7498_v6 = vsel %vm12621_vm9, %v7497_v45, %v6639_v10  ;;  %vm12627_vm9 = vcmask 539648   ;;  %v4806_v45 = vcombine.high %v4788_v48, %v11824_v17  ;;  %v4841_v43 = vcombine.low %v4817_v37, %v4833_v25 }
 0x5db   :  { %6870 = vrot.lane.b32.xlu1 %v4713_v63, %s12056_s8  ;;  %v7499_v13 = vsel %vm12622_vm8, %v7498_v6, %v6643_v0  ;;  %6874 = vrot.lane.b32.xlu0 %v4737_v3, %s11972_s1  ;;  %vm12628_vm8 = vcmask 556032   ;;  %v4807_v3 = vcombine.high %v4797_v50, %v11824_v17  ;;  %s12641_s1 = smov 74   ;;  %v4842_v24 = vcombine.high %v4817_v37, %v4833_v25  ;;  %v12661_v37 = vld [vmem:[#allocation106_spill] sm:$0xff] }
 0x5dd   :  { %v6647_v23 = vpop.permute.xlu1 %6646  ;;  %v6651_v19 = vpop.permute.xlu0 %6650 }
 0x5de   :  { %v7500_v55 = vsel %vm12625_vm10, %v7499_v13, %v6647_v23  ;;  %vm12629_vm10 = vcmask 572416  }
 0x5df   :  { %6878 = vrot.lane.b32.xlu1 %v4720_v29, %s11973_s10  ;;  %v7501_v8 = vsel %vm12626_vm11, %v7500_v55, %v6651_v19  ;;  %6882 = vrot.lane.b32.xlu0 %v4738_v27, %s11864_s4  ;;  %vm12630_vm11 = vcmask 588800   ;;  %v4804_v29 = vrot.slane %v4790_v47, %v8264_v56  ;;  %v4849_v19 = vrot.slane %v4841_v43, %v8264_v56  ;;  %s7820_s4 = smov [#allocation5]  }
 0x5e1   :  { %v6655_v53 = vpop.permute.xlu1 %6654  ;;  %v6659_v33 = vpop.permute.xlu0 %6658  ;;  %v4808_v55 = vcombine.high %v4804_v29, %v11824_v17 }
 0x5e2   :  { %v7502_v36 = vsel %vm12627_vm9, %v7501_v8, %v6655_v53  ;;  %vm12633_vm9 = vcmask 605184   ;;  %v12644_v8 = vld [vmem:[#allocation201_spill] sm:$0xff] }
 0x5e3   :  { %6886 = vrot.lane.b32.xlu1 %v4729_v61, %s11865_s5  ;;  %v7503_v39 = vsel %vm12628_vm8, %v7502_v36, %v6659_v33  ;;  %6890 = vrot.lane.b32.xlu0 %v4739_v11, %s11866_s6  ;;  %vm12634_vm8 = vcmask 621568   ;;  %v4824_v61 = vrot.slane %v4810_v30, %v7837_v5  ;;  %v4893_v58 = vcombine.low %v12645_v4, %v12644_v8  ;;  %v12665_v30 = vld [vmem:[#allocation156_spill] sm:$0xff]  ;;  %s7622_s5 = sshll.u32 %s7820_s4, 4  ;;  %s7623_s5 = int_to_ptr.vmem [resolvable:$true] %s7622_s5 }
 0x5e4   :  { %v4873_v11 = vcombine.high %v4849_v19, %v11824_v17  ;;  %v4894_v16 = vcombine.high %v12645_v4, %v12644_v8  ;;  %s7729_s6 = scalar_lea.vmem %s7623_s5, 512  ;;  %p7734_p6 = scmp.lt.s32.totalorder %s7623_s5, %s7623_s5 }
 0x5e5   :  { %v6663_v54 = vpop.permute.xlu1 %6662  ;;  %v6667_v2 = vpop.permute.xlu0 %6666  ;;  %v4857_v60 = vcombine.low %v4824_v61, %v4840_v49  ;;  %v4858_v46 = vcombine.high %v4824_v61, %v4840_v49  ;;  %v12666_v49 = vld [vmem:[#allocation56_spill] sm:$0xff]  ;;  %p7730_p5 = scmp.ne.s32.totalorder %s7623_s5, %s7729_s6  ;;  %p7735_p7 = scmp.lt.s32.totalorder %s7729_s6, %s7729_s6 }
 0x5e6   :  { %v7504_v14 = vsel %vm12629_vm10, %v7503_v39, %v6663_v54  ;;  %vm12637_vm10 = vcmask 637952   ;;  %v12648_v39 = vld [vmem:[#allocation154_spill] sm:$0xff]  ;;  %v4908_v31 = vrot.slane %v4894_v16, %v7837_v5 }
 0x5e7   :  { %6894 = vrot.lane.b32.xlu1 %v4736_v1, %s11867_s3  ;;  %v7505_v12 = vsel %vm12630_vm11, %v7504_v14, %v6667_v2  ;;  %6898 = vrot.lane.b32.xlu0 %v4740_v38, %s11868_s2  ;;  %vm12638_vm11 = vcmask 654336   ;;  %v4856_v1 = vrot.slane %v4842_v24, %v8264_v56  ;;  %v4877_v54 = vcombine.low %v12649_v22, %v12648_v39  ;;  %s12685_s2 = smov 124   ;;  %s12686_s3 = smov 126  }
 0x5e8   :  { %v4901_v2 = vrot.slane %v4893_v58, %v7837_v5  ;;  %v4878_v51 = vcombine.high %v12649_v22, %v12648_v39  ;;  %v4946_v39 = vcombine.high %v12666_v49, %v12665_v30  ;;  %p7736_p8 = por %p7735_p7, %p7734_p6 }
 0x5e9   :  { %v6671_v26 = vpop.permute.xlu1 %6670  ;;  %v6675_v62 = vpop.permute.xlu0 %6674  ;;  %v4874_v59 = vcombine.high %v4856_v1, %v11824_v17 }
 0x5ea   :  { %v7506_v15 = vsel %vm12633_vm9, %v7505_v12, %v6671_v26  ;;  %vm12639_vm9 = vcmask 670720   ;;  %v4865_v12 = vrot.slane %v4857_v60, %v8264_v56  ;;  %v4885_v26 = vrot.slane %v4877_v54, %v7837_v5  ;;  %p7737_p9 = pnand %p7736_p8, %p7730_p5 }
 0x5eb   :  { %6902 = vrot.lane.b32.xlu1 %v4781_v42, %s11869_s30  ;;  %v7507_v21 = vsel %vm12634_vm8, %v7506_v15, %v6675_v62  ;;  %6906 = vrot.lane.b32.xlu0 %v4805_v28, %s11870_s29  ;;  %vm12640_vm8 = vcmask 687104   ;;  %s12683_s29 = smov 120   ;;  %s12684_s30 = smov 122  }
 0x5ec   :  { %v4909_v20 = vcombine.low %v4885_v26, %v4901_v2  ;;  %v4875_v28 = vcombine.high %v4865_v12, %v11824_v17  ;;  %v4910_v47 = vcombine.high %v4885_v26, %v4901_v2 }
 0x5ed   :  { %v6679_v52 = vpop.permute.xlu1 %6678  ;;  %v6683_v63 = vpop.permute.xlu0 %6682 }
 0x5ee   :  { %v7508_v7 = vsel %vm12637_vm10, %v7507_v21, %v6679_v52  ;;  %vm12642_vm10 = vcmask 703488  }
 0x5ef   :  { %6910 = vrot.lane.b32.xlu1 %v4788_v48, %s11872_s28  ;;  %v7509_v40 = vsel %vm12638_vm11, %v7508_v7, %v6683_v63  ;;  %6914 = vrot.lane.b32.xlu0 %v4806_v45, %s11873_s27  ;;  %vm12643_vm11 = vcmask 719872   ;;  %v4872_v48 = vrot.slane %v4858_v46, %v8264_v56  ;;  %v4917_v63 = vrot.slane %v4909_v20, %v8264_v56  ;;  %s12681_s27 = smov 116   ;;  %s12682_s28 = smov 118  }
 0x5f1   :  { %v6687_v10 = vpop.permute.xlu1 %6686  ;;  %v6691_v0 = vpop.permute.xlu0 %6690  ;;  %v4876_v7 = vcombine.high %v4872_v48, %v11824_v17 }
 0x5f2   :  { %v7510_v6 = vsel %vm12639_vm9, %v7509_v40, %v6687_v10  ;;  %vm12646_vm9 = vcmask 736256   ;;  %v12660_v40 = vld [vmem:[#allocation203_spill] sm:$0xff] }
 0x5f3   :  { %6918 = vrot.lane.b32.xlu1 %v4797_v50, %s11876_s26  ;;  %v7511_v13 = vsel %vm12640_vm8, %v7510_v6, %v6691_v0  ;;  %6922 = vrot.lane.b32.xlu0 %v4807_v3, %s12641_s1  ;;  %vm12647_vm8 = vcmask 752640   ;;  %v4892_v50 = vrot.slane %v4878_v51, %v7837_v5  ;;  %v4961_v34 = vcombine.low %v12661_v37, %v12660_v40  ;;  %s12680_s26 = smov 114  }
 0x5f4   :  { %v4941_v3 = vcombine.high %v4917_v63, %v11824_v17  ;;  %v4962_v58 = vcombine.high %v12661_v37, %v12660_v40 }
 0x5f5   :  { %v6695_v35 = vpop.permute.xlu1 %6694  ;;  %v6699_v9 = vpop.permute.xlu0 %6698  ;;  %v4925_v43 = vcombine.low %v4892_v50, %v4908_v31  ;;  %v4926_v24 = vcombine.high %v4892_v50, %v4908_v31 }
 0x5f6   :  { %v7512_v23 = vsel %vm12642_vm10, %v7511_v13, %v6695_v35  ;;  %vm12650_vm10 = vcmask 769024   ;;  %v4945_v35 = vcombine.low %v12666_v49, %v12665_v30  ;;  %v4976_v22 = vrot.slane %v4962_v58, %v7837_v5 }
 0x5f7   :  { %6926 = vrot.lane.b32.xlu1 %v4804_v29, %s11879_s24  ;;  %v7513_v27 = vsel %vm12643_vm11, %v7512_v23, %v6699_v9  ;;  %6930 = vrot.lane.b32.xlu0 %v4808_v55, %s12497_s25  ;;  %vm12651_vm11 = vcmask 785408   ;;  %v4924_v29 = vrot.slane %v4910_v47, %v8264_v56  ;;  %v4969_v9 = vrot.slane %v4961_v34, %v7837_v5  ;;  %s12678_s24 = smov 110   ;;  %s12679_s25 = smov 112  }
 0x5f8   :  { %v4933_v61 = vrot.slane %v4925_v43, %v8264_v56  ;;  %v4953_v4 = vrot.slane %v4945_v35, %v7837_v5 }
 0x5f9   :  { %v6703_v53 = vpop.permute.xlu1 %6702  ;;  %v6707_v33 = vpop.permute.xlu0 %6706 }
 0x5fa   :  { %v7514_v36 = vsel %vm12646_vm9, %v7513_v27, %v6703_v53  ;;  %vm12652_vm9 = vcmask 801792   ;;  %v4942_v27 = vcombine.high %v4924_v29, %v11824_v17  ;;  %v4977_v60 = vcombine.low %v4953_v4, %v4969_v9 }
 0x5fb   :  { %6934 = vrot.lane.b32.xlu1 %v4849_v19, %s11884_s22  ;;  %v7515_v44 = vsel %vm12647_vm8, %v7514_v36, %v6707_v33  ;;  %6938 = vrot.lane.b32.xlu0 %v4873_v11, %s11887_s21  ;;  %vm12654_vm8 = vcmask 818176   ;;  %v4943_v11 = vcombine.high %v4933_v61, %v11824_v17  ;;  %s12673_s21 = smov 104   ;;  %s12675_s22 = smov 106   ;;  %v4978_v46 = vcombine.high %v4953_v4, %v4969_v9 }
 0x5fd   :  { %v6711_v14 = vpop.permute.xlu1 %6710  ;;  %v6715_v42 = vpop.permute.xlu0 %6714 }
 0x5fe   :  { %v7516_v38 = vsel %vm12650_vm10, %v7515_v44, %v6711_v14  ;;  %vm12656_vm10 = vcmask 834560  }
 0x5ff   :  { %6942 = vrot.lane.b32.xlu1 %v4856_v1, %s12344_s23  ;;  %v7517_v32 = vsel %vm12651_vm11, %v7516_v38, %v6715_v42  ;;  %6946 = vrot.lane.b32.xlu0 %v4874_v59, %s11890_s19  ;;  %vm12658_vm11 = vcmask 850944   ;;  %s12671_s19 = smov 102   ;;  %v4940_v1 = vrot.slane %v4926_v24, %v8264_v56  ;;  %v4985_v42 = vrot.slane %v4977_v60, %v8264_v56  ;;  %s12677_s23 = smov 108  }
 0x601   :  { %v6719_v57 = vpop.permute.xlu1 %6718  ;;  %v6723_v62 = vpop.permute.xlu0 %6722  ;;  %v4944_v38 = vcombine.high %v4940_v1, %v11824_v17  ;;  %v5009_v20 = vcombine.high %v4985_v42, %v11824_v17 }
 0x602   :  { %v7518_v15 = vsel %vm12652_vm9, %v7517_v32, %v6719_v57  ;;  %vm12662_vm9 = vcmask 867328  }
 0x603   :  { %6950 = vrot.lane.b32.xlu1 %v4865_v12, %s12653_s0  ;;  %v7519_v21 = vsel %vm12654_vm8, %v7518_v15, %v6723_v62  ;;  %6954 = vrot.lane.b32.xlu0 %v4875_v28, %s12655_s11  ;;  %vm12664_vm8 = vcmask 883712   ;;  %v4960_v12 = vrot.slane %v4946_v39, %v7837_v5  ;;  %v4992_v15 = vrot.slane %v4978_v46, %v8264_v56 }
 0x605   :  { %v6727_v41 = vpop.permute.xlu1 %6726  ;;  %v6731_v25 = vpop.permute.xlu0 %6730  ;;  %v4993_v26 = vcombine.low %v4960_v12, %v4976_v22  ;;  %v5010_v51 = vcombine.high %v4992_v15, %v11824_v17 }
 0x606   :  { %v7520_v52 = vsel %vm12656_vm10, %v7519_v21, %v6727_v41  ;;  %vm12668_vm10 = vcmask 900096  }
 0x607   :  { %6958 = vrot.lane.b32.xlu1 %v4872_v48, %s12657_s12  ;;  %v7521_v45 = vsel %vm12658_vm11, %v7520_v52, %v6731_v25  ;;  %6962 = vrot.lane.b32.xlu0 %v4876_v7, %s12659_s13  ;;  %vm12670_vm11 = vcmask 916480   ;;  %v4994_v48 = vcombine.high %v4960_v12, %v4976_v22  ;;  %v5001_v31 = vrot.slane %v4993_v26, %v8264_v56 }
 0x609   :  { %v6735_v10 = vpop.permute.xlu1 %6734  ;;  %v6739_v0 = vpop.permute.xlu0 %6738  ;;  %v5011_v7 = vcombine.high %v5001_v31, %v11824_v17 }
 0x60a   :  { %v7522_v6 = vsel %vm12662_vm9, %v7521_v45, %v6735_v10  ;;  %vm12672_vm9 = vcmask 932864  }
 0x60b   :  { %6966 = vrot.lane.b32.xlu1 %v4917_v63, %s12663_s15  ;;  %v7523_v13 = vsel %vm12664_vm8, %v7522_v6, %v6739_v0  ;;  %6970 = vrot.lane.b32.xlu0 %v4941_v3, %s12667_s16  ;;  %vm12674_vm8 = vcmask 949248   ;;  %v5008_v63 = vrot.slane %v4994_v48, %v8264_v56 }
 0x60d   :  { %v6743_v23 = vpop.permute.xlu1 %6742  ;;  %v6747_v19 = vpop.permute.xlu0 %6746  ;;  %v5012_v37 = vcombine.high %v5008_v63, %v11824_v17 }
 0x60e   :  { %v7524_v55 = vsel %vm12668_vm10, %v7523_v13, %v6743_v23  ;;  %vm12676_vm10 = vcmask 965632  }
 0x60f   :  { %6974 = vrot.lane.b32.xlu1 %v4924_v29, %s12669_s18  ;;  %v7525_v8 = vsel %vm12670_vm11, %v7524_v55, %v6747_v19  ;;  %6978 = vrot.lane.b32.xlu0 %v4942_v27, %s12671_s19  ;;  %vm12695_vm11 = vcmask 277504  }
 0x611   :  { %v6751_v53 = vpop.permute.xlu1 %6750  ;;  %v6755_v33 = vpop.permute.xlu0 %6754 }
 0x612   :  { %v7526_v36 = vsel %vm12672_vm9, %v7525_v8, %v6751_v53  ;;  %vm12696_vm9 = vcmask 293888  }
 0x613   :  { %6982 = vrot.lane.b32.xlu1 %v4933_v61, %s12673_s21  ;;  %v7527_v44 = vsel %vm12674_vm8, %v7526_v36, %v6755_v33  ;;  %6986 = vrot.lane.b32.xlu0 %v4943_v11, %s12675_s22  ;;  %vm12697_vm8 = vcmask 310272  }
 0x615   :  { %v6759_v54 = vpop.permute.xlu1 %6758  ;;  %v6763_v2 = vpop.permute.xlu0 %6762 }
 0x616   :  { %v7528_v14 = vsel %vm12676_vm10, %v7527_v44, %v6759_v54  ;;  %vm12698_vm10 = vcmask 326656  }
 0x617   :  { %6990 = vrot.lane.b32.xlu1 %v4940_v1, %s12677_s23  ;;  %v7529_v59 = vsel %vm7147_vm15, %v7528_v14, %v6763_v2  ;;  %6994 = vrot.lane.b32.xlu0 %v4944_v38, %s12678_s24 }
 0x619   :  { %v6767_v32 = vpop.permute.xlu1 %6766  ;;  %v6771_v57 = vpop.permute.xlu0 %6770 }
 0x61a   :  { %v7530_v16 = vsel %vm7149_vm12, %v7529_v59, %v6767_v32 }
 0x61b   :  { %6998 = vrot.lane.b32.xlu1 %v4985_v42, %s12679_s25  ;;  %v7531_v62 = vsel %vm7151_vm13, %v7530_v16, %v6771_v57  ;;  %7002 = vrot.lane.b32.xlu0 %v5009_v20, %s12680_s26 }
 0x61d   :  { %v6775_v28 = vpop.permute.xlu1 %6774  ;;  %v6779_v21 = vpop.permute.xlu0 %6778 }
 0x61e   :  { %v11182_v5 = vsel %vm7153_vm14, %v7531_v62, %v6775_v28  ;;  %v7533_v41 = vsel %vm7029_vm0, %v10915_v18, %v6779_v21  ;;  %vm12687_vm0 = vcmask 146432  }
 0x61f   :  { %7006 = vrot.lane.b32.xlu1 %v4992_v15, %s12681_s27  ;;  %7010 = vrot.lane.b32.xlu0 %v5010_v51, %s12682_s28 }
 0x621   :  { %v6783_v47 = vpop.permute.xlu1 %6782  ;;  %v6787_v25 = vpop.permute.xlu0 %6786 }
 0x622   :  { %v7534_v52 = vsel %vm7031_vm1, %v7533_v41, %v6783_v47  ;;  %vm12688_vm1 = vcmask 162816  }
 0x623   :  { %7014 = vrot.lane.b32.xlu1 %v5001_v31, %s12683_s29  ;;  %v7535_v45 = vsel %vm7033_vm2, %v7534_v52, %v6787_v25  ;;  %7018 = vrot.lane.b32.xlu0 %v5011_v7, %s12684_s30  ;;  %vm12689_vm2 = vcmask 179200  }
 0x625   :  { %v6791_v50 = vpop.permute.xlu1 %6790  ;;  %v6795_v18 = vpop.permute.xlu0 %6794 }
 0x626   :  { %v7536_v40 = vsel %vm7035_vm3, %v7535_v45, %v6791_v50  ;;  %vm12690_vm3 = vcmask 195584  }
 0x627   :  { %7022 = vrot.lane.b32.xlu1 %v5008_v63, %s12685_s2  ;;  %v7537_v34 = vsel %vm7037_vm4, %v7536_v40, %v6795_v18  ;;  %7026 = vrot.lane.b32.xlu0 %v5012_v37, %s12686_s3  ;;  %vm12691_vm4 = vcmask 211968  }
 0x629   :  { %v6799_v10 = vpop.permute.xlu1 %6798  ;;  %v6803_v43 = vpop.permute.xlu0 %6802 }
 0x62a   :  { %v7538_v56 = vsel %vm7039_vm5, %v7537_v34, %v6799_v10  ;;  %vm12692_vm5 = vcmask 228352  }
 0x62b   :  { %v7539_v6 = vsel %vm7041_vm6, %v7538_v56, %v6803_v43  ;;  %vm12693_vm6 = vcmask 244736  }
 0x62d   :  { %v6807_v0 = vpop.permute.xlu1 %6806  ;;  %v6811_v29 = vpop.permute.xlu0 %6810 }
 0x62e   :  { %v7540_v3 = vsel %vm7043_vm7, %v7539_v6, %v6807_v0  ;;  %vm12694_vm7 = vcmask 261120  }
 0x62f   :  { %v7541_v13 = vsel %vm12687_vm0, %v7540_v3, %v6811_v29  ;;  %vm12699_vm0 = vcmask 343040  }
 0x631   :  { %v6815_v30 = vpop.permute.xlu1 %6814  ;;  %v6819_v49 = vpop.permute.xlu0 %6818 }
 0x632   :  { %v7542_v17 = vsel %vm12688_vm1, %v7541_v13, %v6815_v30  ;;  %vm12700_vm1 = vcmask 359424  }
 0x633   :  { %v7543_v35 = vsel %vm12689_vm2, %v7542_v17, %v6819_v49  ;;  %vm12701_vm2 = vcmask 375808  }
 0x635   :  { %v6823_v24 = vpop.permute.xlu1 %6822  ;;  %v6827_v9 = vpop.permute.xlu0 %6826 }
 0x636   :  { %v7544_v23 = vsel %vm12690_vm3, %v7543_v35, %v6823_v24  ;;  %vm12702_vm3 = vcmask 392192  }
 0x637   :  { %v7545_v55 = vsel %vm12691_vm4, %v7544_v23, %v6827_v9  ;;  %vm12703_vm4 = vcmask 408576  }
 0x639   :  { %v6831_v19 = vpop.permute.xlu1 %6830  ;;  %v6835_v61 = vpop.permute.xlu0 %6834 }
 0x63a   :  { %v7546_v27 = vsel %vm12692_vm5, %v7545_v55, %v6831_v19  ;;  %vm12704_vm5 = vcmask 424960  }
 0x63b   :  { %v7547_v8 = vsel %vm12693_vm6, %v7546_v27, %v6835_v61  ;;  %vm12705_vm6 = vcmask 441344  }
 0x63d   :  { %v6839_v4 = vpop.permute.xlu1 %6838  ;;  %v6843_v53 = vpop.permute.xlu0 %6842 }
 0x63e   :  { %v7548_v58 = vsel %vm12694_vm7, %v7547_v8, %v6839_v4  ;;  %vm12706_vm7 = vcmask 457728  }
 0x63f   :  { %v7549_v60 = vsel %vm12695_vm11, %v7548_v58, %v6843_v53  ;;  %vm12707_vm11 = vcmask 474112  }
 0x641   :  { %v6847_v36 = vpop.permute.xlu1 %6846  ;;  %v6851_v11 = vpop.permute.xlu0 %6850 }
 0x642   :  { %v7550_v33 = vsel %vm12696_vm9, %v7549_v60, %v6847_v36  ;;  %vm12708_vm9 = vcmask 490496  }
 0x643   :  { %v7551_v1 = vsel %vm12697_vm8, %v7550_v33, %v6851_v11  ;;  %vm12709_vm8 = vcmask 506880  }
 0x645   :  { %v6855_v44 = vpop.permute.xlu1 %6854  ;;  %v6859_v22 = vpop.permute.xlu0 %6858 }
 0x646   :  { %v7552_v39 = vsel %vm12698_vm10, %v7551_v1, %v6855_v44  ;;  %vm12710_vm10 = vcmask 523264  }
 0x647   :  { %v7553_v54 = vsel %vm12699_vm0, %v7552_v39, %v6859_v22  ;;  %vm12711_vm0 = vcmask 539648  }
 0x649   :  { %v6863_v46 = vpop.permute.xlu1 %6862  ;;  %v6867_v2 = vpop.permute.xlu0 %6866 }
 0x64a   :  { %v7554_v14 = vsel %vm12700_vm1, %v7553_v54, %v6863_v46  ;;  %vm12712_vm1 = vcmask 556032  }
 0x64b   :  { %v7555_v38 = vsel %vm12701_vm2, %v7554_v14, %v6867_v2  ;;  %vm12713_vm2 = vcmask 572416  }
 0x64d   :  { %v6871_v42 = vpop.permute.xlu1 %6870  ;;  %v6875_v12 = vpop.permute.xlu0 %6874 }
 0x64e   :  { %v7556_v59 = vsel %vm12702_vm3, %v7555_v38, %v6871_v42  ;;  %vm12714_vm3 = vcmask 588800  }
 0x64f   :  { %v7557_v32 = vsel %vm12703_vm4, %v7556_v59, %v6875_v12  ;;  %vm12715_vm4 = vcmask 605184  }
 0x651   :  { %v6879_v26 = vpop.permute.xlu1 %6878  ;;  %v6883_v57 = vpop.permute.xlu0 %6882 }
 0x652   :  { %v7558_v16 = vsel %vm12704_vm5, %v7557_v32, %v6879_v26  ;;  %vm12716_vm5 = vcmask 621568  }
 0x653   :  { %v7559_v20 = vsel %vm12705_vm6, %v7558_v16, %v6883_v57  ;;  %vm12717_vm6 = vcmask 637952  }
 0x655   :  { %v6887_v15 = vpop.permute.xlu1 %6886  ;;  %v6891_v28 = vpop.permute.xlu0 %6890 }
 0x656   :  { %v7560_v62 = vsel %vm12706_vm7, %v7559_v20, %v6887_v15  ;;  %vm12718_vm7 = vcmask 654336  }
 0x657   :  { %v7561_v48 = vsel %vm12707_vm11, %v7560_v62, %v6891_v28  ;;  %vm12719_vm11 = vcmask 670720  }
 0x659   :  { %v6895_v21 = vpop.permute.xlu1 %6894  ;;  %v6899_v31 = vpop.permute.xlu0 %6898 }
 0x65a   :  { %v7562_v51 = vsel %vm12708_vm9, %v7561_v48, %v6895_v21  ;;  %vm12720_vm9 = vcmask 687104  }
 0x65b   :  { %v7563_v41 = vsel %vm12709_vm8, %v7562_v51, %v6899_v31  ;;  %vm12721_vm8 = vcmask 703488  }
 0x65d   :  { %v6903_v47 = vpop.permute.xlu1 %6902  ;;  %v6907_v25 = vpop.permute.xlu0 %6906 }
 0x65e   :  { %v7564_v52 = vsel %vm12710_vm10, %v7563_v41, %v6903_v47  ;;  %vm12722_vm10 = vcmask 719872  }
 0x65f   :  { %v7565_v7 = vsel %vm12711_vm0, %v7564_v52, %v6907_v25  ;;  %vm12723_vm0 = vcmask 736256  }
 0x661   :  { %v6911_v63 = vpop.permute.xlu1 %6910  ;;  %v6915_v50 = vpop.permute.xlu0 %6914 }
 0x662   :  { %v7566_v45 = vsel %vm12712_vm1, %v7565_v7, %v6911_v63  ;;  %vm12724_vm1 = vcmask 752640  }
 0x663   :  { %v7567_v40 = vsel %vm12713_vm2, %v7566_v45, %v6915_v50  ;;  %vm12725_vm2 = vcmask 769024  }
 0x665   :  { %v6919_v18 = vpop.permute.xlu1 %6918  ;;  %v6923_v34 = vpop.permute.xlu0 %6922 }
 0x666   :  { %v7568_v37 = vsel %vm12714_vm3, %v7567_v40, %v6919_v18  ;;  %vm12726_vm3 = vcmask 785408  }
 0x667   :  { %v7569_v10 = vsel %vm12715_vm4, %v7568_v37, %v6923_v34  ;;  %vm12727_vm4 = vcmask 801792  }
 0x669   :  { %v6927_v56 = vpop.permute.xlu1 %6926  ;;  %v6931_v6 = vpop.permute.xlu0 %6930 }
 0x66a   :  { %v7570_v43 = vsel %vm12716_vm5, %v7569_v10, %v6927_v56  ;;  %vm12728_vm5 = vcmask 818176  }
 0x66b   :  { %v7571_v0 = vsel %vm12717_vm6, %v7570_v43, %v6931_v6  ;;  %vm12729_vm6 = vcmask 834560  }
 0x66d   :  { %v6935_v3 = vpop.permute.xlu1 %6934  ;;  %v6939_v13 = vpop.permute.xlu0 %6938 }
 0x66e   :  { %v7572_v29 = vsel %vm12718_vm7, %v7571_v0, %v6935_v3  ;;  %vm12730_vm7 = vcmask 850944  }
 0x66f   :  { %v7573_v30 = vsel %vm12719_vm11, %v7572_v29, %v6939_v13  ;;  %vm12731_vm11 = vcmask 867328  }
 0x671   :  { %v6943_v17 = vpop.permute.xlu1 %6942  ;;  %v6947_v35 = vpop.permute.xlu0 %6946 }
 0x672   :  { %v7574_v49 = vsel %vm12720_vm9, %v7573_v30, %v6943_v17  ;;  %vm12732_vm9 = vcmask 883712  }
 0x673   :  { %v7575_v24 = vsel %vm12721_vm8, %v7574_v49, %v6947_v35  ;;  %vm12733_vm8 = vcmask 900096  }
 0x675   :  { %v6951_v23 = vpop.permute.xlu1 %6950  ;;  %v6955_v55 = vpop.permute.xlu0 %6954 }
 0x676   :  { %v7576_v9 = vsel %vm12722_vm10, %v7575_v24, %v6951_v23  ;;  %vm12734_vm10 = vcmask 916480  }
 0x677   :  { %v7577_v19 = vsel %vm12723_vm0, %v7576_v9, %v6955_v55  ;;  %vm12735_vm0 = vcmask 932864  }
 0x679   :  { %v6959_v27 = vpop.permute.xlu1 %6958  ;;  %v6963_v8 = vpop.permute.xlu0 %6962 }
 0x67a   :  { %v7578_v61 = vsel %vm12724_vm1, %v7577_v19, %v6959_v27  ;;  %vm12736_vm1 = vcmask 949248  }
 0x67b   :  { %v7579_v4 = vsel %vm12725_vm2, %v7578_v61, %v6963_v8  ;;  %vm12737_vm2 = vcmask 965632  }
 0x67d   :  { %v6967_v58 = vpop.permute.xlu1 %6966  ;;  %v6971_v60 = vpop.permute.xlu0 %6970 }
 0x67e   :  { %v7580_v53 = vsel %vm12726_vm3, %v7579_v4, %v6967_v58 }
 0x67f   :  { %v7581_v36 = vsel %vm12727_vm4, %v7580_v53, %v6971_v60 }
 0x681   :  { %v6975_v33 = vpop.permute.xlu1 %6974  ;;  %v6979_v1 = vpop.permute.xlu0 %6978 }
 0x682   :  { %v7582_v11 = vsel %vm12728_vm5, %v7581_v36, %v6975_v33 }
 0x683   :  { %v7583_v44 = vsel %vm12729_vm6, %v7582_v11, %v6979_v1 }
 0x685   :  { %v6983_v39 = vpop.permute.xlu1 %6982  ;;  %v6987_v54 = vpop.permute.xlu0 %6986 }
 0x686   :  { %v7584_v22 = vsel %vm12730_vm7, %v7583_v44, %v6983_v39 }
 0x687   :  { %v7585_v46 = vsel %vm12731_vm11, %v7584_v22, %v6987_v54 }
 0x689   :  { %v6991_v14 = vpop.permute.xlu1 %6990  ;;  %v6995_v38 = vpop.permute.xlu0 %6994 }
 0x68a   :  { %v7586_v2 = vsel %vm12732_vm9, %v7585_v46, %v6991_v14 }
 0x68b   :  { %v7587_v42 = vsel %vm12733_vm8, %v7586_v2, %v6995_v38 }
 0x68d   :  { %v6999_v59 = vpop.permute.xlu1 %6998  ;;  %v7003_v32 = vpop.permute.xlu0 %7002 }
 0x68e   :  { %v7588_v12 = vsel %vm12734_vm10, %v7587_v42, %v6999_v59 }
 0x68f   :  { %v7589_v26 = vsel %vm12735_vm0, %v7588_v12, %v7003_v32 }
 0x691   :  { %v7007_v16 = vpop.permute.xlu1 %7006  ;;  %v7011_v20 = vpop.permute.xlu0 %7010 }
 0x692   :  { %v7590_v57 = vsel %vm12736_vm1, %v7589_v26, %v7007_v16 }
 0x693   :  { %v7591_v15 = vsel %vm12737_vm2, %v7590_v57, %v7011_v20 }
 0x695   :  { %v7015_v62 = vpop.permute.xlu1 %7014  ;;  %v7019_v48 = vpop.permute.xlu0 %7018 }
 0x696   :  { %v7592_v28 = vsel %vm7147_vm15, %v7591_v15, %v7015_v62 }
 0x697   :  { %v7593_v21 = vsel %vm7149_vm12, %v7592_v28, %v7019_v48 }
 0x699   :  { %v7023_v51 = vpop.permute.xlu1 %7022  ;;  %v7027_v41 = vpop.permute.xlu0 %7026 }
 0x69a   :  { %v7594_v31 = vsel %vm7151_vm13, %v7593_v21, %v7023_v51 }
 0x69b   :  { %v7595_v47 = vsel %vm7153_vm14, %v7594_v31, %v7027_v41 }
 0x69c   :  { %v7607_v52 = vcombine.low %v11182_v5, %v7595_v47 }
 0x69e   :  { %7615 = vst [vmem:[#allocation5 + $0x18] sm:$0xff] %v7607_v52 }
 0x69f   :  { %7740 = shalt.err (!%p7737_p9)
}
 0x6a0   :  { %s12738_s9 = sld [smem:[#allocation220_spill]] }
 0x6a6   :  { %7625 = dma.vmem_to_hbm [thread:$0]  %s7623_s5, 512, %s12738_s9, [#allocation4]  }
 0x6a7   :  { %7751 = dma.done.wait [#allocation4], 512  }
 0x6a8   :  { %7752 = vsyncadd [#allocation4], 4294966784 }
 0x6a9   :  { %7629 = vsyncpa [#allocation3], 1 }
 0x6aa   :  { %7630 = vsyncpa [#allocation4], 1 }

</bundles_post_ra>
